<compile_context>
chip_gen: v7x
topology: tpu7x:2x2x1
jax: 0.10.0
libtpu: 0.0.40
codegen_flags: <defaults>
</compile_context>

<pallas_src>
import numpy as np

import jax
import jax.numpy as jnp
from jax.experimental import pallas as pl
from jax.experimental.pallas import tpu as pltpu


# ----------------------------------------------------------------------------
# Host-side constant matrices (static, depend only on shapes)
# ----------------------------------------------------------------------------
def _bilinear_matrix(in_size, out_size):
    """Row-interpolation matrix matching F.interpolate(bilinear, align_corners=False)."""
    w = np.zeros((out_size, in_size), dtype=np.float32)
    scale = in_size / out_size
    for o in range(out_size):
        src = scale * (o + 0.5) - 0.5
        src = max(src, 0.0)                       # PyTorch clamps negative coords
        i0 = min(int(np.floor(src)), in_size - 1)
        i1 = min(i0 + 1, in_size - 1)
        l1 = src - i0
        w[o, i0] += 1.0 - l1
        w[o, i1] += l1
    return w


def _interp_matrix(H, W, S0, S1):
    wy = _bilinear_matrix(H, S0)                  # (S0, H)
    wx = _bilinear_matrix(W, S1)                  # (S1, W)
    m = np.einsum("sh,tw->sthw", wy, wx)          # (S0, S1, H, W)
    return m.reshape(S0 * S1, H * W)


def _gather_matrix(S0, S1, n_pad):
    """G (N, 9*n_pad): column block k gathers the (dy,dx)=(k//3-1, k%3-1) shifted grid.

    conv3x3(h) = G @ [h@W_0; h@W_1; ...; h@W_8]   (zero padding outside the grid;
    padded rows n_pad > N in each block have zero columns).
    """
    N = S0 * S1
    G = np.zeros((N, 9 * n_pad), dtype=np.float32)
    for ky in range(3):
        for kx in range(3):
            k = ky * 3 + kx
            dy, dx = ky - 1, kx - 1
            for i in range(S0):
                si = i + dy
                if si < 0 or si >= S0:
                    continue
                for j in range(S1):
                    sj = j + dx
                    if sj < 0 or sj >= S1:
                        continue
                    G[i * S1 + j, k * n_pad + si * S1 + sj] = 1.0
    return G


def _round_up(x, m):
    return ((x + m - 1) // m) * m


# ----------------------------------------------------------------------------
# Fused Pallas kernel: resize -> conv1 -> (relu, conv2, relu, conv3, relu) -> conv4
# ----------------------------------------------------------------------------
def category_pre_branch_forward(f, branch):
    B, Cin, H, W = f.shape
    S0, S1 = branch.S
    Cout = branch.outdim
    N = S0 * S1
    HW = H * W
    N_pad = _round_up(N, 8)                       # sublane-aligned row blocks

    # Static host-side matrices.
    m = jnp.asarray(_interp_matrix(H, W, S0, S1))             # (N, HW)
    g = jnp.asarray(_gather_matrix(S0, S1, N_pad))            # (N, 9*N_pad)

    # Channels-last, spatial-flattened input: (B, HW, Cin).
    f_cl = jnp.transpose(f, (0, 2, 3, 1)).reshape(B, HW, Cin)

    def kernel(f_ref, m_ref, g_ref,
               w1_ref, b1_ref, w2_ref, b2_ref,
               w3_ref, b3_ref, w4_ref, b4_ref,
               p_ref, p1_ref, hw_ref):
        f32 = jnp.float32

        # Only needed when N is not sublane-aligned: keep padded rows at zero so
        # the (zero) padded columns of G never multiply garbage.
        if N_pad != N:
            hw_ref[...] = jnp.zeros_like(hw_ref)

        # Bilinear resize as one MXU matmul: (N, HW) @ (HW, Cin) -> (N, Cin)
        x = jnp.dot(m_ref[...], f_ref[...].astype(f32),
                    preferred_element_type=f32)

        def conv3x3(h, w_ref, b_ref):
            # Stage the 9 per-tap products into row blocks of the VMEM scratch,
            # then do a single deep gather matmul with G.
            for k in range(9):
                hw_ref[pl.ds(k * N_pad, N), :] = jnp.dot(
                    h, w_ref[k].astype(f32), preferred_element_type=f32)
            return (jnp.dot(g_ref[...], hw_ref[...], preferred_element_type=f32)
                    + b_ref[...].astype(f32))

        p1 = conv3x3(x, w1_ref, b1_ref)                       # cat_pre_conv1 (no act)
        p1_ref[...] = p1.astype(p1_ref.dtype)

        h = jnp.maximum(p1, 0.0)                              # F.relu(p1)
        h = jnp.maximum(conv3x3(h, w2_ref, b2_ref), 0.0)      # cat_pre_conv2 + ReLU
        h = jnp.maximum(conv3x3(h, w3_ref, b3_ref), 0.0)      # cat_pre_conv3 + ReLU
        p = (jnp.dot(h, w4_ref[...].astype(f32), preferred_element_type=f32)
             + b4_ref[...].astype(f32))                       # cat_pre_conv4 (1x1)
        p_ref[...] = p.astype(p_ref.dtype)

    p_flat, p1_flat = pl.pallas_call(
        kernel,
        grid=(B,),
        in_specs=[
            pl.BlockSpec((None, HW, Cin), lambda b: (b, 0, 0)),       # f (per-batch)
            pl.BlockSpec((N, HW), lambda b: (0, 0)),                  # interp matrix
            pl.BlockSpec((N, 9 * N_pad), lambda b: (0, 0)),           # gather matrix G
            pl.BlockSpec((9, Cin, Cout), lambda b: (0, 0, 0)),        # w1
            pl.BlockSpec((1, Cout), lambda b: (0, 0)),                # b1
            pl.BlockSpec((9, Cout, Cout), lambda b: (0, 0, 0)),       # w2
            pl.BlockSpec((1, Cout), lambda b: (0, 0)),                # b2
            pl.BlockSpec((9, Cout, Cout), lambda b: (0, 0, 0)),       # w3
            pl.BlockSpec((1, Cout), lambda b: (0, 0)),                # b3
            pl.BlockSpec((Cout, Cout), lambda b: (0, 0)),             # w4
            pl.BlockSpec((1, Cout), lambda b: (0, 0)),                # b4
        ],
        out_specs=(
            pl.BlockSpec((None, N, Cout), lambda b: (b, 0, 0)),       # p
            pl.BlockSpec((None, N, Cout), lambda b: (b, 0, 0)),       # p1
        ),
        out_shape=(
            jax.ShapeDtypeStruct((B, N, Cout), f.dtype),
            jax.ShapeDtypeStruct((B, N, Cout), f.dtype),
        ),
        scratch_shapes=[pltpu.VMEM((9 * N_pad, Cout), jnp.float32)],
        compiler_params=pltpu.CompilerParams(
            dimension_semantics=("parallel",),                        # megacore over batch
        ),
    )(f_cl, m, g,
      branch.w1, branch.b1, branch.w2, branch.b2,
      branch.w3, branch.b3, branch.w4, branch.b4)

    # Back to PyTorch NCHW layout.
    p = jnp.transpose(p_flat.reshape(B, S0, S1, Cout), (0, 3, 1, 2))
    p1 = jnp.transpose(p1_flat.reshape(B, S0, S1, Cout), (0, 3, 1, 2))
    return p, p1


# ----------------------------------------------------------------------------
# Module wrapper (weights in tap-major layout: (9, Cin, Cout); biases (1, Cout))
# ----------------------------------------------------------------------------
class CategoryPreBranch:
    def __init__(self, S, indim, outdim, conv_norm="", key=None):
        if conv_norm:
            # TODO(synk): get_norm normalization layers not implemented (unused here).
            raise NotImplementedError("conv_norm != '' is not supported")
        self.S = (int(S[0]), int(S[1]))
        self.indim = int(indim)
        self.outdim = int(outdim)

        key = jax.random.PRNGKey(0) if key is None else key
        k1, k2, k3, k4 = jax.random.split(key, 4)

        def msra3(k, cin, cout):   # kaiming_normal, mode='fan_out', relu, 3x3
            std = float(np.sqrt(2.0 / (cout * 9)))
            return std * jax.random.normal(k, (9, cin, cout), dtype=jnp.float32)

        def msra1(k, cin, cout):   # 1x1
            std = float(np.sqrt(2.0 / cout))
            return std * jax.random.normal(k, (cin, cout), dtype=jnp.float32)

        self.w1 = msra3(k1, indim, outdim)
        self.w2 = msra3(k2, outdim, outdim)
        self.w3 = msra3(k3, outdim, outdim)
        self.w4 = msra1(k4, outdim, outdim)
        zeros = jnp.zeros((1, outdim), dtype=jnp.float32)    # init_msra_fill: bias = 0
        self.b1, self.b2, self.b3, self.b4 = zeros, zeros, zeros, zeros

    def __call__(self, f):
        return category_pre_branch_forward(f, self)


# ----------------------------------------------------------------------------
# Pure-JAX reference (XLA conv) for a sanity check
# ----------------------------------------------------------------------------
def _conv3x3_ref(x_nchw, w_taps, bias):
    cin, cout = w_taps.shape[1], w_taps.shape[2]
    w = jnp.transpose(jnp.reshape(w_taps, (3, 3, cin, cout)), (3, 2, 0, 1))  # OIHW
    y = jax.lax.conv_general_dilated(
        x_nchw, w, window_strides=(1, 1), padding=((1, 1), (1, 1)),
        dimension_numbers=("NCHW", "OIHW", "NCHW"))
    return y + bias.reshape(1, cout, 1, 1)


def _reference_forward(f, branch):
    B, Cin, H, W = f.shape
    S0, S1 = branch.S
    Cout = branch.outdim
    m = jnp.asarray(_interp_matrix(H, W, S0, S1))
    f_cl = jnp.transpose(f, (0, 2, 3, 1)).reshape(B, H * W, Cin)
    x = jnp.einsum("nk,bkc->bnc", m, f_cl).reshape(B, S0, S1, Cin)
    x = jnp.transpose(x, (0, 3, 1, 2))                                 # NCHW
    p1 = _conv3x3_ref(x, branch.w1, branch.b1)
    h = jax.nn.relu(p1)
    h = jax.nn.relu(_conv3x3_ref(h, branch.w2, branch.b2))
    h = jax.nn.relu(_conv3x3_ref(h, branch.w3, branch.b3))
    p = jnp.einsum("bchw,cd->bdhw", h, branch.w4) + branch.b4.reshape(1, Cout, 1, 1)
    return p, p1


if __name__ == "__main__":
    B, Cin, H, W = 2, 4, 16, 16
    Cout = 32
    S = (8, 8)

    key = jax.random.PRNGKey(0)
    kf, kp = jax.random.split(key)
    f = jax.random.normal(kf, (B, Cin, H, W), dtype=jnp.float32)

    branch = CategoryPreBranch(S=S, indim=Cin, outdim=Cout, key=kp)

    p, p1 = branch(f)
    p = jax.block_until_ready(p)
    p1 = jax.block_until_ready(p1)

    assert p.shape == (B, Cout, S[0], S[1]) and p1.shape == (B, Cout, S[0], S[1])
    assert bool(jnp.all(jnp.isfinite(p))) and bool(jnp.all(jnp.isfinite(p1)))

    p_ref, p1_ref = _reference_forward(f, branch)
    assert bool(jnp.allclose(p1, p1_ref, atol=3e-2, rtol=3e-2))
    assert bool(jnp.allclose(p, p_ref, atol=3e-2, rtol=3e-2))

    print("KERNEL_OK")
</pallas_src>

<mosaic_0001>
module attributes {stable_mosaic.version = 11 : i64} {
  func.func @kernel(%arg0: i32, %arg1: memref<1x256x4xf32, #tpu.memory_space<vmem>>, %arg2: memref<64x256xf32, #tpu.memory_space<vmem>>, %arg3: memref<64x576xf32, #tpu.memory_space<vmem>>, %arg4: memref<9x4x32xf32, #tpu.memory_space<vmem>>, %arg5: memref<1x32xf32, #tpu.memory_space<vmem>>, %arg6: memref<9x32x32xf32, #tpu.memory_space<vmem>>, %arg7: memref<1x32xf32, #tpu.memory_space<vmem>>, %arg8: memref<9x32x32xf32, #tpu.memory_space<vmem>>, %arg9: memref<1x32xf32, #tpu.memory_space<vmem>>, %arg10: memref<32x32xf32, #tpu.memory_space<vmem>>, %arg11: memref<1x32xf32, #tpu.memory_space<vmem>>, %arg12: memref<1x64x32xf32, #tpu.memory_space<vmem>>, %arg13: memref<1x64x32xf32, #tpu.memory_space<vmem>>, %arg14: memref<576x32xf32, #tpu.memory_space<vmem>>) attributes {dimension_semantics = [#tpu.dimension_semantics<parallel>], iteration_bounds = array<i64: 2>, scalar_prefetch = 0 : i64, scratch_operands = 1 : i64, tpu.core_type = #tpu.core_type<tc>, window_params = [{transform_indices = @transform_0, window_bounds = array<i64: 1, 256, 4>}, {pipeline_mode = #tpu.pipeline_mode<synchronous>, transform_indices = @transform_1, window_bounds = array<i64: 64, 256>}, {pipeline_mode = #tpu.pipeline_mode<synchronous>, transform_indices = @transform_2, window_bounds = array<i64: 64, 576>}, {pipeline_mode = #tpu.pipeline_mode<synchronous>, transform_indices = @transform_3, window_bounds = array<i64: 9, 4, 32>}, {pipeline_mode = #tpu.pipeline_mode<synchronous>, transform_indices = @transform_4, window_bounds = array<i64: 1, 32>}, {pipeline_mode = #tpu.pipeline_mode<synchronous>, transform_indices = @transform_5, window_bounds = array<i64: 9, 32, 32>}, {pipeline_mode = #tpu.pipeline_mode<synchronous>, transform_indices = @transform_6, window_bounds = array<i64: 1, 32>}, {pipeline_mode = #tpu.pipeline_mode<synchronous>, transform_indices = @transform_7, window_bounds = array<i64: 9, 32, 32>}, {pipeline_mode = #tpu.pipeline_mode<synchronous>, transform_indices = @transform_8, window_bounds = array<i64: 1, 32>}, {pipeline_mode = #tpu.pipeline_mode<synchronous>, transform_indices = @transform_9, window_bounds = array<i64: 32, 32>}, {pipeline_mode = #tpu.pipeline_mode<synchronous>, transform_indices = @transform_10, window_bounds = array<i64: 1, 32>}, {transform_indices = @transform_11, window_bounds = array<i64: 1, 64, 32>}, {transform_indices = @transform_12, window_bounds = array<i64: 1, 64, 32>}]} {
    %c0 = arith.constant 0 : index
    %c0_0 = arith.constant 0 : index
    %0 = vector.load %arg2[%c0, %c0_0] : memref<64x256xf32, #tpu.memory_space<vmem>>, vector<64x256xf32>
    %c0_1 = arith.constant 0 : index
    %c0_2 = arith.constant 0 : index
    %c0_3 = arith.constant 0 : index
    %1 = vector.load %arg1[%c0_1, %c0_2, %c0_3] : memref<1x256x4xf32, #tpu.memory_space<vmem>>, vector<1x256x4xf32>
    %2 = vector.shape_cast %1 : vector<1x256x4xf32> to vector<256x4xf32>
    %cst = arith.constant dense<0.000000e+00> : vector<64x4xf32>
    %3 = tpu.matmul %0, %2, %cst {dimension_numbers = #tpu.dot_dimension_numbers<[1], [0], [0], [1], [0, 0, 1, 1], [], []>} : vector<64x256xf32>, vector<256x4xf32>, vector<64x4xf32> -> vector<64x4xf32>
    %c0_4 = arith.constant 0 : index
    %c0_5 = arith.constant 0 : index
    %c0_6 = arith.constant 0 : index
    %4 = vector.load %arg4[%c0_4, %c0_5, %c0_6] : memref<9x4x32xf32, #tpu.memory_space<vmem>>, vector<1x4x32xf32>
    %5 = vector.shape_cast %4 : vector<1x4x32xf32> to vector<4x32xf32>
    %cst_7 = arith.constant dense<0.000000e+00> : vector<64x32xf32>
    %6 = tpu.matmul %3, %5, %cst_7 {dimension_numbers = #tpu.dot_dimension_numbers<[1], [0], [0], [1], [0, 0, 1, 1], [], []>} : vector<64x4xf32>, vector<4x32xf32>, vector<64x32xf32> -> vector<64x32xf32>
    %c0_8 = arith.constant 0 : index
    %c0_9 = arith.constant 0 : index
    %7 = vector.load %arg14[%c0_8, %c0_9] : memref<576x32xf32, #tpu.memory_space<vmem>>, vector<64x32xf32>
    tpu.vector_store %arg14[%c0_8, %c0_9], %6 {strides = array<i32>} : memref<576x32xf32, #tpu.memory_space<vmem>>, vector<64x32xf32>,
    %c1 = arith.constant 1 : index
    %c0_10 = arith.constant 0 : index
    %c0_11 = arith.constant 0 : index
    %8 = vector.load %arg4[%c1, %c0_10, %c0_11] : memref<9x4x32xf32, #tpu.memory_space<vmem>>, vector<1x4x32xf32>
    %9 = vector.shape_cast %8 : vector<1x4x32xf32> to vector<4x32xf32>
    %cst_12 = arith.constant dense<0.000000e+00> : vector<64x32xf32>
    %10 = tpu.matmul %3, %9, %cst_12 {dimension_numbers = #tpu.dot_dimension_numbers<[1], [0], [0], [1], [0, 0, 1, 1], [], []>} : vector<64x4xf32>, vector<4x32xf32>, vector<64x32xf32> -> vector<64x32xf32>
    %c64 = arith.constant 64 : index
    %c0_13 = arith.constant 0 : index
    %11 = vector.load %arg14[%c64, %c0_13] : memref<576x32xf32, #tpu.memory_space<vmem>>, vector<64x32xf32>
    tpu.vector_store %arg14[%c64, %c0_13], %10 {strides = array<i32>} : memref<576x32xf32, #tpu.memory_space<vmem>>, vector<64x32xf32>,
    %c2 = arith.constant 2 : index
    %c0_14 = arith.constant 0 : index
    %c0_15 = arith.constant 0 : index
    %12 = vector.load %arg4[%c2, %c0_14, %c0_15] : memref<9x4x32xf32, #tpu.memory_space<vmem>>, vector<1x4x32xf32>
    %13 = vector.shape_cast %12 : vector<1x4x32xf32> to vector<4x32xf32>
    %cst_16 = arith.constant dense<0.000000e+00> : vector<64x32xf32>
    %14 = tpu.matmul %3, %13, %cst_16 {dimension_numbers = #tpu.dot_dimension_numbers<[1], [0], [0], [1], [0, 0, 1, 1], [], []>} : vector<64x4xf32>, vector<4x32xf32>, vector<64x32xf32> -> vector<64x32xf32>
    %c128 = arith.constant 128 : index
    %c0_17 = arith.constant 0 : index
    %15 = vector.load %arg14[%c128, %c0_17] : memref<576x32xf32, #tpu.memory_space<vmem>>, vector<64x32xf32>
    tpu.vector_store %arg14[%c128, %c0_17], %14 {strides = array<i32>} : memref<576x32xf32, #tpu.memory_space<vmem>>, vector<64x32xf32>,
    %c3 = arith.constant 3 : index
    %c0_18 = arith.constant 0 : index
    %c0_19 = arith.constant 0 : index
    %16 = vector.load %arg4[%c3, %c0_18, %c0_19] : memref<9x4x32xf32, #tpu.memory_space<vmem>>, vector<1x4x32xf32>
    %17 = vector.shape_cast %16 : vector<1x4x32xf32> to vector<4x32xf32>
    %cst_20 = arith.constant dense<0.000000e+00> : vector<64x32xf32>
    %18 = tpu.matmul %3, %17, %cst_20 {dimension_numbers = #tpu.dot_dimension_numbers<[1], [0], [0], [1], [0, 0, 1, 1], [], []>} : vector<64x4xf32>, vector<4x32xf32>, vector<64x32xf32> -> vector<64x32xf32>
    %c192 = arith.constant 192 : index
    %c0_21 = arith.constant 0 : index
    %19 = vector.load %arg14[%c192, %c0_21] : memref<576x32xf32, #tpu.memory_space<vmem>>, vector<64x32xf32>
    tpu.vector_store %arg14[%c192, %c0_21], %18 {strides = array<i32>} : memref<576x32xf32, #tpu.memory_space<vmem>>, vector<64x32xf32>,
    %c4 = arith.constant 4 : index
    %c0_22 = arith.constant 0 : index
    %c0_23 = arith.constant 0 : index
    %20 = vector.load %arg4[%c4, %c0_22, %c0_23] : memref<9x4x32xf32, #tpu.memory_space<vmem>>, vector<1x4x32xf32>
    %21 = vector.shape_cast %20 : vector<1x4x32xf32> to vector<4x32xf32>
    %cst_24 = arith.constant dense<0.000000e+00> : vector<64x32xf32>
    %22 = tpu.matmul %3, %21, %cst_24 {dimension_numbers = #tpu.dot_dimension_numbers<[1], [0], [0], [1], [0, 0, 1, 1], [], []>} : vector<64x4xf32>, vector<4x32xf32>, vector<64x32xf32> -> vector<64x32xf32>
    %c256 = arith.constant 256 : index
    %c0_25 = arith.constant 0 : index
    %23 = vector.load %arg14[%c256, %c0_25] : memref<576x32xf32, #tpu.memory_space<vmem>>, vector<64x32xf32>
    tpu.vector_store %arg14[%c256, %c0_25], %22 {strides = array<i32>} : memref<576x32xf32, #tpu.memory_space<vmem>>, vector<64x32xf32>,
    %c5 = arith.constant 5 : index
    %c0_26 = arith.constant 0 : index
    %c0_27 = arith.constant 0 : index
    %24 = vector.load %arg4[%c5, %c0_26, %c0_27] : memref<9x4x32xf32, #tpu.memory_space<vmem>>, vector<1x4x32xf32>
    %25 = vector.shape_cast %24 : vector<1x4x32xf32> to vector<4x32xf32>
    %cst_28 = arith.constant dense<0.000000e+00> : vector<64x32xf32>
    %26 = tpu.matmul %3, %25, %cst_28 {dimension_numbers = #tpu.dot_dimension_numbers<[1], [0], [0], [1], [0, 0, 1, 1], [], []>} : vector<64x4xf32>, vector<4x32xf32>, vector<64x32xf32> -> vector<64x32xf32>
    %c320 = arith.constant 320 : index
    %c0_29 = arith.constant 0 : index
    %27 = vector.load %arg14[%c320, %c0_29] : memref<576x32xf32, #tpu.memory_space<vmem>>, vector<64x32xf32>
    tpu.vector_store %arg14[%c320, %c0_29], %26 {strides = array<i32>} : memref<576x32xf32, #tpu.memory_space<vmem>>, vector<64x32xf32>,
    %c6 = arith.constant 6 : index
    %c0_30 = arith.constant 0 : index
    %c0_31 = arith.constant 0 : index
    %28 = vector.load %arg4[%c6, %c0_30, %c0_31] : memref<9x4x32xf32, #tpu.memory_space<vmem>>, vector<1x4x32xf32>
    %29 = vector.shape_cast %28 : vector<1x4x32xf32> to vector<4x32xf32>
    %cst_32 = arith.constant dense<0.000000e+00> : vector<64x32xf32>
    %30 = tpu.matmul %3, %29, %cst_32 {dimension_numbers = #tpu.dot_dimension_numbers<[1], [0], [0], [1], [0, 0, 1, 1], [], []>} : vector<64x4xf32>, vector<4x32xf32>, vector<64x32xf32> -> vector<64x32xf32>
    %c384 = arith.constant 384 : index
    %c0_33 = arith.constant 0 : index
    %31 = vector.load %arg14[%c384, %c0_33] : memref<576x32xf32, #tpu.memory_space<vmem>>, vector<64x32xf32>
    tpu.vector_store %arg14[%c384, %c0_33], %30 {strides = array<i32>} : memref<576x32xf32, #tpu.memory_space<vmem>>, vector<64x32xf32>,
    %c7 = arith.constant 7 : index
    %c0_34 = arith.constant 0 : index
    %c0_35 = arith.constant 0 : index
    %32 = vector.load %arg4[%c7, %c0_34, %c0_35] : memref<9x4x32xf32, #tpu.memory_space<vmem>>, vector<1x4x32xf32>
    %33 = vector.shape_cast %32 : vector<1x4x32xf32> to vector<4x32xf32>
    %cst_36 = arith.constant dense<0.000000e+00> : vector<64x32xf32>
    %34 = tpu.matmul %3, %33, %cst_36 {dimension_numbers = #tpu.dot_dimension_numbers<[1], [0], [0], [1], [0, 0, 1, 1], [], []>} : vector<64x4xf32>, vector<4x32xf32>, vector<64x32xf32> -> vector<64x32xf32>
    %c448 = arith.constant 448 : index
    %c0_37 = arith.constant 0 : index
    %35 = vector.load %arg14[%c448, %c0_37] : memref<576x32xf32, #tpu.memory_space<vmem>>, vector<64x32xf32>
    tpu.vector_store %arg14[%c448, %c0_37], %34 {strides = array<i32>} : memref<576x32xf32, #tpu.memory_space<vmem>>, vector<64x32xf32>,
    %c8 = arith.constant 8 : index
    %c0_38 = arith.constant 0 : index
    %c0_39 = arith.constant 0 : index
    %36 = vector.load %arg4[%c8, %c0_38, %c0_39] : memref<9x4x32xf32, #tpu.memory_space<vmem>>, vector<1x4x32xf32>
    %37 = vector.shape_cast %36 : vector<1x4x32xf32> to vector<4x32xf32>
    %cst_40 = arith.constant dense<0.000000e+00> : vector<64x32xf32>
    %38 = tpu.matmul %3, %37, %cst_40 {dimension_numbers = #tpu.dot_dimension_numbers<[1], [0], [0], [1], [0, 0, 1, 1], [], []>} : vector<64x4xf32>, vector<4x32xf32>, vector<64x32xf32> -> vector<64x32xf32>
    %c512 = arith.constant 512 : index
    %c0_41 = arith.constant 0 : index
    %39 = vector.load %arg14[%c512, %c0_41] : memref<576x32xf32, #tpu.memory_space<vmem>>, vector<64x32xf32>
    tpu.vector_store %arg14[%c512, %c0_41], %38 {strides = array<i32>} : memref<576x32xf32, #tpu.memory_space<vmem>>, vector<64x32xf32>,
    %c0_42 = arith.constant 0 : index
    %c0_43 = arith.constant 0 : index
    %40 = vector.load %arg3[%c0_42, %c0_43] : memref<64x576xf32, #tpu.memory_space<vmem>>, vector<64x576xf32>
    %c0_44 = arith.constant 0 : index
    %c0_45 = arith.constant 0 : index
    %41 = vector.load %arg14[%c0_44, %c0_45] : memref<576x32xf32, #tpu.memory_space<vmem>>, vector<576x32xf32>
    %cst_46 = arith.constant dense<0.000000e+00> : vector<64x32xf32>
    %42 = tpu.matmul %40, %41, %cst_46 {dimension_numbers = #tpu.dot_dimension_numbers<[1], [0], [0], [1], [0, 0, 1, 1], [], []>} : vector<64x576xf32>, vector<576x32xf32>, vector<64x32xf32> -> vector<64x32xf32>
    %c0_47 = arith.constant 0 : index
    %c0_48 = arith.constant 0 : index
    %43 = vector.load %arg5[%c0_47, %c0_48] : memref<1x32xf32, #tpu.memory_space<vmem>>, vector<1x32xf32>
    %44 = vector.broadcast %43 : vector<1x32xf32> to vector<64x32xf32>
    %45 = arith.addf %42, %44 : vector<64x32xf32>
    %c0_49 = arith.constant 0 : index
    %c0_50 = arith.constant 0 : index
    %c0_51 = arith.constant 0 : index
    %46 = vector.load %arg13[%c0_49, %c0_50, %c0_51] : memref<1x64x32xf32, #tpu.memory_space<vmem>>, vector<1x64x32xf32>
    %47 = vector.shape_cast %46 : vector<1x64x32xf32> to vector<64x32xf32>
    %48 = vector.shape_cast %45 : vector<64x32xf32> to vector<1x64x32xf32>
    tpu.vector_store %arg13[%c0_49, %c0_50, %c0_51], %48 {strides = array<i32>} : memref<1x64x32xf32, #tpu.memory_space<vmem>>, vector<1x64x32xf32>,
    %cst_52 = arith.constant 0.000000e+00 : f32
    %49 = vector.broadcast %cst_52 : f32 to vector<64x32xf32>
    %50 = arith.maximumf %45, %49 : vector<64x32xf32>
    %c0_53 = arith.constant 0 : index
    %c0_54 = arith.constant 0 : index
    %c0_55 = arith.constant 0 : index
    %51 = vector.load %arg6[%c0_53, %c0_54, %c0_55] : memref<9x32x32xf32, #tpu.memory_space<vmem>>, vector<1x32x32xf32>
    %52 = vector.shape_cast %51 : vector<1x32x32xf32> to vector<32x32xf32>
    %cst_56 = arith.constant dense<0.000000e+00> : vector<64x32xf32>
    %53 = tpu.matmul %50, %52, %cst_56 {dimension_numbers = #tpu.dot_dimension_numbers<[1], [0], [0], [1], [0, 0, 1, 1], [], []>} : vector<64x32xf32>, vector<32x32xf32>, vector<64x32xf32> -> vector<64x32xf32>
    %c0_57 = arith.constant 0 : index
    %c0_58 = arith.constant 0 : index
    %54 = vector.load %arg14[%c0_57, %c0_58] : memref<576x32xf32, #tpu.memory_space<vmem>>, vector<64x32xf32>
    tpu.vector_store %arg14[%c0_57, %c0_58], %53 {strides = array<i32>} : memref<576x32xf32, #tpu.memory_space<vmem>>, vector<64x32xf32>,
    %c1_59 = arith.constant 1 : index
    %c0_60 = arith.constant 0 : index
    %c0_61 = arith.constant 0 : index
    %55 = vector.load %arg6[%c1_59, %c0_60, %c0_61] : memref<9x32x32xf32, #tpu.memory_space<vmem>>, vector<1x32x32xf32>
    %56 = vector.shape_cast %55 : vector<1x32x32xf32> to vector<32x32xf32>
    %cst_62 = arith.constant dense<0.000000e+00> : vector<64x32xf32>
    %57 = tpu.matmul %50, %56, %cst_62 {dimension_numbers = #tpu.dot_dimension_numbers<[1], [0], [0], [1], [0, 0, 1, 1], [], []>} : vector<64x32xf32>, vector<32x32xf32>, vector<64x32xf32> -> vector<64x32xf32>
    %c64_63 = arith.constant 64 : index
    %c0_64 = arith.constant 0 : index
    %58 = vector.load %arg14[%c64_63, %c0_64] : memref<576x32xf32, #tpu.memory_space<vmem>>, vector<64x32xf32>
    tpu.vector_store %arg14[%c64_63, %c0_64], %57 {strides = array<i32>} : memref<576x32xf32, #tpu.memory_space<vmem>>, vector<64x32xf32>,
    %c2_65 = arith.constant 2 : index
    %c0_66 = arith.constant 0 : index
    %c0_67 = arith.constant 0 : index
    %59 = vector.load %arg6[%c2_65, %c0_66, %c0_67] : memref<9x32x32xf32, #tpu.memory_space<vmem>>, vector<1x32x32xf32>
    %60 = vector.shape_cast %59 : vector<1x32x32xf32> to vector<32x32xf32>
    %cst_68 = arith.constant dense<0.000000e+00> : vector<64x32xf32>
    %61 = tpu.matmul %50, %60, %cst_68 {dimension_numbers = #tpu.dot_dimension_numbers<[1], [0], [0], [1], [0, 0, 1, 1], [], []>} : vector<64x32xf32>, vector<32x32xf32>, vector<64x32xf32> -> vector<64x32xf32>
    %c128_69 = arith.constant 128 : index
    %c0_70 = arith.constant 0 : index
    %62 = vector.load %arg14[%c128_69, %c0_70] : memref<576x32xf32, #tpu.memory_space<vmem>>, vector<64x32xf32>
    tpu.vector_store %arg14[%c128_69, %c0_70], %61 {strides = array<i32>} : memref<576x32xf32, #tpu.memory_space<vmem>>, vector<64x32xf32>,
    %c3_71 = arith.constant 3 : index
    %c0_72 = arith.constant 0 : index
    %c0_73 = arith.constant 0 : index
    %63 = vector.load %arg6[%c3_71, %c0_72, %c0_73] : memref<9x32x32xf32, #tpu.memory_space<vmem>>, vector<1x32x32xf32>
    %64 = vector.shape_cast %63 : vector<1x32x32xf32> to vector<32x32xf32>
    %cst_74 = arith.constant dense<0.000000e+00> : vector<64x32xf32>
    %65 = tpu.matmul %50, %64, %cst_74 {dimension_numbers = #tpu.dot_dimension_numbers<[1], [0], [0], [1], [0, 0, 1, 1], [], []>} : vector<64x32xf32>, vector<32x32xf32>, vector<64x32xf32> -> vector<64x32xf32>
    %c192_75 = arith.constant 192 : index
    %c0_76 = arith.constant 0 : index
    %66 = vector.load %arg14[%c192_75, %c0_76] : memref<576x32xf32, #tpu.memory_space<vmem>>, vector<64x32xf32>
    tpu.vector_store %arg14[%c192_75, %c0_76], %65 {strides = array<i32>} : memref<576x32xf32, #tpu.memory_space<vmem>>, vector<64x32xf32>,
    %c4_77 = arith.constant 4 : index
    %c0_78 = arith.constant 0 : index
    %c0_79 = arith.constant 0 : index
    %67 = vector.load %arg6[%c4_77, %c0_78, %c0_79] : memref<9x32x32xf32, #tpu.memory_space<vmem>>, vector<1x32x32xf32>
    %68 = vector.shape_cast %67 : vector<1x32x32xf32> to vector<32x32xf32>
    %cst_80 = arith.constant dense<0.000000e+00> : vector<64x32xf32>
    %69 = tpu.matmul %50, %68, %cst_80 {dimension_numbers = #tpu.dot_dimension_numbers<[1], [0], [0], [1], [0, 0, 1, 1], [], []>} : vector<64x32xf32>, vector<32x32xf32>, vector<64x32xf32> -> vector<64x32xf32>
    %c256_81 = arith.constant 256 : index
    %c0_82 = arith.constant 0 : index
    %70 = vector.load %arg14[%c256_81, %c0_82] : memref<576x32xf32, #tpu.memory_space<vmem>>, vector<64x32xf32>
    tpu.vector_store %arg14[%c256_81, %c0_82], %69 {strides = array<i32>} : memref<576x32xf32, #tpu.memory_space<vmem>>, vector<64x32xf32>,
    %c5_83 = arith.constant 5 : index
    %c0_84 = arith.constant 0 : index
    %c0_85 = arith.constant 0 : index
    %71 = vector.load %arg6[%c5_83, %c0_84, %c0_85] : memref<9x32x32xf32, #tpu.memory_space<vmem>>, vector<1x32x32xf32>
    %72 = vector.shape_cast %71 : vector<1x32x32xf32> to vector<32x32xf32>
    %cst_86 = arith.constant dense<0.000000e+00> : vector<64x32xf32>
    %73 = tpu.matmul %50, %72, %cst_86 {dimension_numbers = #tpu.dot_dimension_numbers<[1], [0], [0], [1], [0, 0, 1, 1], [], []>} : vector<64x32xf32>, vector<32x32xf32>, vector<64x32xf32> -> vector<64x32xf32>
    %c320_87 = arith.constant 320 : index
    %c0_88 = arith.constant 0 : index
    %74 = vector.load %arg14[%c320_87, %c0_88] : memref<576x32xf32, #tpu.memory_space<vmem>>, vector<64x32xf32>
    tpu.vector_store %arg14[%c320_87, %c0_88], %73 {strides = array<i32>} : memref<576x32xf32, #tpu.memory_space<vmem>>, vector<64x32xf32>,
    %c6_89 = arith.constant 6 : index
    %c0_90 = arith.constant 0 : index
    %c0_91 = arith.constant 0 : index
    %75 = vector.load %arg6[%c6_89, %c0_90, %c0_91] : memref<9x32x32xf32, #tpu.memory_space<vmem>>, vector<1x32x32xf32>
    %76 = vector.shape_cast %75 : vector<1x32x32xf32> to vector<32x32xf32>
    %cst_92 = arith.constant dense<0.000000e+00> : vector<64x32xf32>
    %77 = tpu.matmul %50, %76, %cst_92 {dimension_numbers = #tpu.dot_dimension_numbers<[1], [0], [0], [1], [0, 0, 1, 1], [], []>} : vector<64x32xf32>, vector<32x32xf32>, vector<64x32xf32> -> vector<64x32xf32>
    %c384_93 = arith.constant 384 : index
    %c0_94 = arith.constant 0 : index
    %78 = vector.load %arg14[%c384_93, %c0_94] : memref<576x32xf32, #tpu.memory_space<vmem>>, vector<64x32xf32>
    tpu.vector_store %arg14[%c384_93, %c0_94], %77 {strides = array<i32>} : memref<576x32xf32, #tpu.memory_space<vmem>>, vector<64x32xf32>,
    %c7_95 = arith.constant 7 : index
    %c0_96 = arith.constant 0 : index
    %c0_97 = arith.constant 0 : index
    %79 = vector.load %arg6[%c7_95, %c0_96, %c0_97] : memref<9x32x32xf32, #tpu.memory_space<vmem>>, vector<1x32x32xf32>
    %80 = vector.shape_cast %79 : vector<1x32x32xf32> to vector<32x32xf32>
    %cst_98 = arith.constant dense<0.000000e+00> : vector<64x32xf32>
    %81 = tpu.matmul %50, %80, %cst_98 {dimension_numbers = #tpu.dot_dimension_numbers<[1], [0], [0], [1], [0, 0, 1, 1], [], []>} : vector<64x32xf32>, vector<32x32xf32>, vector<64x32xf32> -> vector<64x32xf32>
    %c448_99 = arith.constant 448 : index
    %c0_100 = arith.constant 0 : index
    %82 = vector.load %arg14[%c448_99, %c0_100] : memref<576x32xf32, #tpu.memory_space<vmem>>, vector<64x32xf32>
    tpu.vector_store %arg14[%c448_99, %c0_100], %81 {strides = array<i32>} : memref<576x32xf32, #tpu.memory_space<vmem>>, vector<64x32xf32>,
    %c8_101 = arith.constant 8 : index
    %c0_102 = arith.constant 0 : index
    %c0_103 = arith.constant 0 : index
    %83 = vector.load %arg6[%c8_101, %c0_102, %c0_103] : memref<9x32x32xf32, #tpu.memory_space<vmem>>, vector<1x32x32xf32>
    %84 = vector.shape_cast %83 : vector<1x32x32xf32> to vector<32x32xf32>
    %cst_104 = arith.constant dense<0.000000e+00> : vector<64x32xf32>
    %85 = tpu.matmul %50, %84, %cst_104 {dimension_numbers = #tpu.dot_dimension_numbers<[1], [0], [0], [1], [0, 0, 1, 1], [], []>} : vector<64x32xf32>, vector<32x32xf32>, vector<64x32xf32> -> vector<64x32xf32>
    %c512_105 = arith.constant 512 : index
    %c0_106 = arith.constant 0 : index
    %86 = vector.load %arg14[%c512_105, %c0_106] : memref<576x32xf32, #tpu.memory_space<vmem>>, vector<64x32xf32>
    tpu.vector_store %arg14[%c512_105, %c0_106], %85 {strides = array<i32>} : memref<576x32xf32, #tpu.memory_space<vmem>>, vector<64x32xf32>,
    %c0_107 = arith.constant 0 : index
    %c0_108 = arith.constant 0 : index
    %87 = vector.load %arg3[%c0_107, %c0_108] : memref<64x576xf32, #tpu.memory_space<vmem>>, vector<64x576xf32>
    %c0_109 = arith.constant 0 : index
    %c0_110 = arith.constant 0 : index
    %88 = vector.load %arg14[%c0_109, %c0_110] : memref<576x32xf32, #tpu.memory_space<vmem>>, vector<576x32xf32>
    %cst_111 = arith.constant dense<0.000000e+00> : vector<64x32xf32>
    %89 = tpu.matmul %87, %88, %cst_111 {dimension_numbers = #tpu.dot_dimension_numbers<[1], [0], [0], [1], [0, 0, 1, 1], [], []>} : vector<64x576xf32>, vector<576x32xf32>, vector<64x32xf32> -> vector<64x32xf32>
    %c0_112 = arith.constant 0 : index
    %c0_113 = arith.constant 0 : index
    %90 = vector.load %arg7[%c0_112, %c0_113] : memref<1x32xf32, #tpu.memory_space<vmem>>, vector<1x32xf32>
    %91 = vector.broadcast %90 : vector<1x32xf32> to vector<64x32xf32>
    %92 = arith.addf %89, %91 : vector<64x32xf32>
    %cst_114 = arith.constant 0.000000e+00 : f32
    %93 = vector.broadcast %cst_114 : f32 to vector<64x32xf32>
    %94 = arith.maximumf %92, %93 : vector<64x32xf32>
    %c0_115 = arith.constant 0 : index
    %c0_116 = arith.constant 0 : index
    %c0_117 = arith.constant 0 : index
    %95 = vector.load %arg8[%c0_115, %c0_116, %c0_117] : memref<9x32x32xf32, #tpu.memory_space<vmem>>, vector<1x32x32xf32>
    %96 = vector.shape_cast %95 : vector<1x32x32xf32> to vector<32x32xf32>
    %cst_118 = arith.constant dense<0.000000e+00> : vector<64x32xf32>
    %97 = tpu.matmul %94, %96, %cst_118 {dimension_numbers = #tpu.dot_dimension_numbers<[1], [0], [0], [1], [0, 0, 1, 1], [], []>} : vector<64x32xf32>, vector<32x32xf32>, vector<64x32xf32> -> vector<64x32xf32>
    %c0_119 = arith.constant 0 : index
    %c0_120 = arith.constant 0 : index
    %98 = vector.load %arg14[%c0_119, %c0_120] : memref<576x32xf32, #tpu.memory_space<vmem>>, vector<64x32xf32>
    tpu.vector_store %arg14[%c0_119, %c0_120], %97 {strides = array<i32>} : memref<576x32xf32, #tpu.memory_space<vmem>>, vector<64x32xf32>,
    %c1_121 = arith.constant 1 : index
    %c0_122 = arith.constant 0 : index
    %c0_123 = arith.constant 0 : index
    %99 = vector.load %arg8[%c1_121, %c0_122, %c0_123] : memref<9x32x32xf32, #tpu.memory_space<vmem>>, vector<1x32x32xf32>
    %100 = vector.shape_cast %99 : vector<1x32x32xf32> to vector<32x32xf32>
    %cst_124 = arith.constant dense<0.000000e+00> : vector<64x32xf32>
    %101 = tpu.matmul %94, %100, %cst_124 {dimension_numbers = #tpu.dot_dimension_numbers<[1], [0], [0], [1], [0, 0, 1, 1], [], []>} : vector<64x32xf32>, vector<32x32xf32>, vector<64x32xf32> -> vector<64x32xf32>
    %c64_125 = arith.constant 64 : index
    %c0_126 = arith.constant 0 : index
    %102 = vector.load %arg14[%c64_125, %c0_126] : memref<576x32xf32, #tpu.memory_space<vmem>>, vector<64x32xf32>
    tpu.vector_store %arg14[%c64_125, %c0_126], %101 {strides = array<i32>} : memref<576x32xf32, #tpu.memory_space<vmem>>, vector<64x32xf32>,
    %c2_127 = arith.constant 2 : index
    %c0_128 = arith.constant 0 : index
    %c0_129 = arith.constant 0 : index
    %103 = vector.load %arg8[%c2_127, %c0_128, %c0_129] : memref<9x32x32xf32, #tpu.memory_space<vmem>>, vector<1x32x32xf32>
    %104 = vector.shape_cast %103 : vector<1x32x32xf32> to vector<32x32xf32>
    %cst_130 = arith.constant dense<0.000000e+00> : vector<64x32xf32>
    %105 = tpu.matmul %94, %104, %cst_130 {dimension_numbers = #tpu.dot_dimension_numbers<[1], [0], [0], [1], [0, 0, 1, 1], [], []>} : vector<64x32xf32>, vector<32x32xf32>, vector<64x32xf32> -> vector<64x32xf32>
    %c128_131 = arith.constant 128 : index
    %c0_132 = arith.constant 0 : index
    %106 = vector.load %arg14[%c128_131, %c0_132] : memref<576x32xf32, #tpu.memory_space<vmem>>, vector<64x32xf32>
    tpu.vector_store %arg14[%c128_131, %c0_132], %105 {strides = array<i32>} : memref<576x32xf32, #tpu.memory_space<vmem>>, vector<64x32xf32>,
    %c3_133 = arith.constant 3 : index
    %c0_134 = arith.constant 0 : index
    %c0_135 = arith.constant 0 : index
    %107 = vector.load %arg8[%c3_133, %c0_134, %c0_135] : memref<9x32x32xf32, #tpu.memory_space<vmem>>, vector<1x32x32xf32>
    %108 = vector.shape_cast %107 : vector<1x32x32xf32> to vector<32x32xf32>
    %cst_136 = arith.constant dense<0.000000e+00> : vector<64x32xf32>
    %109 = tpu.matmul %94, %108, %cst_136 {dimension_numbers = #tpu.dot_dimension_numbers<[1], [0], [0], [1], [0, 0, 1, 1], [], []>} : vector<64x32xf32>, vector<32x32xf32>, vector<64x32xf32> -> vector<64x32xf32>
    %c192_137 = arith.constant 192 : index
    %c0_138 = arith.constant 0 : index
    %110 = vector.load %arg14[%c192_137, %c0_138] : memref<576x32xf32, #tpu.memory_space<vmem>>, vector<64x32xf32>
    tpu.vector_store %arg14[%c192_137, %c0_138], %109 {strides = array<i32>} : memref<576x32xf32, #tpu.memory_space<vmem>>, vector<64x32xf32>,
    %c4_139 = arith.constant 4 : index
    %c0_140 = arith.constant 0 : index
    %c0_141 = arith.constant 0 : index
    %111 = vector.load %arg8[%c4_139, %c0_140, %c0_141] : memref<9x32x32xf32, #tpu.memory_space<vmem>>, vector<1x32x32xf32>
    %112 = vector.shape_cast %111 : vector<1x32x32xf32> to vector<32x32xf32>
    %cst_142 = arith.constant dense<0.000000e+00> : vector<64x32xf32>
    %113 = tpu.matmul %94, %112, %cst_142 {dimension_numbers = #tpu.dot_dimension_numbers<[1], [0], [0], [1], [0, 0, 1, 1], [], []>} : vector<64x32xf32>, vector<32x32xf32>, vector<64x32xf32> -> vector<64x32xf32>
    %c256_143 = arith.constant 256 : index
    %c0_144 = arith.constant 0 : index
    %114 = vector.load %arg14[%c256_143, %c0_144] : memref<576x32xf32, #tpu.memory_space<vmem>>, vector<64x32xf32>
    tpu.vector_store %arg14[%c256_143, %c0_144], %113 {strides = array<i32>} : memref<576x32xf32, #tpu.memory_space<vmem>>, vector<64x32xf32>,
    %c5_145 = arith.constant 5 : index
    %c0_146 = arith.constant 0 : index
    %c0_147 = arith.constant 0 : index
    %115 = vector.load %arg8[%c5_145, %c0_146, %c0_147] : memref<9x32x32xf32, #tpu.memory_space<vmem>>, vector<1x32x32xf32>
    %116 = vector.shape_cast %115 : vector<1x32x32xf32> to vector<32x32xf32>
    %cst_148 = arith.constant dense<0.000000e+00> : vector<64x32xf32>
    %117 = tpu.matmul %94, %116, %cst_148 {dimension_numbers = #tpu.dot_dimension_numbers<[1], [0], [0], [1], [0, 0, 1, 1], [], []>} : vector<64x32xf32>, vector<32x32xf32>, vector<64x32xf32> -> vector<64x32xf32>
    %c320_149 = arith.constant 320 : index
    %c0_150 = arith.constant 0 : index
    %118 = vector.load %arg14[%c320_149, %c0_150] : memref<576x32xf32, #tpu.memory_space<vmem>>, vector<64x32xf32>
    tpu.vector_store %arg14[%c320_149, %c0_150], %117 {strides = array<i32>} : memref<576x32xf32, #tpu.memory_space<vmem>>, vector<64x32xf32>,
    %c6_151 = arith.constant 6 : index
    %c0_152 = arith.constant 0 : index
    %c0_153 = arith.constant 0 : index
    %119 = vector.load %arg8[%c6_151, %c0_152, %c0_153] : memref<9x32x32xf32, #tpu.memory_space<vmem>>, vector<1x32x32xf32>
    %120 = vector.shape_cast %119 : vector<1x32x32xf32> to vector<32x32xf32>
    %cst_154 = arith.constant dense<0.000000e+00> : vector<64x32xf32>
    %121 = tpu.matmul %94, %120, %cst_154 {dimension_numbers = #tpu.dot_dimension_numbers<[1], [0], [0], [1], [0, 0, 1, 1], [], []>} : vector<64x32xf32>, vector<32x32xf32>, vector<64x32xf32> -> vector<64x32xf32>
    %c384_155 = arith.constant 384 : index
    %c0_156 = arith.constant 0 : index
    %122 = vector.load %arg14[%c384_155, %c0_156] : memref<576x32xf32, #tpu.memory_space<vmem>>, vector<64x32xf32>
    tpu.vector_store %arg14[%c384_155, %c0_156], %121 {strides = array<i32>} : memref<576x32xf32, #tpu.memory_space<vmem>>, vector<64x32xf32>,
    %c7_157 = arith.constant 7 : index
    %c0_158 = arith.constant 0 : index
    %c0_159 = arith.constant 0 : index
    %123 = vector.load %arg8[%c7_157, %c0_158, %c0_159] : memref<9x32x32xf32, #tpu.memory_space<vmem>>, vector<1x32x32xf32>
    %124 = vector.shape_cast %123 : vector<1x32x32xf32> to vector<32x32xf32>
    %cst_160 = arith.constant dense<0.000000e+00> : vector<64x32xf32>
    %125 = tpu.matmul %94, %124, %cst_160 {dimension_numbers = #tpu.dot_dimension_numbers<[1], [0], [0], [1], [0, 0, 1, 1], [], []>} : vector<64x32xf32>, vector<32x32xf32>, vector<64x32xf32> -> vector<64x32xf32>
    %c448_161 = arith.constant 448 : index
    %c0_162 = arith.constant 0 : index
    %126 = vector.load %arg14[%c448_161, %c0_162] : memref<576x32xf32, #tpu.memory_space<vmem>>, vector<64x32xf32>
    tpu.vector_store %arg14[%c448_161, %c0_162], %125 {strides = array<i32>} : memref<576x32xf32, #tpu.memory_space<vmem>>, vector<64x32xf32>,
    %c8_163 = arith.constant 8 : index
    %c0_164 = arith.constant 0 : index
    %c0_165 = arith.constant 0 : index
    %127 = vector.load %arg8[%c8_163, %c0_164, %c0_165] : memref<9x32x32xf32, #tpu.memory_space<vmem>>, vector<1x32x32xf32>
    %128 = vector.shape_cast %127 : vector<1x32x32xf32> to vector<32x32xf32>
    %cst_166 = arith.constant dense<0.000000e+00> : vector<64x32xf32>
    %129 = tpu.matmul %94, %128, %cst_166 {dimension_numbers = #tpu.dot_dimension_numbers<[1], [0], [0], [1], [0, 0, 1, 1], [], []>} : vector<64x32xf32>, vector<32x32xf32>, vector<64x32xf32> -> vector<64x32xf32>
    %c512_167 = arith.constant 512 : index
    %c0_168 = arith.constant 0 : index
    %130 = vector.load %arg14[%c512_167, %c0_168] : memref<576x32xf32, #tpu.memory_space<vmem>>, vector<64x32xf32>
    tpu.vector_store %arg14[%c512_167, %c0_168], %129 {strides = array<i32>} : memref<576x32xf32, #tpu.memory_space<vmem>>, vector<64x32xf32>,
    %c0_169 = arith.constant 0 : index
    %c0_170 = arith.constant 0 : index
    %131 = vector.load %arg3[%c0_169, %c0_170] : memref<64x576xf32, #tpu.memory_space<vmem>>, vector<64x576xf32>
    %c0_171 = arith.constant 0 : index
    %c0_172 = arith.constant 0 : index
    %132 = vector.load %arg14[%c0_171, %c0_172] : memref<576x32xf32, #tpu.memory_space<vmem>>, vector<576x32xf32>
    %cst_173 = arith.constant dense<0.000000e+00> : vector<64x32xf32>
    %133 = tpu.matmul %131, %132, %cst_173 {dimension_numbers = #tpu.dot_dimension_numbers<[1], [0], [0], [1], [0, 0, 1, 1], [], []>} : vector<64x576xf32>, vector<576x32xf32>, vector<64x32xf32> -> vector<64x32xf32>
    %c0_174 = arith.constant 0 : index
    %c0_175 = arith.constant 0 : index
    %134 = vector.load %arg9[%c0_174, %c0_175] : memref<1x32xf32, #tpu.memory_space<vmem>>, vector<1x32xf32>
    %135 = vector.broadcast %134 : vector<1x32xf32> to vector<64x32xf32>
    %136 = arith.addf %133, %135 : vector<64x32xf32>
    %cst_176 = arith.constant 0.000000e+00 : f32
    %137 = vector.broadcast %cst_176 : f32 to vector<64x32xf32>
    %138 = arith.maximumf %136, %137 : vector<64x32xf32>
    %c0_177 = arith.constant 0 : index
    %c0_178 = arith.constant 0 : index
    %139 = vector.load %arg10[%c0_177, %c0_178] : memref<32x32xf32, #tpu.memory_space<vmem>>, vector<32x32xf32>
    %cst_179 = arith.constant dense<0.000000e+00> : vector<64x32xf32>
    %140 = tpu.matmul %138, %139, %cst_179 {dimension_numbers = #tpu.dot_dimension_numbers<[1], [0], [0], [1], [0, 0, 1, 1], [], []>} : vector<64x32xf32>, vector<32x32xf32>, vector<64x32xf32> -> vector<64x32xf32>
    %c0_180 = arith.constant 0 : index
    %c0_181 = arith.constant 0 : index
    %141 = vector.load %arg11[%c0_180, %c0_181] : memref<1x32xf32, #tpu.memory_space<vmem>>, vector<1x32xf32>
    %142 = vector.broadcast %141 : vector<1x32xf32> to vector<64x32xf32>
    %143 = arith.addf %140, %142 : vector<64x32xf32>
    %c0_182 = arith.constant 0 : index
    %c0_183 = arith.constant 0 : index
    %c0_184 = arith.constant 0 : index
    %144 = vector.load %arg12[%c0_182, %c0_183, %c0_184] : memref<1x64x32xf32, #tpu.memory_space<vmem>>, vector<1x64x32xf32>
    %145 = vector.shape_cast %144 : vector<1x64x32xf32> to vector<64x32xf32>
    %146 = vector.shape_cast %143 : vector<64x32xf32> to vector<1x64x32xf32>
    tpu.vector_store %arg12[%c0_182, %c0_183, %c0_184], %146 {strides = array<i32>} : memref<1x64x32xf32, #tpu.memory_space<vmem>>, vector<1x64x32xf32>,
    return
  }
  func.func @transform_0(%arg0: i32) -> (i32, i32, i32) {
    %c0_i32 = arith.constant 0 : i32
    %c0_i32_0 = arith.constant 0 : i32
    %c0_i32_1 = arith.constant 0 : i32
    return %arg0, %c0_i32, %c0_i32_0 : i32, i32, i32
  }
  func.func @transform_1(%arg0: i32) -> (i32, i32) {
    %c0_i32 = arith.constant 0 : i32
    %c0_i32_0 = arith.constant 0 : i32
    %c0_i32_1 = arith.constant 0 : i32
    return %c0_i32, %c0_i32_0 : i32, i32
  }
  func.func @transform_2(%arg0: i32) -> (i32, i32) {
    %c0_i32 = arith.constant 0 : i32
    %c0_i32_0 = arith.constant 0 : i32
    %c0_i32_1 = arith.constant 0 : i32
    return %c0_i32, %c0_i32_0 : i32, i32
  }
  func.func @transform_3(%arg0: i32) -> (i32, i32, i32) {
    %c0_i32 = arith.constant 0 : i32
    %c0_i32_0 = arith.constant 0 : i32
    %c0_i32_1 = arith.constant 0 : i32
    %c0_i32_2 = arith.constant 0 : i32
    return %c0_i32, %c0_i32_0, %c0_i32_1 : i32, i32, i32
  }
  func.func @transform_4(%arg0: i32) -> (i32, i32) {
    %c0_i32 = arith.constant 0 : i32
    %c0_i32_0 = arith.constant 0 : i32
    %c0_i32_1 = arith.constant 0 : i32
    return %c0_i32, %c0_i32_0 : i32, i32
  }
  func.func @transform_5(%arg0: i32) -> (i32, i32, i32) {
    %c0_i32 = arith.constant 0 : i32
    %c0_i32_0 = arith.constant 0 : i32
    %c0_i32_1 = arith.constant 0 : i32
    %c0_i32_2 = arith.constant 0 : i32
    return %c0_i32, %c0_i32_0, %c0_i32_1 : i32, i32, i32
  }
  func.func @transform_6(%arg0: i32) -> (i32, i32) {
    %c0_i32 = arith.constant 0 : i32
    %c0_i32_0 = arith.constant 0 : i32
    %c0_i32_1 = arith.constant 0 : i32
    return %c0_i32, %c0_i32_0 : i32, i32
  }
  func.func @transform_7(%arg0: i32) -> (i32, i32, i32) {
    %c0_i32 = arith.constant 0 : i32
    %c0_i32_0 = arith.constant 0 : i32
    %c0_i32_1 = arith.constant 0 : i32
    %c0_i32_2 = arith.constant 0 : i32
    return %c0_i32, %c0_i32_0, %c0_i32_1 : i32, i32, i32
  }
  func.func @transform_8(%arg0: i32) -> (i32, i32) {
    %c0_i32 = arith.constant 0 : i32
    %c0_i32_0 = arith.constant 0 : i32
    %c0_i32_1 = arith.constant 0 : i32
    return %c0_i32, %c0_i32_0 : i32, i32
  }
  func.func @transform_9(%arg0: i32) -> (i32, i32) {
    %c0_i32 = arith.constant 0 : i32
    %c0_i32_0 = arith.constant 0 : i32
    %c0_i32_1 = arith.constant 0 : i32
    return %c0_i32, %c0_i32_0 : i32, i32
  }
  func.func @transform_10(%arg0: i32) -> (i32, i32) {
    %c0_i32 = arith.constant 0 : i32
    %c0_i32_0 = arith.constant 0 : i32
    %c0_i32_1 = arith.constant 0 : i32
    return %c0_i32, %c0_i32_0 : i32, i32
  }
  func.func @transform_11(%arg0: i32) -> (i32, i32, i32) {
    %c0_i32 = arith.constant 0 : i32
    %c0_i32_0 = arith.constant 0 : i32
    %c0_i32_1 = arith.constant 0 : i32
    return %arg0, %c0_i32, %c0_i32_0 : i32, i32, i32
  }
  func.func @transform_12(%arg0: i32) -> (i32, i32, i32) {
    %c0_i32 = arith.constant 0 : i32
    %c0_i32_0 = arith.constant 0 : i32
    %c0_i32_1 = arith.constant 0 : i32
    return %arg0, %c0_i32, %c0_i32_0 : i32, i32, i32
  }
}

</mosaic_0001>

<bundles_post_ra>
// kernel: tpu_custom_call.1
= control target key start
LH: loop header
LB: loop body
LE: loop exit
PB: predicated region body
PF: predicated region fallthrough
CT: control target
= control target key end

     0   :  { %18 = vsyncpa [#allocation4], 0  ;;  %s9203_s0 = inlined_call_operand.vmem [shape: f32[2,256,4], index: 0, kind: input, shape index: {}]   ;;  %s9204_s1 = inlined_call_operand.vmem [shape: f32[64,256], index: 1, kind: input, shape index: {}]   ;;  %s9205_s2 = inlined_call_operand.vmem [shape: f32[64,576], index: 2, kind: input, shape index: {}]   ;;  %s9206_s3 = inlined_call_operand.vmem [shape: f32[9,4,32], index: 3, kind: input, shape index: {}]   ;;  %s9207_s4 = inlined_call_operand.vmem [shape: f32[1,32], index: 4, kind: input, shape index: {}]   ;;  %s9208_s5 = inlined_call_operand.hbm [shape: f32[9,32,32], index: 5, kind: input, shape index: {}]   ;;  %s9209_s6 = inlined_call_operand.vmem [shape: f32[1,32], index: 6, kind: input, shape index: {}]   ;;  %s9210_s7 = inlined_call_operand.hbm [shape: f32[9,32,32], index: 7, kind: input, shape index: {}]   ;;  %s9211_s8 = inlined_call_operand.vmem [shape: f32[1,32], index: 8, kind: input, shape index: {}]   ;;  %s9212_s9 = inlined_call_operand.vmem [shape: f32[32,32], index: 9, kind: input, shape index: {}]   ;;  %s9213_s10 = inlined_call_operand.vmem [shape: f32[1,32], index: 10, kind: input, shape index: {}]   ;;  %s9214_s11 = inlined_call_operand.vmem [shape: f32[2,64,32], index: 11, kind: output, shape index: {0}]   ;;  %s9215_s12 = inlined_call_operand.vmem [shape: f32[2,64,32], index: 12, kind: output, shape index: {1}]  }
   0x1   :  { %19 = vsyncpa [#allocation6], 0  ;;  %s7761_s21 = smov 0  }
   0x2 LB: > { %s7767_s22 = sadd.s32 4294967295, %s7690_s21   ;;  %p5535_p0 = scmp.ge.s32.totalorder %s7690_s21, 1  ;;  %s7690_s21 = sphi %s7761_s21, %s25_s21  }
   0x3   : > { %p318_p1 = scmp.lt.s32.totalorder %s7690_s21, 3  ;;  %s7692_s23 = smov [#allocation3]  }
   0x4   : > { %s342_s24 = sshll.u32 %s7692_s23, 4  ;;  %p9216_p3 = scmp.eq.s32.totalorder %s7767_s22, 0  ;;  %s343_s24 = int_to_ptr.vmem [resolvable:$true] %s342_s24 }
   0x5   : > { %p7771_p2 = pnand %p5535_p0, %p318_p1  ;;  %s7693_s26 = smov [#allocation5]  }
   0x6   : > { %s358_s27 = sshll.u32 %s7693_s26, 4  ;;  %s7620_s13 = scalar_lea.hbm %s9208_s5, 4608  ;;  %s7784_s27 = int_to_ptr.vmem [resolvable:$true] %s358_s27 }
   0x7   : > { %s9218_s25 = scalar_select %p7771_p2, 1, 0 }
   0x8   : > { %p7597_p4 = pneg %p7771_p2  ;;  %p7621_p6 = scmp.ne.s32.totalorder %s9208_s5, %s7620_s13 }
   0x9   : > { %p7627_p10 = scmp.lt.u32.totalorder %s7620_s13, %s9208_s5 }
   0xa   : > { %p7780_p5 = pnand %p9216_p3, %p7597_p4 }
   0xc   : > { %p7622_p7 = pneg %p7780_p5 }
   0xe   : > { %p7623_p8 = pnand %p7622_p7, %p7621_p6 }
  0x10   : > { %p7624_p9 = pneg %p7623_p8 }
  0x12   : > { %p7629_p11 = pnand %p7627_p10, %p7624_p9 }
  0x14   : > { %7632 = shalt.err (!%p7629_p11)
}
  0x15   : > { %s7633_s18 = scalar_lea.vmem %s343_s24, 4608  ;;  %p7641_p1 = scmp.lt.s32.totalorder %s343_s24, %s343_s24 }
  0x16   : > { %p7634_p12 = scmp.ne.s32.totalorder %s343_s24, %s7633_s18  ;;  %p7642_p4 = scmp.lt.s32.totalorder %s7633_s18, %s7633_s18 }
  0x18   : > { %p7636_p13 = pnand %p7634_p12, %p7622_p7  ;;  %p7643_p3 = por %p7642_p4, %p7641_p1 }
  0x1a   : > { %p7637_p0 = pneg %p7636_p13 }
  0x1c   : > { %p7644_p2 = pnand %p7643_p3, %p7637_p0 }
  0x1e   : > { %7647 = shalt.err (!%p7644_p2)
}
  0x1f   : > { %s7694_s19 = smov 128   ;;  %s7695_s20 = smov 8  }
  0x20   : > { %7600 = dma.hbm_to_vmem [thread:$0]  (!%p7780_p5), %s9208_s5, 4608, %s343_s24, [#allocation4], %s7694_s19, %s7694_s19, %s7695_s20  }
  0x21   : > { %s7648_s13 = scalar_lea.hbm %s9210_s7, 4608 }
  0x22   : > { %p7649_p6 = scmp.ne.s32.totalorder %s9210_s7, %s7648_s13  ;;  %p7655_p8 = scmp.lt.u32.totalorder %s7648_s13, %s9210_s7 }
  0x24   : > { %p7651_p2 = pnand %p7649_p6, %p7622_p7 }
  0x26   : > { %p7652_p3 = pneg %p7651_p2 }
  0x28   : > { %p7657_p9 = pnand %p7655_p8, %p7652_p3 }
  0x2a   : > { %7660 = shalt.err (!%p7657_p9)
}
  0x2b   : > { %s7661_s24 = scalar_lea.vmem %s7784_s27, 4608  ;;  %p7669_p13 = scmp.lt.s32.totalorder %s7784_s27, %s7784_s27 }
  0x2c   : > { %p7662_p10 = scmp.ne.s32.totalorder %s7784_s27, %s7661_s24  ;;  %p7670_p0 = scmp.lt.s32.totalorder %s7661_s24, %s7661_s24 }
  0x2e   : > { %p7664_p11 = pnand %p7662_p10, %p7622_p7  ;;  %p7671_p1 = por %p7670_p0, %p7669_p13 }
  0x30   : > { %p7665_p12 = pneg %p7664_p11 }
  0x32   : > { %p7672_p4 = pnand %p7671_p1, %p7665_p12 }
  0x34   : > { %7675 = shalt.err (!%p7672_p4)
}
  0x35   : > { %7603 = dma.hbm_to_vmem [thread:$0]  (!%p7780_p5), %s9210_s7, 4608, %s7784_s27, [#allocation6], %s7694_s19, %s7694_s19, %s7695_s20  }
  0x36   : > { %p9220_p6 = scmp.ne.s32.totalorder %s9218_s25, 0 }
  0x37   : > { %p9221_p2 = scmp.eq.s32.totalorder (!%p9220_p6), %s7767_s22, 0 }
  0x38   : > { %391 = sbr.rel (%p9220_p6) target bundleno = 2202 (0x89a), region = 64 }
  0x3f   : > { %7681 = dma.done.wait (%p9221_p2), [#allocation4], 4608   ;;  %p9222_p7 = pmov %p9221_p2 }
  0x40   : > { %p9223_p3 = pmov %p9221_p2 }
  0x41   : > { %7683 = vsyncadd (%p9222_p7), [#allocation4], 4294962688 }
  0x42   : > { %7685 = dma.done.wait (%p9223_p3), [#allocation6], 4608   ;;  %p9224_p8 = pmov %p9221_p2 }
  0x43   : > { %p442_p9 = scmp.lt.s32.totalorder %s7767_s22, 1  ;;  %v458_v25 = vld [vmem:[%s9204_s1 + $0x8] sm:$0xff]  ;;  %v457_v49 = vld [vmem:[%s9204_s1] sm:$0xff]  ;;  %v460_v50 = vld [vmem:[%s9204_s1 + $0x18] sm:$0xff]  ;;  %vm636_vm0 = vcmask 1043456   ;;  %vm611_vm1 = vcmask 31744  }
  0x44   : > { %7687 = vsyncadd (%p9224_p8), [#allocation6], 4294962688  ;;  %569 = vmatprep.mubr.f32.mxu0 %v458_v25  ;;  %v459_v51 = vld [vmem:[%s9204_s1 + $0x10] sm:$0xff]  ;;  %v462_v52 = vld [vmem:[%s9204_s1 + $0x28] sm:$0xff]  ;;  %vm745_vm2 = vcmask 261120   ;;  %vm1817_vm3 = vcmask 523264  }
  0x45   : > { %s9226_s22 = smov (!%p442_p9, %s7767_s22), 1  ;;  %v461_v53 = vld [vmem:[%s9204_s1 + $0x20] sm:$0xff]  ;;  %v464_v54 = vld [vmem:[%s9204_s1 + $0x38] sm:$0xff]  ;;  %v463_v55 = vld [vmem:[%s9204_s1 + $0x30] sm:$0xff] }
  0x46   : > { %s5819_s25 = sshll.u32 %s9226_s22, 8  ;;  %v466_v56 = vld [vmem:[%s9204_s1 + $0x48] sm:$0xff]  ;;  %v465_v57 = vld [vmem:[%s9204_s1 + $0x40] sm:$0xff]  ;;  %v468_v58 = vld [vmem:[%s9204_s1 + $0x58] sm:$0xff]  ;;  %s5820_s13 = sshll.u32 %s9226_s22, 6 }
  0x47   : > { %s7851_s19 = scalar_lea.vmem %s9203_s0, %s5819_s25  ;;  %v467_v59 = vld [vmem:[%s9204_s1 + $0x50] sm:$0xff]  ;;  %v470_v60 = vld [vmem:[%s9204_s1 + $0x68] sm:$0xff]  ;;  %v469_v61 = vld [vmem:[%s9204_s1 + $0x60] sm:$0xff]  ;;  %s8362_s16 = scalar_lea.vmem %s9215_s12, %s5820_s13 }
  0x48   : > { %v489_v0 = vld [vmem:[%s7851_s19 + $0x80] sm:$0xff]  ;;  %v490_v1 = vld [vmem:[%s7851_s19 + $0x88] sm:$0xff]  ;;  %v491_v5 = vld [vmem:[%s7851_s19 + $0x90] sm:$0xff]  ;;  %s451_s30 = scalar_lea.vmem %s9214_s11, %s5820_s13 }
  0x49   : > { %v473_v2 = vld [vmem:[%s7851_s19] sm:$0xff]  ;;  %v7161_v3 = vpack.c.bf16 %v490_v1, %v489_v0  ;;  %v474_v4 = vld [vmem:[%s7851_s19 + $0x8] sm:$0xff]  ;;  %v492_v6 = vld [vmem:[%s7851_s19 + $0x98] sm:$0xff] }
  0x4a   : > { %v7163_v7 = vpack.c.bf16 %v474_v4, %v473_v2  ;;  %v7165_v8 = vpack.c.bf16 %v492_v6, %v491_v5  ;;  %v475_v9 = vld [vmem:[%s7851_s19 + $0x10] sm:$0xff]  ;;  %v476_v10 = vld [vmem:[%s7851_s19 + $0x18] sm:$0xff]  ;;  %v493_v11 = vld [vmem:[%s7851_s19 + $0xa0] sm:$0xff] }
  0x4b   : > { %7162 = vmatprep.subr.bf16.mxu0 %v7161_v3  ;;  %v494_v12 = vld [vmem:[%s7851_s19 + $0xa8] sm:$0xff]  ;;  %v7167_v13 = vpack.c.bf16 %v476_v10, %v475_v9  ;;  %v477_v15 = vld [vmem:[%s7851_s19 + $0x20] sm:$0xff]  ;;  %v495_v17 = vld [vmem:[%s7851_s19 + $0xb0] sm:$0xff] }
  0x4c   : > { %7164 = vmatpush3.bf16.msra.mxu0 %v7163_v7  ;;  %v7169_v14 = vpack.c.bf16 %v494_v12, %v493_v11  ;;  %v478_v16 = vld [vmem:[%s7851_s19 + $0x28] sm:$0xff]  ;;  %v496_v18 = vld [vmem:[%s7851_s19 + $0xb8] sm:$0xff]  ;;  %v479_v21 = vld [vmem:[%s7851_s19 + $0x30] sm:$0xff] }
  0x4d   : > { %7166 = vmatprep.subr.bf16.mxu0 %v7165_v8  ;;  %v7171_v19 = vpack.c.bf16 %v478_v16, %v477_v15  ;;  %v7173_v20 = vpack.c.bf16 %v496_v18, %v495_v17  ;;  %v480_v22 = vld [vmem:[%s7851_s19 + $0x38] sm:$0xff]  ;;  %v497_v23 = vld [vmem:[%s7851_s19 + $0xc0] sm:$0xff]  ;;  %v498_v24 = vld [vmem:[%s7851_s19 + $0xc8] sm:$0xff] }
  0x4e   : > { %v7175_v26 = vpack.c.bf16 %v480_v22, %v479_v21  ;;  %v7177_v27 = vpack.c.bf16 %v498_v24, %v497_v23  ;;  %v481_v28 = vld [vmem:[%s7851_s19 + $0x40] sm:$0xff]  ;;  %v482_v29 = vld [vmem:[%s7851_s19 + $0x48] sm:$0xff]  ;;  %v499_v30 = vld [vmem:[%s7851_s19 + $0xd0] sm:$0xff] }
  0x4f   : > { %v500_v31 = vld [vmem:[%s7851_s19 + $0xd8] sm:$0xff]  ;;  %v7179_v32 = vpack.c.bf16 %v482_v29, %v481_v28  ;;  %v483_v34 = vld [vmem:[%s7851_s19 + $0x50] sm:$0xff]  ;;  %v501_v36 = vld [vmem:[%s7851_s19 + $0xe0] sm:$0xff] }
  0x50   : > { %7168 = vmatpush3.bf16.msra.mxu0 %v7167_v13  ;;  %v7181_v33 = vpack.c.bf16 %v500_v31, %v499_v30  ;;  %v484_v35 = vld [vmem:[%s7851_s19 + $0x58] sm:$0xff]  ;;  %v502_v37 = vld [vmem:[%s7851_s19 + $0xe8] sm:$0xff]  ;;  %v485_v40 = vld [vmem:[%s7851_s19 + $0x60] sm:$0xff] }
  0x51   : > { %7170 = vmatprep.subr.bf16.mxu0 %v7169_v14  ;;  %v7183_v38 = vpack.c.bf16 %v484_v35, %v483_v34  ;;  %v7185_v39 = vpack.c.bf16 %v502_v37, %v501_v36  ;;  %v486_v41 = vld [vmem:[%s7851_s19 + $0x68] sm:$0xff]  ;;  %v503_v42 = vld [vmem:[%s7851_s19 + $0xf0] sm:$0xff]  ;;  %v504_v43 = vld [vmem:[%s7851_s19 + $0xf8] sm:$0xff] }
  0x52   : > { %v7187_v44 = vpack.c.bf16 %v486_v41, %v485_v40  ;;  %v7189_v45 = vpack.c.bf16 %v504_v43, %v503_v42  ;;  %v487_v46 = vld [vmem:[%s7851_s19 + $0x70] sm:$0xff]  ;;  %v488_v47 = vld [vmem:[%s7851_s19 + $0x78] sm:$0xff]  ;;  %v610_v0 = vld [vmem:[%s9206_s3] sm:$0xf] }
  0x53   : > { %v7191_v48 = vpack.c.bf16 %v488_v47, %v487_v46  ;;  %v472_v62 = vld [vmem:[%s9204_s1 + $0x78] sm:$0xff]  ;;  %v471_v63 = vld [vmem:[%s9204_s1 + $0x70] sm:$0xff]  ;;  %6571 = vmatprep.subr.msk.mxu1 %vm636_vm0, %v610_v0  ;;  %v5557_v2 = vld [vmem:[%s9206_s3 + $0x4] sm:$0xf] }
  0x54   : > { %7172 = vmatpush3.bf16.msra.mxu0 %v7171_v19  ;;  %v5587_v1 = vld [vmem:[%s9206_s3 + $0x10] sm:$0xf]  ;;  %6572 = vmatpush3.msk.msra.mxu1 %vm636_vm0, %v610_v0  ;;  %v5607_v3 = vld [vmem:[%s9206_s3 + $0x18] sm:$0xf]  ;;  %v5567_v10 = vld [vmem:[%s9206_s3 + $0x8] sm:$0xf] }
  0x55   : > { %7174 = vmatprep.subr.bf16.mxu0 %v7173_v20  ;;  %6585 = vmatprep.subr.msk.mxu1 %vm636_vm0, %v5557_v2  ;;  %v5627_v11 = vld [vmem:[%s9206_s3 + $0x20] sm:$0xf]  ;;  %v5577_v30 = vld [vmem:[%s9206_s3 + $0xc] sm:$0xf]  ;;  %v5597_v31 = vld [vmem:[%s9206_s3 + $0x14] sm:$0xf] }
  0x56   : > { %v1701_v34 = vld [vmem:[%s9205_s2 + $0x18] sm:$0xff] }
  0x58   : > { %7176 = vmatpush3.bf16.msra.mxu0 %v7175_v26 }
  0x59   : > { %7178 = vmatprep.subr.bf16.mxu0 %v7177_v27 }
  0x5c   : > { %7180 = vmatpush3.bf16.msra.mxu0 %v7179_v32  ;;  %v5617_v32 = vld [vmem:[%s9206_s3 + $0x1c] sm:$0xf] }
  0x5d   : > { %7182 = vmatprep.subr.bf16.mxu0 %v7181_v33  ;;  %v1699_v33 = vld [vmem:[%s9205_s2 + $0x8] sm:$0xff] }
  0x60   : > { %7184 = vmatpush3.bf16.msra.mxu0 %v7183_v38 }
  0x61   : > { %7186 = vmatprep.subr.bf16.mxu0 %v7185_v39 }
  0x64   : > { %7188 = vmatpush3.bf16.msra.mxu0 %v7187_v44 }
  0x65   : > { %7190 = vmatprep.subr.bf16.mxu0 %v7189_v45 }
  0x68   : > { %7192 = vmatpush3.bf16.msra.mxu0 %v7191_v48 }
  0x69   : > { %6627 = vmatprep.subr.msk.mxu0 %vm636_vm0, %v5587_v1 }
  0x6b   : > { %570 = vmatmul.mubr.f32.vlgmr.msra.gmra.mrb[0].mxu0 %v457_v49 }
  0x6c   : > { %574 = vmatprep.mubr.f32.mxu0 %v460_v50  ;;  %6628 = vmatpush3.msk.msra.mxu0 %vm636_vm0, %v5587_v1 }
  0x6d   : > { %6655 = vmatprep.subr.msk.mxu0 %vm636_vm0, %v5607_v3 }
  0x6f   : > { %575 = vmatmul.mubr.f32.gmra.mrb[2].mxu0 %v459_v51 }
  0x70   : > { %579 = vmatprep.mubr.f32.mxu0 %v462_v52 }
  0x73   : > { %580 = vmatmul.mubr.f32.gmra.mrb[4].mxu0 %v461_v53 }
  0x74   : > { %584 = vmatprep.mubr.f32.mxu0 %v464_v54 }
  0x77   : > { %585 = vmatmul.mubr.f32.gmra.mrb[6].mxu0 %v463_v55 }
  0x78   : > { %589 = vmatprep.mubr.f32.mxu0 %v466_v56 }
  0x7b   : > { %590 = vmatmul.mubr.f32.gmra.mrb[8].mxu0 %v465_v57 }
  0x7c   : > { %594 = vmatprep.mubr.f32.mxu0 %v468_v58 }
  0x7f   : > { %595 = vmatmul.mubr.f32.gmra.mrb[10].mxu0 %v467_v59 }
  0x80   : > { %599 = vmatprep.mubr.f32.mxu0 %v470_v60 }
  0x83   : > { %600 = vmatmul.mubr.f32.gmra.mrb[12].mxu0 %v469_v61 }
  0x84   : > { %604 = vmatprep.mubr.f32.mxu0 %v472_v62 }
  0x87   : > { %605 = vmatmul.mubr.f32.gmra.mrb[14].mxu0 %v471_v63 }
 0x13e   : > { %v5854_v4 = vpop.f32.mrb[0].mxu0 }
 0x13f   : > { %v5855_v5 = vpop.f32.mrb[1].mxu0 }
 0x140   : > { %v7951_v6 = vadd.f32 %v5855_v5, %v5854_v4 }
 0x142   : > { %v5857_v7 = vpop.f32.mrb[2].mxu0  ;;  %6573 = vmatprep.mubr.msk.f32.mxu1 %vm611_vm1, %v7951_v6  ;;  %6629 = vmatprep.mubr.msk.f32.mxu0 %vm611_vm1, %v7951_v6 }
 0x143   : > { %v5858_v8 = vpop.f32.mrb[3].mxu0 }
 0x144   : > { %v7957_v9 = vadd.f32 %v5858_v8, %v5857_v7 }
 0x146   : > { %v5860_v12 = vpop.f32.mrb[4].mxu0  ;;  %6574 = vmatmul.mubr.msk.f32.vlgmr.msra.gmra.mrb[0].mxu1 %vm611_vm1, %v7957_v9  ;;  %6630 = vmatmul.mubr.msk.f32.vlgmr.msra.gmra.mrb[16].mxu0 %vm611_vm1, %v7957_v9 }
 0x147   : > { %v5861_v13 = vpop.f32.mrb[5].mxu0  ;;  %6586 = vmatpush3.msk.msra.mxu1 %vm636_vm0, %v5557_v2  ;;  %6656 = vmatpush3.msk.msra.mxu0 %vm636_vm0, %v5607_v3 }
 0x148   : > { %v7971_v14 = vadd.f32 %v5861_v13, %v5860_v12  ;;  %6599 = vmatprep.subr.msk.mxu1 %vm636_vm0, %v5567_v10  ;;  %6683 = vmatprep.subr.msk.mxu0 %vm636_vm0, %v5627_v11 }
 0x14a   : > { %v5863_v15 = vpop.f32.mrb[6].mxu0  ;;  %6576 = vmatprep.mubr.msk.f32.mxu1 %vm611_vm1, %v7971_v14  ;;  %6632 = vmatprep.mubr.msk.f32.mxu0 %vm611_vm1, %v7971_v14 }
 0x14b   : > { %v5864_v16 = vpop.f32.mrb[7].mxu0 }
 0x14c   : > { %v7979_v17 = vadd.f32 %v5864_v16, %v5863_v15 }
 0x14e   : > { %v5866_v18 = vpop.f32.mrb[8].mxu0  ;;  %6577 = vmatmul.mubr.msk.f32.gmra.mrb[2].mxu1 %vm611_vm1, %v7979_v17  ;;  %6633 = vmatmul.mubr.msk.f32.gmra.mrb[18].mxu0 %vm611_vm1, %v7979_v17 }
 0x14f   : > { %v5867_v19 = vpop.f32.mrb[9].mxu0 }
 0x150   : > { %v7985_v20 = vadd.f32 %v5867_v19, %v5866_v18 }
 0x152   : > { %v5869_v21 = vpop.f32.mrb[10].mxu0  ;;  %6579 = vmatprep.mubr.msk.f32.mxu1 %vm611_vm1, %v7985_v20  ;;  %6635 = vmatprep.mubr.msk.f32.mxu0 %vm611_vm1, %v7985_v20 }
 0x153   : > { %v5870_v22 = vpop.f32.mrb[11].mxu0 }
 0x154   : > { %v7991_v23 = vadd.f32 %v5870_v22, %v5869_v21 }
 0x156   : > { %v5872_v24 = vpop.f32.mrb[12].mxu0  ;;  %6580 = vmatmul.mubr.msk.f32.gmra.mrb[4].mxu1 %vm611_vm1, %v7991_v23  ;;  %6636 = vmatmul.mubr.msk.f32.gmra.mrb[20].mxu0 %vm611_vm1, %v7991_v23 }
 0x157   : > { %v5873_v25 = vpop.f32.mrb[13].mxu0 }
 0x158   : > { %v7997_v26 = vadd.f32 %v5873_v25, %v5872_v24 }
 0x15a   : > { %v5875_v27 = vpop.f32.mrb[14].mxu0  ;;  %6582 = vmatprep.mubr.msk.f32.mxu1 %vm611_vm1, %v7997_v26  ;;  %6638 = vmatprep.mubr.msk.f32.mxu0 %vm611_vm1, %v7997_v26 }
 0x15b   : > { %v5876_v28 = vpop.f32.mrb[15].mxu0 }
 0x15c   : > { %v8003_v29 = vadd.f32 %v5876_v28, %v5875_v27 }
 0x15e   : > { %6583 = vmatmul.mubr.msk.f32.gmra.mrb[6].mxu1 %vm611_vm1, %v8003_v29  ;;  %6639 = vmatmul.mubr.msk.f32.gmra.mrb[22].mxu0 %vm611_vm1, %v8003_v29 }
 0x15f   : > { %6587 = vmatprep.mubr.msk.f32.mxu1 %vm611_vm1, %v7951_v6  ;;  %6657 = vmatprep.mubr.msk.f32.mxu0 %vm611_vm1, %v7951_v6 }
 0x162   : > { %6588 = vmatmul.mubr.msk.f32.vlgmr.msra.gmra.mrb[8].mxu1 %vm611_vm1, %v7957_v9  ;;  %6658 = vmatmul.mubr.msk.f32.vlgmr.msra.gmra.mrb[24].mxu0 %vm611_vm1, %v7957_v9 }
 0x163   : > { %6600 = vmatpush3.msk.msra.mxu1 %vm636_vm0, %v5567_v10  ;;  %6590 = vmatprep.mubr.msk.f32.mxu1 %vm611_vm1, %v7971_v14 }
 0x164   : > { %6660 = vmatprep.mubr.msk.f32.mxu0 %vm611_vm1, %v7971_v14  ;;  %6613 = vmatprep.subr.msk.mxu1 %vm636_vm0, %v5577_v30 }
 0x165   : > { %6684 = vmatpush3.msk.msra.mxu0 %vm636_vm0, %v5627_v11 }
 0x166   : > { %6591 = vmatmul.mubr.msk.f32.gmra.mrb[10].mxu1 %vm611_vm1, %v7979_v17  ;;  %6661 = vmatmul.mubr.msk.f32.gmra.mrb[26].mxu0 %vm611_vm1, %v7979_v17 }
 0x167   : > { %6593 = vmatprep.mubr.msk.f32.mxu1 %vm611_vm1, %v7985_v20  ;;  %6663 = vmatprep.mubr.msk.f32.mxu0 %vm611_vm1, %v7985_v20 }
 0x16a   : > { %6594 = vmatmul.mubr.msk.f32.gmra.mrb[12].mxu1 %vm611_vm1, %v7991_v23  ;;  %6664 = vmatmul.mubr.msk.f32.gmra.mrb[28].mxu0 %vm611_vm1, %v7991_v23 }
 0x16b   : > { %6596 = vmatprep.mubr.msk.f32.mxu1 %vm611_vm1, %v7997_v26  ;;  %6666 = vmatprep.mubr.msk.f32.mxu0 %vm611_vm1, %v7997_v26 }
 0x16e   : > { %6597 = vmatmul.mubr.msk.f32.gmra.mrb[14].mxu1 %vm611_vm1, %v8003_v29  ;;  %6667 = vmatmul.mubr.msk.f32.gmra.mrb[30].mxu0 %vm611_vm1, %v8003_v29 }
 0x16f   : > { %6601 = vmatprep.mubr.msk.f32.mxu1 %vm611_vm1, %v7951_v6  ;;  %6685 = vmatprep.mubr.msk.f32.mxu0 %vm611_vm1, %v7951_v6 }
 0x172   : > { %6602 = vmatmul.mubr.msk.f32.vlgmr.msra.gmra.mrb[16].mxu1 %vm611_vm1, %v7957_v9  ;;  %6686 = vmatmul.mubr.msk.f32.vlgmr.msra.gmra.mrb[32].mxu0 %vm611_vm1, %v7957_v9 }
 0x173   : > { %6614 = vmatpush3.msk.msra.mxu1 %vm636_vm0, %v5577_v30  ;;  %6604 = vmatprep.mubr.msk.f32.mxu1 %vm611_vm1, %v7971_v14 }
 0x174   : > { %6688 = vmatprep.mubr.msk.f32.mxu0 %vm611_vm1, %v7971_v14  ;;  %6641 = vmatprep.subr.msk.mxu1 %vm636_vm0, %v5597_v31 }
 0x176   : > { %6605 = vmatmul.mubr.msk.f32.gmra.mrb[18].mxu1 %vm611_vm1, %v7979_v17  ;;  %6689 = vmatmul.mubr.msk.f32.gmra.mrb[34].mxu0 %vm611_vm1, %v7979_v17 }
 0x177   : > { %6607 = vmatprep.mubr.msk.f32.mxu1 %vm611_vm1, %v7985_v20  ;;  %6691 = vmatprep.mubr.msk.f32.mxu0 %vm611_vm1, %v7985_v20 }
 0x17a   : > { %6608 = vmatmul.mubr.msk.f32.gmra.mrb[20].mxu1 %vm611_vm1, %v7991_v23  ;;  %6692 = vmatmul.mubr.msk.f32.gmra.mrb[36].mxu0 %vm611_vm1, %v7991_v23 }
 0x17b   : > { %6610 = vmatprep.mubr.msk.f32.mxu1 %vm611_vm1, %v7997_v26  ;;  %6694 = vmatprep.mubr.msk.f32.mxu0 %vm611_vm1, %v7997_v26 }
 0x17e   : > { %6611 = vmatmul.mubr.msk.f32.gmra.mrb[22].mxu1 %vm611_vm1, %v8003_v29  ;;  %6695 = vmatmul.mubr.msk.f32.gmra.mrb[38].mxu0 %vm611_vm1, %v8003_v29 }
 0x17f   : > { %6615 = vmatprep.mubr.msk.f32.mxu1 %vm611_vm1, %v7951_v6  ;;  %2011 = vmatprep.mubr.f32.mxu0 %v1701_v34 }
 0x182   : > { %6616 = vmatmul.mubr.msk.f32.vlgmr.msra.gmra.mrb[24].mxu1 %vm611_vm1, %v7957_v9 }
 0x183   : > { %6642 = vmatpush3.msk.msra.mxu1 %vm636_vm0, %v5597_v31  ;;  %6618 = vmatprep.mubr.msk.f32.mxu1 %vm611_vm1, %v7971_v14 }
 0x184   : > { %6669 = vmatprep.subr.msk.mxu1 %vm636_vm0, %v5617_v32 }
 0x186   : > { %6619 = vmatmul.mubr.msk.f32.gmra.mrb[26].mxu1 %vm611_vm1, %v7979_v17 }
 0x187   : > { %6621 = vmatprep.mubr.msk.f32.mxu1 %vm611_vm1, %v7985_v20 }
 0x18a   : > { %6622 = vmatmul.mubr.msk.f32.gmra.mrb[28].mxu1 %vm611_vm1, %v7991_v23 }
 0x18b   : > { %6624 = vmatprep.mubr.msk.f32.mxu1 %vm611_vm1, %v7997_v26 }
 0x18e   : > { %6625 = vmatmul.mubr.msk.f32.gmra.mrb[30].mxu1 %vm611_vm1, %v8003_v29 }
 0x18f   : > { %6643 = vmatprep.mubr.msk.f32.mxu1 %vm611_vm1, %v7951_v6 }
 0x192   : > { %6644 = vmatmul.mubr.msk.f32.vlgmr.msra.gmra.mrb[32].mxu1 %vm611_vm1, %v7957_v9 }
 0x193   : > { %6670 = vmatpush3.msk.msra.mxu1 %vm636_vm0, %v5617_v32  ;;  %6646 = vmatprep.mubr.msk.f32.mxu1 %vm611_vm1, %v7971_v14 }
 0x196   : > { %6647 = vmatmul.mubr.msk.f32.gmra.mrb[34].mxu1 %vm611_vm1, %v7979_v17 }
 0x197   : > { %6649 = vmatprep.mubr.msk.f32.mxu1 %vm611_vm1, %v7985_v20 }
 0x19a   : > { %6650 = vmatmul.mubr.msk.f32.gmra.mrb[36].mxu1 %vm611_vm1, %v7991_v23 }
 0x19b   : > { %6652 = vmatprep.mubr.msk.f32.mxu1 %vm611_vm1, %v7997_v26 }
 0x19e   : > { %6653 = vmatmul.mubr.msk.f32.gmra.mrb[38].mxu1 %vm611_vm1, %v8003_v29 }
 0x19f   : > { %6671 = vmatprep.mubr.msk.f32.mxu1 %vm611_vm1, %v7951_v6 }
 0x1a2   : > { %6672 = vmatmul.mubr.msk.f32.vlgmr.msra.gmra.mrb[40].mxu1 %vm611_vm1, %v7957_v9 }
 0x1a3   : > { %6674 = vmatprep.mubr.msk.f32.mxu1 %vm611_vm1, %v7971_v14 }
 0x1a6   : > { %6675 = vmatmul.mubr.msk.f32.gmra.mrb[42].mxu1 %vm611_vm1, %v7979_v17 }
 0x1a7   : > { %6677 = vmatprep.mubr.msk.f32.mxu1 %vm611_vm1, %v7985_v20 }
 0x1aa   : > { %6678 = vmatmul.mubr.msk.f32.gmra.mrb[44].mxu1 %vm611_vm1, %v7991_v23 }
 0x1ab   : > { %6680 = vmatprep.mubr.msk.f32.mxu1 %vm611_vm1, %v7997_v26 }
 0x1ae   : > { %6681 = vmatmul.mubr.msk.f32.gmra.mrb[46].mxu1 %vm611_vm1, %v8003_v29 }
 0x1af   : > { %1906 = vmatprep.mubr.f32.mxu1 %v1699_v33 }
 0x219   : > { %v6575_v35 = vpop.f32.mrb[0].mxu1  ;;  %v6631_v36 = vpop.f32.mrb[16].mxu0 }
 0x21a   : > { %747 = vst.msk [vmem:[#allocation2 + $0x8] sm:$0xff] %vm745_vm2, %v6575_v35  ;;  %1219 = vst.msk [vmem:[#allocation2 + $0x108] sm:$0xff] %vm745_vm2, %v6631_v36  ;;  %v706_v37 = vpop.f32.mrb[1].mxu1  ;;  %v1179_v38 = vpop.f32.mrb[17].mxu0 }
 0x21b   : > { %746 = vst.msk [vmem:[#allocation2] sm:$0xff] %vm745_vm2, %v706_v37  ;;  %1218 = vst.msk [vmem:[#allocation2 + $0x100] sm:$0xff] %vm745_vm2, %v1179_v38 }
 0x221   : > { %v6578_v39 = vpop.f32.mrb[2].mxu1  ;;  %v6634_v40 = vpop.f32.mrb[18].mxu0  ;;  %v1771_v63 = vld [vmem:[#allocation2 + $0x108] sm:$0xff] }
 0x222   : > { %749 = vst.msk [vmem:[#allocation2 + $0x18] sm:$0xff] %vm745_vm2, %v6578_v39  ;;  %1221 = vst.msk [vmem:[#allocation2 + $0x118] sm:$0xff] %vm745_vm2, %v6634_v40  ;;  %v716_v41 = vpop.f32.mrb[3].mxu1  ;;  %v1189_v42 = vpop.f32.mrb[19].mxu0  ;;  %v1770_v62 = vld [vmem:[#allocation2 + $0x100] sm:$0xff]  ;;  %v1739_v39 = vld [vmem:[#allocation2 + $0x8] sm:$0xff] }
 0x223   : > { %748 = vst.msk [vmem:[#allocation2 + $0x10] sm:$0xff] %vm745_vm2, %v716_v41  ;;  %1220 = vst.msk [vmem:[#allocation2 + $0x110] sm:$0xff] %vm745_vm2, %v1189_v42  ;;  %v7227_v4 = vpack.c.bf16 %v1771_v63, %v1770_v62  ;;  %v1738_v38 = vld [vmem:[#allocation2] sm:$0xff] }
 0x229   : > { %v6581_v43 = vpop.f32.mrb[4].mxu1  ;;  %v6637_v44 = vpop.f32.mrb[20].mxu0  ;;  %v1773_v9 = vld [vmem:[#allocation2 + $0x118] sm:$0xff] }
 0x22a   : > { %751 = vst.msk [vmem:[#allocation2 + $0x28] sm:$0xff] %vm745_vm2, %v6581_v43  ;;  %1223 = vst.msk [vmem:[#allocation2 + $0x128] sm:$0xff] %vm745_vm2, %v6637_v44  ;;  %v726_v45 = vpop.f32.mrb[5].mxu1  ;;  %v1199_v46 = vpop.f32.mrb[21].mxu0  ;;  %v1772_v8 = vld [vmem:[#allocation2 + $0x110] sm:$0xff]  ;;  %v7195_v44 = vpack.c.bf16 %v1739_v39, %v1738_v38 }
 0x22b   : > { %750 = vst.msk [vmem:[#allocation2 + $0x20] sm:$0xff] %vm745_vm2, %v726_v45  ;;  %1222 = vst.msk [vmem:[#allocation2 + $0x120] sm:$0xff] %vm745_vm2, %v1199_v46  ;;  %v7231_v14 = vpack.c.bf16 %v1773_v9, %v1772_v8 }
 0x231   : > { %v6584_v47 = vpop.f32.mrb[6].mxu1  ;;  %v6640_v48 = vpop.f32.mrb[22].mxu0  ;;  %v1775_v19 = vld [vmem:[#allocation2 + $0x128] sm:$0xff] }
 0x232   : > { %753 = vst.msk [vmem:[#allocation2 + $0x38] sm:$0xff] %vm745_vm2, %v6584_v47  ;;  %1225 = vst.msk [vmem:[#allocation2 + $0x138] sm:$0xff] %vm745_vm2, %v6640_v48  ;;  %v736_v49 = vpop.f32.mrb[7].mxu1  ;;  %v1209_v50 = vpop.f32.mrb[23].mxu0  ;;  %v1774_v18 = vld [vmem:[#allocation2 + $0x120] sm:$0xff]  ;;  %v1740_v48 = vld [vmem:[#allocation2 + $0x10] sm:$0xff] }
 0x233   : > { %752 = vst.msk [vmem:[#allocation2 + $0x30] sm:$0xff] %vm745_vm2, %v736_v49  ;;  %1224 = vst.msk [vmem:[#allocation2 + $0x130] sm:$0xff] %vm745_vm2, %v1209_v50  ;;  %v7235_v24 = vpack.c.bf16 %v1775_v19, %v1774_v18  ;;  %v1741_v49 = vld [vmem:[#allocation2 + $0x18] sm:$0xff] }
 0x235   : > { %v6589_v51 = vpop.f32.mrb[8].mxu1  ;;  %v6659_v52 = vpop.f32.mrb[24].mxu0 }
 0x236   : > { %865 = vst.msk [vmem:[#allocation2 + $0x48] sm:$0xff] %vm745_vm2, %v6589_v51  ;;  %1455 = vst.msk [vmem:[#allocation2 + $0x188] sm:$0xff] %vm745_vm2, %v6659_v52  ;;  %v825_v53 = vpop.f32.mrb[9].mxu1  ;;  %v1415_v54 = vpop.f32.mrb[25].mxu0 }
 0x237   : > { %864 = vst.msk [vmem:[#allocation2 + $0x40] sm:$0xff] %vm745_vm2, %v825_v53  ;;  %1454 = vst.msk [vmem:[#allocation2 + $0x180] sm:$0xff] %vm745_vm2, %v1415_v54  ;;  %v7199_v54 = vpack.c.bf16 %v1741_v49, %v1740_v48 }
 0x239   : > { %v6592_v55 = vpop.f32.mrb[10].mxu1  ;;  %v6662_v56 = vpop.f32.mrb[26].mxu0  ;;  %v1777_v29 = vld [vmem:[#allocation2 + $0x138] sm:$0xff] }
 0x23a   : > { %867 = vst.msk [vmem:[#allocation2 + $0x58] sm:$0xff] %vm745_vm2, %v6592_v55  ;;  %1457 = vst.msk [vmem:[#allocation2 + $0x198] sm:$0xff] %vm745_vm2, %v6662_v56  ;;  %v835_v57 = vpop.f32.mrb[11].mxu1  ;;  %v1425_v58 = vpop.f32.mrb[27].mxu0  ;;  %v1776_v28 = vld [vmem:[#allocation2 + $0x130] sm:$0xff] }
 0x23b   : > { %866 = vst.msk [vmem:[#allocation2 + $0x50] sm:$0xff] %vm745_vm2, %v835_v57  ;;  %1456 = vst.msk [vmem:[#allocation2 + $0x190] sm:$0xff] %vm745_vm2, %v1425_v58  ;;  %v7239_v34 = vpack.c.bf16 %v1777_v29, %v1776_v28  ;;  %v1742_v57 = vld [vmem:[#allocation2 + $0x20] sm:$0xff]  ;;  %v1743_v58 = vld [vmem:[#allocation2 + $0x28] sm:$0xff] }
 0x23c   : > { %v7203_v62 = vpack.c.bf16 %v1743_v58, %v1742_v57 }
 0x23d   : > { %v6595_v59 = vpop.f32.mrb[12].mxu1  ;;  %v6665_v60 = vpop.f32.mrb[28].mxu0  ;;  %v1787_v61 = vld [vmem:[#allocation2 + $0x188] sm:$0xff] }
 0x23e   : > { %869 = vst.msk [vmem:[#allocation2 + $0x68] sm:$0xff] %vm745_vm2, %v6595_v59  ;;  %1459 = vst.msk [vmem:[#allocation2 + $0x1a8] sm:$0xff] %vm745_vm2, %v6665_v60  ;;  %v845_v0 = vpop.f32.mrb[13].mxu1  ;;  %v1435_v1 = vpop.f32.mrb[29].mxu0  ;;  %v1786_v2 = vld [vmem:[#allocation2 + $0x180] sm:$0xff] }
 0x23f   : > { %868 = vst.msk [vmem:[#allocation2 + $0x60] sm:$0xff] %vm745_vm2, %v845_v0  ;;  %1458 = vst.msk [vmem:[#allocation2 + $0x1a0] sm:$0xff] %vm745_vm2, %v1435_v1  ;;  %v7225_v3 = vpack.c.bf16 %v1787_v61, %v1786_v2  ;;  %v1744_v1 = vld [vmem:[#allocation2 + $0x30] sm:$0xff]  ;;  %v1745_v2 = vld [vmem:[#allocation2 + $0x38] sm:$0xff] }
 0x240   : > { %v1746_v9 = vld [vmem:[#allocation2 + $0x40] sm:$0xff] }
 0x241   : > { %v6598_v5 = vpop.f32.mrb[14].mxu1  ;;  %v6668_v6 = vpop.f32.mrb[30].mxu0  ;;  %7226 = vmatprep.subr.bf16.mxu0 %v7225_v3  ;;  %v1789_v7 = vld [vmem:[#allocation2 + $0x198] sm:$0xff] }
 0x242   : > { %871 = vst.msk [vmem:[#allocation2 + $0x78] sm:$0xff] %vm745_vm2, %v6598_v5  ;;  %1461 = vst.msk [vmem:[#allocation2 + $0x1b8] sm:$0xff] %vm745_vm2, %v6668_v6  ;;  %v855_v10 = vpop.f32.mrb[15].mxu1  ;;  %v1445_v11 = vpop.f32.mrb[31].mxu0  ;;  %7228 = vmatpush3.bf16.msra.mxu0 %v7227_v4  ;;  %v1788_v12 = vld [vmem:[#allocation2 + $0x190] sm:$0xff]  ;;  %v7207_v6 = vpack.c.bf16 %v1745_v2, %v1744_v1  ;;  %v1749_v18 = vld [vmem:[#allocation2 + $0x58] sm:$0xff] }
 0x243   : > { %870 = vst.msk [vmem:[#allocation2 + $0x70] sm:$0xff] %vm745_vm2, %v855_v10  ;;  %1460 = vst.msk [vmem:[#allocation2 + $0x1b0] sm:$0xff] %vm745_vm2, %v1445_v11  ;;  %v7229_v13 = vpack.c.bf16 %v1789_v7, %v1788_v12  ;;  %v1747_v10 = vld [vmem:[#allocation2 + $0x48] sm:$0xff]  ;;  %v1713_v1 = vld [vmem:[%s9205_s2 + $0x78] sm:$0xff] }
 0x244   : > { %v1719_v2 = vld [vmem:[%s9205_s2 + $0xa8] sm:$0xff] }
 0x245   : > { %v6603_v15 = vpop.f32.mrb[16].mxu1  ;;  %v6687_v16 = vpop.f32.mrb[32].mxu0  ;;  %7230 = vmatprep.subr.bf16.mxu0 %v7229_v13  ;;  %v1791_v17 = vld [vmem:[#allocation2 + $0x1a8] sm:$0xff] }
 0x246   : > { %983 = vst.msk [vmem:[#allocation2 + $0x88] sm:$0xff] %vm745_vm2, %v6603_v15  ;;  %1691 = vst.msk [vmem:[#allocation2 + $0x208] sm:$0xff] %vm745_vm2, %v6687_v16  ;;  %v943_v20 = vpop.f32.mrb[17].mxu1  ;;  %v1651_v21 = vpop.f32.mrb[33].mxu0  ;;  %7232 = vmatpush3.bf16.msra.mxu0 %v7231_v14  ;;  %v1790_v22 = vld [vmem:[#allocation2 + $0x1a0] sm:$0xff]  ;;  %v7211_v14 = vpack.c.bf16 %v1747_v10, %v1746_v9 }
 0x247   : > { %982 = vst.msk [vmem:[#allocation2 + $0x80] sm:$0xff] %vm745_vm2, %v943_v20  ;;  %1690 = vst.msk [vmem:[#allocation2 + $0x200] sm:$0xff] %vm745_vm2, %v1651_v21  ;;  %v7233_v23 = vpack.c.bf16 %v1791_v17, %v1790_v22  ;;  %v1748_v17 = vld [vmem:[#allocation2 + $0x50] sm:$0xff]  ;;  %v1718_v9 = vld [vmem:[%s9205_s2 + $0xa0] sm:$0xff] }
 0x248   : > { %v7215_v22 = vpack.c.bf16 %v1749_v18, %v1748_v17 }
 0x249   : > { %v6606_v25 = vpop.f32.mrb[18].mxu1  ;;  %v6690_v26 = vpop.f32.mrb[34].mxu0  ;;  %7234 = vmatprep.subr.bf16.mxu0 %v7233_v23  ;;  %v1793_v27 = vld [vmem:[#allocation2 + $0x1b8] sm:$0xff] }
 0x24a   : > { %985 = vst.msk [vmem:[#allocation2 + $0x98] sm:$0xff] %vm745_vm2, %v6606_v25  ;;  %1693 = vst.msk [vmem:[#allocation2 + $0x218] sm:$0xff] %vm745_vm2, %v6690_v26  ;;  %v953_v30 = vpop.f32.mrb[19].mxu1  ;;  %v1661_v31 = vpop.f32.mrb[35].mxu0  ;;  %7236 = vmatpush3.bf16.msra.mxu0 %v7235_v24  ;;  %v1792_v32 = vld [vmem:[#allocation2 + $0x1b0] sm:$0xff]  ;;  %v1750_v25 = vld [vmem:[#allocation2 + $0x60] sm:$0xff] }
 0x24b   : > { %984 = vst.msk [vmem:[#allocation2 + $0x90] sm:$0xff] %vm745_vm2, %v953_v30  ;;  %1692 = vst.msk [vmem:[#allocation2 + $0x210] sm:$0xff] %vm745_vm2, %v1661_v31  ;;  %v7237_v33 = vpack.c.bf16 %v1793_v27, %v1792_v32  ;;  %v1751_v26 = vld [vmem:[#allocation2 + $0x68] sm:$0xff] }
 0x24c   : > { %v7219_v30 = vpack.c.bf16 %v1751_v26, %v1750_v25 }
 0x24d   : > { %v6609_v35 = vpop.f32.mrb[20].mxu1  ;;  %v6693_v36 = vpop.f32.mrb[36].mxu0  ;;  %7238 = vmatprep.subr.bf16.mxu0 %v7237_v33  ;;  %v1755_v37 = vld [vmem:[#allocation2 + $0x88] sm:$0xff]  ;;  %v1752_v33 = vld [vmem:[#allocation2 + $0x70] sm:$0xff] }
 0x24e   : > { %987 = vst.msk [vmem:[#allocation2 + $0xa8] sm:$0xff] %vm745_vm2, %v6609_v35  ;;  %1695 = vst.msk [vmem:[#allocation2 + $0x228] sm:$0xff] %vm745_vm2, %v6693_v36  ;;  %v963_v40 = vpop.f32.mrb[21].mxu1  ;;  %v1671_v41 = vpop.f32.mrb[37].mxu0  ;;  %7240 = vmatpush3.bf16.msra.mxu0 %v7239_v34  ;;  %v1754_v42 = vld [vmem:[#allocation2 + $0x80] sm:$0xff]  ;;  %v1753_v34 = vld [vmem:[#allocation2 + $0x78] sm:$0xff] }
 0x24f   : > { %986 = vst.msk [vmem:[#allocation2 + $0xa0] sm:$0xff] %vm745_vm2, %v963_v40  ;;  %1694 = vst.msk [vmem:[#allocation2 + $0x220] sm:$0xff] %vm745_vm2, %v1671_v41  ;;  %v7193_v43 = vpack.c.bf16 %v1755_v37, %v1754_v42  ;;  %v1802_v37 = vld [vmem:[#allocation2 + $0x200] sm:$0xff]  ;;  %v1803_v38 = vld [vmem:[#allocation2 + $0x208] sm:$0xff]  ;;  %v7223_v40 = vpack.c.bf16 %v1753_v34, %v1752_v33 }
 0x250   : > { %v7257_v42 = vpack.c.bf16 %v1803_v38, %v1802_v37  ;;  %v1702_v37 = vld [vmem:[%s9205_s2 + $0x20] sm:$0xff] }
 0x251   : > { %v6612_v45 = vpop.f32.mrb[22].mxu1  ;;  %v6696_v46 = vpop.f32.mrb[38].mxu0  ;;  %7194 = vmatprep.subr.bf16.mxu1 %v7193_v43  ;;  %v1757_v47 = vld [vmem:[#allocation2 + $0x98] sm:$0xff] }
 0x252   : > { %989 = vst.msk [vmem:[#allocation2 + $0xb8] sm:$0xff] %vm745_vm2, %v6612_v45  ;;  %1697 = vst.msk [vmem:[#allocation2 + $0x238] sm:$0xff] %vm745_vm2, %v6696_v46  ;;  %v973_v50 = vpop.f32.mrb[23].mxu1  ;;  %v1681_v51 = vpop.f32.mrb[39].mxu0  ;;  %7196 = vmatpush3.bf16.msra.mxu1 %v7195_v44  ;;  %v1756_v52 = vld [vmem:[#allocation2 + $0x90] sm:$0xff]  ;;  %v1698_v44 = vld [vmem:[%s9205_s2] sm:$0xff] }
 0x253   : > { %988 = vst.msk [vmem:[#allocation2 + $0xb0] sm:$0xff] %vm745_vm2, %v973_v50  ;;  %1696 = vst.msk [vmem:[#allocation2 + $0x230] sm:$0xff] %vm745_vm2, %v1681_v51  ;;  %v7197_v53 = vpack.c.bf16 %v1757_v47, %v1756_v52  ;;  %v1804_v45 = vld [vmem:[#allocation2 + $0x210] sm:$0xff]  ;;  %v1805_v46 = vld [vmem:[#allocation2 + $0x218] sm:$0xff] }
 0x254   : > { %v1704_v47 = vld [vmem:[%s9205_s2 + $0x30] sm:$0xff]  ;;  %v7261_v49 = vpack.c.bf16 %v1805_v46, %v1804_v45  ;;  %v1711_v45 = vld [vmem:[%s9205_s2 + $0x68] sm:$0xff]  ;;  %v1722_v46 = vld [vmem:[%s9205_s2 + $0xc0] sm:$0xff] }
 0x255   : > { %v6617_v55 = vpop.f32.mrb[24].mxu1  ;;  %7198 = vmatprep.subr.bf16.mxu1 %v7197_v53  ;;  %v1759_v56 = vld [vmem:[#allocation2 + $0xa8] sm:$0xff] }
 0x256   : > { %1101 = vst.msk [vmem:[#allocation2 + $0xc8] sm:$0xff] %vm745_vm2, %v6617_v55  ;;  %v1061_v59 = vpop.f32.mrb[25].mxu1  ;;  %7200 = vmatpush3.bf16.msra.mxu1 %v7199_v54  ;;  %v1758_v60 = vld [vmem:[#allocation2 + $0xa0] sm:$0xff]  ;;  %v1807_v52 = vld [vmem:[#allocation2 + $0x228] sm:$0xff]  ;;  %v1709_v54 = vld [vmem:[%s9205_s2 + $0x58] sm:$0xff] }
 0x257   : > { %1100 = vst.msk [vmem:[#allocation2 + $0xc0] sm:$0xff] %vm745_vm2, %v1061_v59  ;;  %v7201_v61 = vpack.c.bf16 %v1759_v56, %v1758_v60  ;;  %v1806_v51 = vld [vmem:[#allocation2 + $0x220] sm:$0xff]  ;;  %v1703_v53 = vld [vmem:[%s9205_s2 + $0x28] sm:$0xff]  ;;  %v1708_v60 = vld [vmem:[%s9205_s2 + $0x50] sm:$0xff] }
 0x258   : > { %v7265_v56 = vpack.c.bf16 %v1807_v52, %v1806_v51  ;;  %v1715_v51 = vld [vmem:[%s9205_s2 + $0x88] sm:$0xff]  ;;  %v1737_v52 = vld [vmem:[%s9205_s2 + $0x138] sm:$0xff] }
 0x259   : > { %v6620_v63 = vpop.f32.mrb[26].mxu1  ;;  %7202 = vmatprep.subr.bf16.mxu1 %v7201_v61  ;;  %v1761_v0 = vld [vmem:[#allocation2 + $0xb8] sm:$0xff]  ;;  %v1714_v61 = vld [vmem:[%s9205_s2 + $0x80] sm:$0xff] }
 0x25a   : > { %1103 = vst.msk [vmem:[#allocation2 + $0xd8] sm:$0xff] %vm745_vm2, %v6620_v63  ;;  %v1071_v3 = vpop.f32.mrb[27].mxu1  ;;  %7204 = vmatpush3.bf16.msra.mxu1 %v7203_v62  ;;  %v1760_v4 = vld [vmem:[#allocation2 + $0xb0] sm:$0xff]  ;;  %v1809_v59 = vld [vmem:[#allocation2 + $0x238] sm:$0xff] }
 0x25b   : > { %1102 = vst.msk [vmem:[#allocation2 + $0xd0] sm:$0xff] %vm745_vm2, %v1071_v3  ;;  %v7205_v5 = vpack.c.bf16 %v1761_v0, %v1760_v4  ;;  %v1808_v58 = vld [vmem:[#allocation2 + $0x230] sm:$0xff] }
 0x25c   : > { %v7269_v63 = vpack.c.bf16 %v1809_v59, %v1808_v58  ;;  %v1730_v58 = vld [vmem:[%s9205_s2 + $0x100] sm:$0xff]  ;;  %v1736_v59 = vld [vmem:[%s9205_s2 + $0x130] sm:$0xff] }
 0x25d   : > { %v6623_v7 = vpop.f32.mrb[28].mxu1  ;;  %7206 = vmatprep.subr.bf16.mxu1 %v7205_v5  ;;  %v1763_v8 = vld [vmem:[#allocation2 + $0xc8] sm:$0xff] }
 0x25e   : > { %1105 = vst.msk [vmem:[#allocation2 + $0xe8] sm:$0xff] %vm745_vm2, %v6623_v7  ;;  %v1081_v11 = vpop.f32.mrb[29].mxu1  ;;  %7208 = vmatpush3.bf16.msra.mxu1 %v7207_v6  ;;  %v1762_v12 = vld [vmem:[#allocation2 + $0xc0] sm:$0xff] }
 0x25f   : > { %1104 = vst.msk [vmem:[#allocation2 + $0xe0] sm:$0xff] %vm745_vm2, %v1081_v11  ;;  %v7209_v13 = vpack.c.bf16 %v1763_v8, %v1762_v12  ;;  %v1724_v11 = vld [vmem:[%s9205_s2 + $0xd0] sm:$0xff] }
 0x261   : > { %v6626_v15 = vpop.f32.mrb[30].mxu1  ;;  %7210 = vmatprep.subr.bf16.mxu1 %v7209_v13  ;;  %v1765_v16 = vld [vmem:[#allocation2 + $0xd8] sm:$0xff] }
 0x262   : > { %1107 = vst.msk [vmem:[#allocation2 + $0xf8] sm:$0xff] %vm745_vm2, %v6626_v15  ;;  %v1091_v19 = vpop.f32.mrb[31].mxu1  ;;  %7212 = vmatpush3.bf16.msra.mxu1 %v7211_v14  ;;  %v1764_v20 = vld [vmem:[#allocation2 + $0xd0] sm:$0xff] }
 0x263   : > { %1106 = vst.msk [vmem:[#allocation2 + $0xf0] sm:$0xff] %vm745_vm2, %v1091_v19  ;;  %v7213_v21 = vpack.c.bf16 %v1765_v16, %v1764_v20  ;;  %v1723_v19 = vld [vmem:[%s9205_s2 + $0xc8] sm:$0xff] }
 0x265   : > { %v6645_v23 = vpop.f32.mrb[32].mxu1  ;;  %7214 = vmatprep.subr.bf16.mxu1 %v7213_v21  ;;  %v1767_v24 = vld [vmem:[#allocation2 + $0xe8] sm:$0xff]  ;;  %v1729_v21 = vld [vmem:[%s9205_s2 + $0xf8] sm:$0xff] }
 0x266   : > { %1337 = vst.msk [vmem:[#allocation2 + $0x148] sm:$0xff] %vm745_vm2, %v6645_v23  ;;  %v1297_v27 = vpop.f32.mrb[33].mxu1  ;;  %7216 = vmatpush3.bf16.msra.mxu1 %v7215_v22  ;;  %v1766_v28 = vld [vmem:[#allocation2 + $0xe0] sm:$0xff] }
 0x267   : > { %1336 = vst.msk [vmem:[#allocation2 + $0x140] sm:$0xff] %vm745_vm2, %v1297_v27  ;;  %v7217_v29 = vpack.c.bf16 %v1767_v24, %v1766_v28  ;;  %v1728_v27 = vld [vmem:[%s9205_s2 + $0xf0] sm:$0xff] }
 0x269   : > { %v6648_v31 = vpop.f32.mrb[34].mxu1  ;;  %7218 = vmatprep.subr.bf16.mxu1 %v7217_v29  ;;  %v1769_v32 = vld [vmem:[#allocation2 + $0xf8] sm:$0xff]  ;;  %v1734_v29 = vld [vmem:[%s9205_s2 + $0x120] sm:$0xff] }
 0x26a   : > { %1339 = vst.msk [vmem:[#allocation2 + $0x158] sm:$0xff] %vm745_vm2, %v6648_v31  ;;  %v1307_v35 = vpop.f32.mrb[35].mxu1  ;;  %7220 = vmatpush3.bf16.msra.mxu1 %v7219_v30  ;;  %v1768_v36 = vld [vmem:[#allocation2 + $0xf0] sm:$0xff] }
 0x26b   : > { %1338 = vst.msk [vmem:[#allocation2 + $0x150] sm:$0xff] %vm745_vm2, %v1307_v35  ;;  %v7221_v39 = vpack.c.bf16 %v1769_v32, %v1768_v36  ;;  %v1733_v35 = vld [vmem:[%s9205_s2 + $0x118] sm:$0xff] }
 0x26d   : > { %v6651_v41 = vpop.f32.mrb[36].mxu1  ;;  %7222 = vmatprep.subr.bf16.mxu1 %v7221_v39  ;;  %v1779_v6 = vld [vmem:[#allocation2 + $0x148] sm:$0xff]  ;;  %v1700_v39 = vld [vmem:[%s9205_s2 + $0x10] sm:$0xff] }
 0x26e   : > { %1341 = vst.msk [vmem:[#allocation2 + $0x168] sm:$0xff] %vm745_vm2, %v6651_v41  ;;  %v1317_v43 = vpop.f32.mrb[37].mxu1  ;;  %7224 = vmatpush3.bf16.msra.mxu1 %v7223_v40  ;;  %v1778_v5 = vld [vmem:[#allocation2 + $0x140] sm:$0xff]  ;;  %v1707_v40 = vld [vmem:[%s9205_s2 + $0x48] sm:$0xff] }
 0x26f   : > { %1340 = vst.msk [vmem:[#allocation2 + $0x160] sm:$0xff] %vm745_vm2, %v1317_v43  ;;  %7258 = vmatprep.subr.bf16.mxu1 %v7257_v42  ;;  %v7243_v12 = vpack.c.bf16 %v1779_v6, %v1778_v5  ;;  %v1706_v41 = vld [vmem:[%s9205_s2 + $0x40] sm:$0xff]  ;;  %v1705_v43 = vld [vmem:[%s9205_s2 + $0x38] sm:$0xff] }
 0x270   : > { %v2315_v6 = vld [vmem:[#allocation3 + $0x20] sm:$0xff] }
 0x271   : > { %v6654_v48 = vpop.f32.mrb[38].mxu1  ;;  %1907 = vmatmul.mubr.f32.vlgmr.msra.gmra.mrb[48].mxu1 %v1698_v44  ;;  %v1781_v16 = vld [vmem:[#allocation2 + $0x158] sm:$0xff] }
 0x272   : > { %1343 = vst.msk [vmem:[#allocation2 + $0x178] sm:$0xff] %vm745_vm2, %v6654_v48  ;;  %v1327_v50 = vpop.f32.mrb[39].mxu1  ;;  %7260 = vmatpush3.bf16.msra.mxu1 %v7257_v42  ;;  %1911 = vmatprep.mubr.f32.mxu1 %v1704_v47  ;;  %v1780_v15 = vld [vmem:[#allocation2 + $0x150] sm:$0xff]  ;;  %v1717_v44 = vld [vmem:[%s9205_s2 + $0x98] sm:$0xff]  ;;  %v1710_v47 = vld [vmem:[%s9205_s2 + $0x60] sm:$0xff] }
 0x273   : > { %1342 = vst.msk [vmem:[#allocation2 + $0x170] sm:$0xff] %vm745_vm2, %v1327_v50  ;;  %7262 = vmatprep.subr.bf16.mxu1 %v7261_v49  ;;  %v7247_v22 = vpack.c.bf16 %v1781_v16, %v1780_v15  ;;  %v1712_v42 = vld [vmem:[%s9205_s2 + $0x70] sm:$0xff]  ;;  %v1727_v48 = vld [vmem:[%s9205_s2 + $0xe8] sm:$0xff] }
 0x274   : > { %v1732_v50 = vld [vmem:[%s9205_s2 + $0x110] sm:$0xff] }
 0x275   : > { %v6673_v55 = vpop.f32.mrb[40].mxu1  ;;  %1912 = vmatmul.mubr.f32.gmra.mrb[50].mxu1 %v1703_v53  ;;  %v1783_v25 = vld [vmem:[#allocation2 + $0x168] sm:$0xff]  ;;  %v1721_v53 = vld [vmem:[%s9205_s2 + $0xb8] sm:$0xff] }
 0x276   : > { %1573 = vst.msk [vmem:[#allocation2 + $0x1c8] sm:$0xff] %vm745_vm2, %v6673_v55  ;;  %v1533_v57 = vpop.f32.mrb[41].mxu1  ;;  %7264 = vmatpush3.bf16.msra.mxu1 %v7261_v49  ;;  %1916 = vmatprep.mubr.f32.mxu1 %v1709_v54  ;;  %v1782_v24 = vld [vmem:[#allocation2 + $0x160] sm:$0xff]  ;;  %v1716_v49 = vld [vmem:[%s9205_s2 + $0x90] sm:$0xff] }
 0x277   : > { %1572 = vst.msk [vmem:[#allocation2 + $0x1c0] sm:$0xff] %vm745_vm2, %v1533_v57  ;;  %7266 = vmatprep.subr.bf16.mxu1 %v7265_v56  ;;  %v7251_v30 = vpack.c.bf16 %v1783_v25, %v1782_v24  ;;  %v1720_v54 = vld [vmem:[%s9205_s2 + $0xb0] sm:$0xff]  ;;  %v1726_v55 = vld [vmem:[%s9205_s2 + $0xe0] sm:$0xff]  ;;  %v1731_v57 = vld [vmem:[%s9205_s2 + $0x108] sm:$0xff] }
 0x279   : > { %v6676_v62 = vpop.f32.mrb[42].mxu1  ;;  %1917 = vmatmul.mubr.f32.gmra.mrb[52].mxu1 %v1708_v60  ;;  %v1785_v33 = vld [vmem:[#allocation2 + $0x178] sm:$0xff]  ;;  %v1735_v60 = vld [vmem:[%s9205_s2 + $0x128] sm:$0xff] }
 0x27a   : > { %1575 = vst.msk [vmem:[#allocation2 + $0x1d8] sm:$0xff] %vm745_vm2, %v6676_v62  ;;  %v1543_v0 = vpop.f32.mrb[43].mxu1  ;;  %7268 = vmatpush3.bf16.msra.mxu1 %v7265_v56  ;;  %1921 = vmatprep.mubr.f32.mxu1 %v1714_v61  ;;  %v1784_v32 = vld [vmem:[#allocation2 + $0x170] sm:$0xff]  ;;  %v1725_v56 = vld [vmem:[%s9205_s2 + $0xd8] sm:$0xff]  ;;  %v2173_v61 = vld [vmem:[#allocation3] sm:$0xff] }
 0x27b   : > { %1574 = vst.msk [vmem:[#allocation2 + $0x1d0] sm:$0xff] %vm745_vm2, %v1543_v0  ;;  %7270 = vmatprep.subr.bf16.mxu1 %v7269_v63  ;;  %v7255_v38 = vpack.c.bf16 %v1785_v33, %v1784_v32  ;;  %v2174_v62 = vld [vmem:[#allocation3 + $0x8] sm:$0xff]  ;;  %v2175_v0 = vld [vmem:[#allocation3 + $0x10] sm:$0xff]  ;;  %v8353_v33 = vld [vmem:[%s9207_s4] ss:$0 sm:$0xff] }
 0x27d   : > { %v6679_v3 = vpop.f32.mrb[44].mxu1  ;;  %1922 = vmatmul.mubr.f32.gmra.mrb[54].mxu1 %v1713_v1  ;;  %v1795_v4 = vld [vmem:[#allocation2 + $0x1c8] sm:$0xff]  ;;  %v2176_v1 = vld [vmem:[#allocation3 + $0x18] sm:$0xff] }
 0x27e   : > { %1577 = vst.msk [vmem:[#allocation2 + $0x1e8] sm:$0xff] %vm745_vm2, %v6679_v3  ;;  %v1553_v7 = vpop.f32.mrb[45].mxu1  ;;  %7272 = vmatpush3.bf16.msra.mxu1 %v7269_v63  ;;  %v1794_v8 = vld [vmem:[#allocation2 + $0x1c0] sm:$0xff]  ;;  %1926 = vmatprep.mubr.f32.mxu1 %v1719_v2  ;;  %v7273_v63 = vpack.c.bf16 %v2174_v62, %v2173_v61  ;;  %v7277_v2 = vpack.c.bf16 %v2176_v1, %v2175_v0 }
 0x27f   : > { %1576 = vst.msk [vmem:[#allocation2 + $0x1e0] sm:$0xff] %vm745_vm2, %v1553_v7  ;;  %v7241_v10 = vpack.c.bf16 %v1795_v4, %v1794_v8  ;;  %v2433_v3 = vld [vmem:[#allocation3 + $0x40] sm:$0xff]  ;;  %v2434_v4 = vld [vmem:[#allocation3 + $0x48] sm:$0xff] }
 0x280   : > { %7585 = vmatprep.subr.bf16.mxu1 %v7273_v63  ;;  %v8338_v5 = vpack.c.bf16 %v2434_v4, %v2433_v3  ;;  %v2316_v7 = vld [vmem:[#allocation3 + $0x28] sm:$0xff] }
 0x281   : > { %v6682_v13 = vpop.f32.mrb[46].mxu1  ;;  %7242 = vmatprep.subr.bf16.mxu0 %v7241_v10  ;;  %1927 = vmatmul.mubr.f32.gmra.mrb[56].mxu1 %v1718_v9  ;;  %v1797_v14 = vld [vmem:[#allocation2 + $0x1d8] sm:$0xff]  ;;  %v8341_v8 = vpack.c.bf16 %v2316_v7, %v2315_v6  ;;  %v2670_v3 = vld [vmem:[#allocation3 + $0x88] sm:$0xff] }
 0x282   : > { %1579 = vst.msk [vmem:[#allocation2 + $0x1f8] sm:$0xff] %vm745_vm2, %v6682_v13  ;;  %v1563_v17 = vpop.f32.mrb[47].mxu1  ;;  %7244 = vmatpush3.bf16.msra.mxu0 %v7243_v12  ;;  %v1796_v18 = vld [vmem:[#allocation2 + $0x1d0] sm:$0xff]  ;;  %1931 = vmatprep.mubr.f32.mxu1 %v1724_v11 }
 0x283   : > { %1578 = vst.msk [vmem:[#allocation2 + $0x1f0] sm:$0xff] %vm745_vm2, %v1563_v17  ;;  %v7245_v20 = vpack.c.bf16 %v1797_v14, %v1796_v18 }
 0x285   : > { %7246 = vmatprep.subr.bf16.mxu0 %v7245_v20  ;;  %1932 = vmatmul.mubr.f32.gmra.mrb[58].mxu1 %v1723_v19  ;;  %v1799_v23 = vld [vmem:[#allocation2 + $0x1e8] sm:$0xff] }
 0x286   : > { %7248 = vmatpush3.bf16.msra.mxu0 %v7247_v22  ;;  %v1798_v26 = vld [vmem:[#allocation2 + $0x1e0] sm:$0xff]  ;;  %1936 = vmatprep.mubr.f32.mxu1 %v1729_v21 }
 0x287   : > { %v7249_v28 = vpack.c.bf16 %v1799_v23, %v1798_v26 }
 0x289   : > { %7250 = vmatprep.subr.bf16.mxu0 %v7249_v28  ;;  %1937 = vmatmul.mubr.f32.gmra.mrb[60].mxu1 %v1728_v27  ;;  %v1801_v31 = vld [vmem:[#allocation2 + $0x1f8] sm:$0xff] }
 0x28a   : > { %7252 = vmatpush3.bf16.msra.mxu0 %v7251_v30  ;;  %v1800_v34 = vld [vmem:[#allocation2 + $0x1f0] sm:$0xff]  ;;  %1941 = vmatprep.mubr.f32.mxu1 %v1734_v29 }
 0x28b   : > { %v7253_v36 = vpack.c.bf16 %v1801_v31, %v1800_v34 }
 0x28d   : > { %7254 = vmatprep.subr.bf16.mxu0 %v7253_v36  ;;  %1942 = vmatmul.mubr.f32.gmra.mrb[62].mxu1 %v1733_v35 }
 0x28e   : > { %7256 = vmatpush3.bf16.msra.mxu0 %v7255_v38  ;;  %6713 = vmatprep.mubr.msk.f32.mxu1 %vm1817_vm3, %v1702_v37 }
 0x28f   : > { %7274 = vmatprep.subr.bf16.mxu0 %v7273_v63 }
 0x291   : > { %2012 = vmatmul.mubr.f32.vlgmr.msra.gmra.mrb[40].mxu0 %v1700_v39  ;;  %6714 = vmatmul.mubr.msk.f32.vlgmr.msra.gmra.mrb[64].mxu1 %vm1817_vm3, %v1707_v40 }
 0x292   : > { %2016 = vmatprep.mubr.f32.mxu0 %v1706_v41  ;;  %6716 = vmatprep.mubr.msk.f32.mxu1 %vm1817_vm3, %v1712_v42 }
 0x293   : > { %7276 = vmatpush3.bf16.msra.mxu0 %v7273_v63  ;;  %7587 = vmatpush3.bf16.msra.mxu1 %v7273_v63 }
 0x294   : > { %7278 = vmatprep.subr.bf16.mxu0 %v7277_v2  ;;  %7586 = vmatprep.subr.bf16.mxu1 %v7277_v2 }
 0x295   : > { %2017 = vmatmul.mubr.f32.gmra.mrb[42].mxu0 %v1705_v43  ;;  %6717 = vmatmul.mubr.msk.f32.gmra.mrb[66].mxu1 %vm1817_vm3, %v1717_v44 }
 0x296   : > { %2021 = vmatprep.mubr.f32.mxu0 %v1711_v45  ;;  %6719 = vmatprep.mubr.msk.f32.mxu1 %vm1817_vm3, %v1722_v46 }
 0x297   : > { %7280 = vmatpush3.bf16.msra.mxu0 %v7277_v2  ;;  %7588 = vmatpush3.bf16.msra.mxu1 %v7277_v2  ;;  %v2669_v2 = vld [vmem:[#allocation3 + $0x80] sm:$0xff] }
 0x298   : > { %7290 = vmatprep.subr.bf16.mxu0 %v8338_v5  ;;  %7282 = vmatprep.subr.bf16.mxu1 %v8341_v8 }
 0x299   : > { %2022 = vmatmul.mubr.f32.gmra.mrb[44].mxu0 %v1710_v47  ;;  %6720 = vmatmul.mubr.msk.f32.gmra.mrb[68].mxu1 %vm1817_vm3, %v1727_v48 }
 0x29a   : > { %2026 = vmatprep.mubr.f32.mxu0 %v1716_v49  ;;  %6722 = vmatprep.mubr.msk.f32.mxu1 %vm1817_vm3, %v1732_v50 }
 0x29d   : > { %2027 = vmatmul.mubr.f32.gmra.mrb[46].mxu0 %v1715_v51  ;;  %6723 = vmatmul.mubr.msk.f32.gmra.mrb[70].mxu1 %vm1817_vm3, %v1737_v52 }
 0x29e   : > { %2031 = vmatprep.mubr.f32.mxu0 %v1721_v53 }
 0x2a1   : > { %2032 = vmatmul.mubr.f32.gmra.mrb[48].mxu0 %v1720_v54  ;;  %v2435_v54 = vld [vmem:[#allocation3 + $0x50] sm:$0xff] }
 0x2a2   : > { %2036 = vmatprep.mubr.f32.mxu0 %v1726_v55  ;;  %v2436_v55 = vld [vmem:[#allocation3 + $0x58] sm:$0xff] }
 0x2a3   : > { %v7293_v62 = vpack.c.bf16 %v2436_v55, %v2435_v54  ;;  %v2554_v54 = vld [vmem:[#allocation3 + $0x78] sm:$0xff] }
 0x2a5   : > { %2037 = vmatmul.mubr.f32.gmra.mrb[50].mxu0 %v1725_v56 }
 0x2a6   : > { %2041 = vmatprep.mubr.f32.mxu0 %v1731_v57 }
 0x2a9   : > { %2042 = vmatmul.mubr.f32.gmra.mrb[52].mxu0 %v1730_v58 }
 0x2aa   : > { %2046 = vmatprep.mubr.f32.mxu0 %v1736_v59 }
 0x2ad   : > { %2047 = vmatmul.mubr.f32.gmra.mrb[54].mxu0 %v1735_v60 }
 0x344   : > { %v5991_v9 = vpop.f32.mrb[48].mxu1 }
 0x345   : > { %v5992_v10 = vpop.f32.mrb[49].mxu1 }
 0x346   : > { %v5993_v11 = vadd.f32 %v5992_v10, %v5991_v9 }
 0x348   : > { %v5994_v12 = vpop.f32.mrb[50].mxu1  ;;  %v1909_v38 = vadd.f32 %v5993_v11, %v8353_v33 }
 0x349   : > { %v5995_v13 = vpop.f32.mrb[51].mxu1 }
 0x34a   : > { %v5996_v14 = vadd.f32 %v5995_v13, %v5994_v12  ;;  %v7305_v12 = vpack.c.bf16 %v2670_v3, %v2669_v2  ;;  %v2789_v2 = vld [vmem:[#allocation3 + $0xb0] sm:$0xff]  ;;  %v2790_v3 = vld [vmem:[#allocation3 + $0xb8] sm:$0xff] }
 0x34c   : > { %v5997_v15 = vpop.f32.mrb[52].mxu1  ;;  %v1914_v45 = vadd.f32 %v5996_v14, %v8353_v33 }
 0x34d   : > { %v5998_v16 = vpop.f32.mrb[53].mxu1 }
 0x34e   : > { %v5999_v17 = vadd.f32 %v5998_v16, %v5997_v15 }
 0x350   : > { %v6000_v18 = vpop.f32.mrb[54].mxu1  ;;  %v1919_v56 = vadd.f32 %v5999_v17, %v8353_v33 }
 0x351   : > { %v6001_v19 = vpop.f32.mrb[55].mxu1 }
 0x352   : > { %v6002_v20 = vadd.f32 %v6001_v19, %v6000_v18 }
 0x354   : > { %v6003_v21 = vpop.f32.mrb[56].mxu1  ;;  %v1924_v4 = vadd.f32 %v6002_v20, %v8353_v33  ;;  %v2671_v20 = vld [vmem:[#allocation3 + $0x90] sm:$0xff] }
 0x355   : > { %v6004_v22 = vpop.f32.mrb[57].mxu1 }
 0x356   : > { %v6005_v23 = vadd.f32 %v6004_v22, %v6003_v21  ;;  %v2672_v21 = vld [vmem:[#allocation3 + $0x98] sm:$0xff] }
 0x358   : > { %v6006_v24 = vpop.f32.mrb[58].mxu1  ;;  %v1929_v14 = vadd.f32 %v6005_v23, %v8353_v33 }
 0x359   : > { %v6007_v25 = vpop.f32.mrb[59].mxu1 }
 0x35a   : > { %v8344_v26 = vadd.f32 %v6007_v25, %v6006_v24 }
 0x35c   : > { %v6009_v27 = vpop.f32.mrb[60].mxu1  ;;  %v1934_v22 = vadd.f32 %v8344_v26, %v8353_v33 }
 0x35d   : > { %v6010_v28 = vpop.f32.mrb[61].mxu1 }
 0x35e   : > { %v8346_v29 = vadd.f32 %v6010_v28, %v6009_v27 }
 0x360   : > { %v6012_v30 = vpop.f32.mrb[62].mxu1  ;;  %v1939_v26 = vadd.f32 %v8346_v29, %v8353_v33 }
 0x361   : > { %v6013_v31 = vpop.f32.mrb[63].mxu1 }
 0x362   : > { %v8348_v32 = vadd.f32 %v6013_v31, %v6012_v30  ;;  %v7309_v30 = vpack.c.bf16 %v2672_v21, %v2671_v20 }
 0x364   : > { %v6047_v34 = vpop.f32.mrb[40].mxu0  ;;  %v6715_v35 = vpop.f32.mrb[64].mxu1 }
 0x365   : > { %v6048_v36 = vpop.f32.mrb[41].mxu0  ;;  %v2118_v37 = vpop.f32.mrb[65].mxu1 }
 0x366   : > { %v6049_v39 = vadd.f32 %v6048_v36, %v6047_v34  ;;  %v2317_v34 = vld [vmem:[#allocation3 + $0x30] sm:$0xff] }
 0x368   : > { %v6050_v40 = vpop.f32.mrb[42].mxu0  ;;  %v2014_v41 = vadd.f32 %v6049_v39, %v1909_v38  ;;  %v6718_v42 = vpop.f32.mrb[66].mxu1  ;;  %v2905_v38 = vld [vmem:[#allocation3 + $0xc0] sm:$0xff]  ;;  %v2906_v39 = vld [vmem:[#allocation3 + $0xc8] sm:$0xff] }
 0x369   : > { %v6051_v43 = vpop.f32.mrb[43].mxu0  ;;  %v2128_v44 = vpop.f32.mrb[67].mxu1 }
 0x36a   : > { %v6052_v46 = vadd.f32 %v6051_v43, %v6050_v40  ;;  %v2119_v47 = vadd.f32 %v2118_v37, %v2014_v41 }
 0x36c   : > { %v2019_v48 = vadd.f32 %v6052_v46, %v1914_v45  ;;  %2157 = vst.msk [vmem:[%s8362_s16] sm:$0xff] %vm745_vm2, %v2119_v47  ;;  %v8367_v49 = vmax.f32 %v2119_v47, 0.0  ;;  %v6053_v50 = vpop.f32.mrb[44].mxu0  ;;  %v6721_v51 = vpop.f32.mrb[68].mxu1  ;;  %v2552_v45 = vld [vmem:[#allocation3 + $0x68] sm:$0xff]  ;;  %v7321_v46 = vpack.c.bf16 %v2906_v39, %v2905_v38  ;;  %v1944_v47 = vadd.f32 %v8348_v32, %v8353_v33 }
 0x36d   : > { %v6054_v52 = vpop.f32.mrb[45].mxu0  ;;  %v2138_v53 = vpop.f32.mrb[69].mxu1 }
 0x36e   : > { %v2124_v57 = vadd.f32 %v6715_v35, %v2019_v48  ;;  %v6055_v58 = vadd.f32 %v6054_v52, %v6053_v50  ;;  %6733 = vmatprep.mubr.msk.f32.mxu0 %vm745_vm2, %v8367_v49  ;;  %v2318_v35 = vld [vmem:[#allocation3 + $0x38] sm:$0xff] }
 0x370   : > { %2158 = vst.msk [vmem:[%s8362_s16 + $0x8] sm:$0xff] %vm745_vm2, %v2124_v57  ;;  %v8374_v59 = vmax.f32 %v2124_v57, 0.0  ;;  %v6056_v60 = vpop.f32.mrb[46].mxu0  ;;  %v2024_v61 = vadd.f32 %v6055_v58, %v1919_v56  ;;  %v8376_v63 = vpop.f32.mrb[70].mxu1  ;;  %v2907_v56 = vld [vmem:[#allocation3 + $0xd0] sm:$0xff]  ;;  %v2908_v57 = vld [vmem:[#allocation3 + $0xd8] sm:$0xff] }
 0x371   : > { %v6057_v0 = vpop.f32.mrb[47].mxu0  ;;  %v2148_v1 = vpop.f32.mrb[71].mxu1  ;;  %v2787_v58 = vld [vmem:[#allocation3 + $0xa0] sm:$0xff] }
 0x372   : > { %v6058_v6 = vadd.f32 %v6057_v0, %v6056_v60  ;;  %v2129_v7 = vadd.f32 %v2128_v44, %v2024_v61  ;;  %6734 = vmatmul.mubr.msk.f32.vlgmr.msra.gmra.mrb[56].mxu0 %vm745_vm2, %v8374_v59  ;;  %v2551_v44 = vld [vmem:[#allocation3 + $0x60] sm:$0xff]  ;;  %v2788_v60 = vld [vmem:[#allocation3 + $0xa8] sm:$0xff]  ;;  %v7325_v61 = vpack.c.bf16 %v2908_v57, %v2907_v56 }
 0x373   : > { %7292 = vmatpush3.bf16.msra.mxu0 %v8338_v5  ;;  %v7297_v32 = vpack.c.bf16 %v2552_v45, %v2551_v44  ;;  %v3142_v0 = vld [vmem:[#allocation3 + $0x108] sm:$0xff] }
 0x374   : > { %v2029_v9 = vadd.f32 %v6058_v6, %v1924_v4  ;;  %2159 = vst.msk [vmem:[%s8362_s16 + $0x10] sm:$0xff] %vm745_vm2, %v2129_v7  ;;  %v8384_v10 = vmax.f32 %v2129_v7, 0.0  ;;  %v6059_v11 = vpop.f32.mrb[48].mxu0  ;;  %7294 = vmatprep.subr.bf16.mxu0 %v7293_v62  ;;  %v7317_v4 = vpack.c.bf16 %v2790_v3, %v2789_v2  ;;  %v3143_v6 = vld [vmem:[#allocation3 + $0x110] sm:$0xff]  ;;  %v3144_v7 = vld [vmem:[#allocation3 + $0x118] sm:$0xff] }
 0x375   : > { %v6060_v13 = vpop.f32.mrb[49].mxu0 }
 0x376   : > { %v2134_v15 = vadd.f32 %v6718_v42, %v2029_v9  ;;  %v6061_v16 = vadd.f32 %v6060_v13, %v6059_v11  ;;  %6736 = vmatprep.mubr.msk.f32.mxu0 %vm745_vm2, %v8384_v10  ;;  %v7285_v42 = vpack.c.bf16 %v2318_v35, %v2317_v34  ;;  %v3023_v9 = vld [vmem:[#allocation3 + $0xe0] sm:$0xff]  ;;  %v3024_v11 = vld [vmem:[#allocation3 + $0xe8] sm:$0xff] }
 0x377   : > { %7296 = vmatpush3.bf16.msra.mxu0 %v7293_v62  ;;  %v7313_v62 = vpack.c.bf16 %v2788_v60, %v2787_v58  ;;  %v7329_v13 = vpack.c.bf16 %v3024_v11, %v3023_v9 }
 0x378   : > { %2160 = vst.msk [vmem:[%s8362_s16 + $0x18] sm:$0xff] %vm745_vm2, %v2134_v15  ;;  %v8391_v5 = vmax.f32 %v2134_v15, 0.0  ;;  %v6062_v17 = vpop.f32.mrb[50].mxu0  ;;  %v2034_v18 = vadd.f32 %v6061_v16, %v1929_v14  ;;  %7306 = vmatprep.subr.bf16.mxu0 %v7305_v12  ;;  %v3025_v14 = vld [vmem:[#allocation3 + $0xf0] sm:$0xff]  ;;  %v3026_v15 = vld [vmem:[#allocation3 + $0xf8] sm:$0xff] }
 0x379   : > { %v6063_v19 = vpop.f32.mrb[51].mxu0  ;;  %v7333_v16 = vpack.c.bf16 %v3026_v15, %v3025_v14 }
 0x37a   : > { %v6064_v23 = vadd.f32 %v6063_v19, %v6062_v17  ;;  %v2139_v24 = vadd.f32 %v2138_v53, %v2034_v18  ;;  %6737 = vmatmul.mubr.msk.f32.gmra.mrb[58].mxu0 %vm745_vm2, %v8391_v5  ;;  %v2553_v53 = vld [vmem:[#allocation3 + $0x70] sm:$0xff] }
 0x37b   : > { %6773 = vmatprep.mubr.msk.f32.mxu0 %vm745_vm2, %v8367_v49  ;;  %v7301_v55 = vpack.c.bf16 %v2554_v54, %v2553_v53 }
 0x37c   : > { %v2039_v25 = vadd.f32 %v6064_v23, %v1934_v22  ;;  %2161 = vst.msk [vmem:[%s8362_s16 + $0x20] sm:$0xff] %vm745_vm2, %v2139_v24  ;;  %v8401_v27 = vmax.f32 %v2139_v24, 0.0  ;;  %v6065_v28 = vpop.f32.mrb[52].mxu0 }
 0x37d   : > { %v6066_v31 = vpop.f32.mrb[53].mxu0 }
 0x37e   : > { %v2144_v36 = vadd.f32 %v6721_v51, %v2039_v25  ;;  %v6067_v37 = vadd.f32 %v6066_v31, %v6065_v28  ;;  %6739 = vmatprep.mubr.msk.f32.mxu1 %vm745_vm2, %v8401_v27  ;;  %6774 = vmatmul.mubr.msk.f32.vlgmr.msra.gmra.mrb[60].mxu0 %vm745_vm2, %v8374_v59 }
 0x37f   : > { %6776 = vmatprep.mubr.msk.f32.mxu0 %vm745_vm2, %v8384_v10  ;;  %7308 = vmatpush3.bf16.msra.mxu0 %v7305_v12  ;;  %v7341_v12 = vpack.c.bf16 %v3144_v7, %v3143_v6 }
 0x380   : > { %2162 = vst.msk [vmem:[%s8362_s16 + $0x28] sm:$0xff] %vm745_vm2, %v2144_v36  ;;  %v8413_v40 = vmax.f32 %v2144_v36, 0.0  ;;  %v6068_v41 = vpop.f32.mrb[54].mxu0  ;;  %v2044_v29 = vadd.f32 %v6067_v37, %v1939_v26  ;;  %7310 = vmatprep.subr.bf16.mxu0 %v7309_v30 }
 0x381   : > { %v6069_v43 = vpop.f32.mrb[55].mxu0 }
 0x382   : > { %v6070_v48 = vadd.f32 %v6069_v43, %v6068_v41  ;;  %v2149_v50 = vadd.f32 %v2148_v1, %v2044_v29  ;;  %6740 = vmatmul.mubr.msk.f32.vlgmr.msra.gmra.mrb[72].mxu1 %vm745_vm2, %v8413_v40  ;;  %6777 = vmatmul.mubr.msk.f32.gmra.mrb[62].mxu0 %vm745_vm2, %v8391_v5 }
 0x383   : > { %6779 = vmatprep.mubr.msk.f32.mxu0 %vm745_vm2, %v8401_v27  ;;  %7284 = vmatpush3.bf16.msra.mxu1 %v8341_v8 }
 0x384   : > { %v2049_v51 = vadd.f32 %v6070_v48, %v1944_v47  ;;  %2163 = vst.msk [vmem:[%s8362_s16 + $0x30] sm:$0xff] %vm745_vm2, %v2149_v50  ;;  %v8426_v52 = vmax.f32 %v2149_v50, 0.0  ;;  %7286 = vmatprep.subr.bf16.mxu1 %v7285_v42  ;;  %7312 = vmatpush3.bf16.msra.mxu0 %v7309_v30 }
 0x385   : > { %7322 = vmatprep.subr.bf16.mxu0 %v7321_v46 }
 0x386   : > { %v2154_v33 = vadd.f32 %v8376_v63, %v2049_v51  ;;  %6742 = vmatprep.mubr.msk.f32.mxu1 %vm745_vm2, %v8426_v52  ;;  %6780 = vmatmul.mubr.msk.f32.gmra.mrb[64].mxu0 %vm745_vm2, %v8413_v40  ;;  %v3141_v63 = vld [vmem:[#allocation3 + $0x100] sm:$0xff] }
 0x387   : > { %6782 = vmatprep.mubr.msk.f32.mxu0 %vm745_vm2, %v8426_v52  ;;  %7288 = vmatpush3.bf16.msra.mxu1 %v7285_v42  ;;  %v7337_v1 = vpack.c.bf16 %v3142_v0, %v3141_v63 }
 0x388   : > { %2164 = vst.msk [vmem:[%s8362_s16 + $0x38] sm:$0xff] %vm745_vm2, %v2154_v33  ;;  %v8437_v8 = vmax.f32 %v2154_v33, 0.0  ;;  %7298 = vmatprep.subr.bf16.mxu1 %v7297_v32 }
 0x38a   : > { %6743 = vmatmul.mubr.msk.f32.gmra.mrb[74].mxu1 %vm745_vm2, %v8437_v8  ;;  %6783 = vmatmul.mubr.msk.f32.gmra.mrb[66].mxu0 %vm745_vm2, %v8437_v8 }
 0x38b   : > { %6753 = vmatprep.mubr.msk.f32.mxu1 %vm745_vm2, %v8367_v49  ;;  %6813 = vmatprep.mubr.msk.f32.mxu0 %vm745_vm2, %v8367_v49 }
 0x38e   : > { %6754 = vmatmul.mubr.msk.f32.vlgmr.msra.gmra.mrb[76].mxu1 %vm745_vm2, %v8374_v59  ;;  %6814 = vmatmul.mubr.msk.f32.vlgmr.msra.gmra.mrb[68].mxu0 %vm745_vm2, %v8374_v59 }
 0x38f   : > { %7300 = vmatpush3.bf16.msra.mxu1 %v7297_v32  ;;  %6756 = vmatprep.mubr.msk.f32.mxu1 %vm745_vm2, %v8384_v10 }
 0x390   : > { %6816 = vmatprep.mubr.msk.f32.mxu0 %vm745_vm2, %v8384_v10  ;;  %7302 = vmatprep.subr.bf16.mxu1 %v7301_v55 }
 0x391   : > { %7324 = vmatpush3.bf16.msra.mxu0 %v7321_v46 }
 0x392   : > { %6757 = vmatmul.mubr.msk.f32.gmra.mrb[78].mxu1 %vm745_vm2, %v8391_v5  ;;  %6817 = vmatmul.mubr.msk.f32.gmra.mrb[70].mxu0 %vm745_vm2, %v8391_v5 }
 0x393   : > { %6759 = vmatprep.mubr.msk.f32.mxu1 %vm745_vm2, %v8401_v27  ;;  %6819 = vmatprep.mubr.msk.f32.mxu0 %vm745_vm2, %v8401_v27 }
 0x394   : > { %7304 = vmatpush3.bf16.msra.mxu1 %v7301_v55  ;;  %7326 = vmatprep.subr.bf16.mxu0 %v7325_v61 }
 0x395   : > { %7328 = vmatpush3.bf16.msra.mxu0 %v7325_v61  ;;  %7314 = vmatprep.subr.bf16.mxu1 %v7313_v62 }
 0x396   : > { %6760 = vmatmul.mubr.msk.f32.gmra.mrb[80].mxu1 %vm745_vm2, %v8413_v40  ;;  %6820 = vmatmul.mubr.msk.f32.gmra.mrb[72].mxu0 %vm745_vm2, %v8413_v40 }
 0x397   : > { %6762 = vmatprep.mubr.msk.f32.mxu1 %vm745_vm2, %v8426_v52  ;;  %6822 = vmatprep.mubr.msk.f32.mxu0 %vm745_vm2, %v8426_v52 }
 0x398   : > { %7338 = vmatprep.subr.bf16.mxu0 %v7337_v1 }
 0x39a   : > { %6763 = vmatmul.mubr.msk.f32.gmra.mrb[82].mxu1 %vm745_vm2, %v8437_v8  ;;  %6823 = vmatmul.mubr.msk.f32.gmra.mrb[74].mxu0 %vm745_vm2, %v8437_v8 }
 0x39b   : > { %6793 = vmatprep.mubr.msk.f32.mxu1 %vm745_vm2, %v8367_v49  ;;  %6853 = vmatprep.mubr.msk.f32.mxu0 %vm745_vm2, %v8367_v49 }
 0x39e   : > { %6794 = vmatmul.mubr.msk.f32.vlgmr.msra.gmra.mrb[84].mxu1 %vm745_vm2, %v8374_v59  ;;  %6854 = vmatmul.mubr.msk.f32.vlgmr.msra.gmra.mrb[76].mxu0 %vm745_vm2, %v8374_v59 }
 0x39f   : > { %7316 = vmatpush3.bf16.msra.mxu1 %v7313_v62  ;;  %6796 = vmatprep.mubr.msk.f32.mxu1 %vm745_vm2, %v8384_v10 }
 0x3a0   : > { %6856 = vmatprep.mubr.msk.f32.mxu0 %vm745_vm2, %v8384_v10  ;;  %7318 = vmatprep.subr.bf16.mxu1 %v7317_v4 }
 0x3a1   : > { %7340 = vmatpush3.bf16.msra.mxu0 %v7337_v1 }
 0x3a2   : > { %6797 = vmatmul.mubr.msk.f32.gmra.mrb[86].mxu1 %vm745_vm2, %v8391_v5  ;;  %6857 = vmatmul.mubr.msk.f32.gmra.mrb[78].mxu0 %vm745_vm2, %v8391_v5 }
 0x3a3   : > { %6799 = vmatprep.mubr.msk.f32.mxu1 %vm745_vm2, %v8401_v27  ;;  %6859 = vmatprep.mubr.msk.f32.mxu0 %vm745_vm2, %v8401_v27 }
 0x3a4   : > { %7320 = vmatpush3.bf16.msra.mxu1 %v7317_v4  ;;  %7342 = vmatprep.subr.bf16.mxu0 %v7341_v12 }
 0x3a5   : > { %7344 = vmatpush3.bf16.msra.mxu0 %v7341_v12  ;;  %7330 = vmatprep.subr.bf16.mxu1 %v7329_v13 }
 0x3a6   : > { %6800 = vmatmul.mubr.msk.f32.gmra.mrb[88].mxu1 %vm745_vm2, %v8413_v40  ;;  %6860 = vmatmul.mubr.msk.f32.gmra.mrb[80].mxu0 %vm745_vm2, %v8413_v40 }
 0x3a7   : > { %6802 = vmatprep.mubr.msk.f32.mxu1 %vm745_vm2, %v8426_v52  ;;  %6862 = vmatprep.mubr.msk.f32.mxu0 %vm745_vm2, %v8426_v52 }
 0x3aa   : > { %6803 = vmatmul.mubr.msk.f32.gmra.mrb[90].mxu1 %vm745_vm2, %v8437_v8  ;;  %6863 = vmatmul.mubr.msk.f32.gmra.mrb[82].mxu0 %vm745_vm2, %v8437_v8 }
 0x3ab   : > { %6833 = vmatprep.mubr.msk.f32.mxu1 %vm745_vm2, %v8367_v49  ;;  %6893 = vmatprep.mubr.msk.f32.mxu0 %vm745_vm2, %v8367_v49 }
 0x3ae   : > { %6834 = vmatmul.mubr.msk.f32.vlgmr.msra.gmra.mrb[92].mxu1 %vm745_vm2, %v8374_v59  ;;  %6894 = vmatmul.mubr.msk.f32.vlgmr.msra.gmra.mrb[84].mxu0 %vm745_vm2, %v8374_v59 }
 0x3af   : > { %7332 = vmatpush3.bf16.msra.mxu1 %v7329_v13  ;;  %6836 = vmatprep.mubr.msk.f32.mxu1 %vm745_vm2, %v8384_v10 }
 0x3b0   : > { %6896 = vmatprep.mubr.msk.f32.mxu0 %vm745_vm2, %v8384_v10  ;;  %7334 = vmatprep.subr.bf16.mxu1 %v7333_v16 }
 0x3b2   : > { %6837 = vmatmul.mubr.msk.f32.gmra.mrb[94].mxu1 %vm745_vm2, %v8391_v5  ;;  %6897 = vmatmul.mubr.msk.f32.gmra.mrb[86].mxu0 %vm745_vm2, %v8391_v5 }
 0x3b3   : > { %6839 = vmatprep.mubr.msk.f32.mxu1 %vm745_vm2, %v8401_v27  ;;  %6899 = vmatprep.mubr.msk.f32.mxu0 %vm745_vm2, %v8401_v27 }
 0x3b4   : > { %7336 = vmatpush3.bf16.msra.mxu1 %v7333_v16 }
 0x3b6   : > { %6840 = vmatmul.mubr.msk.f32.gmra.mrb[96].mxu1 %vm745_vm2, %v8413_v40  ;;  %6900 = vmatmul.mubr.msk.f32.gmra.mrb[88].mxu0 %vm745_vm2, %v8413_v40 }
 0x3b7   : > { %6842 = vmatprep.mubr.msk.f32.mxu1 %vm745_vm2, %v8426_v52  ;;  %6902 = vmatprep.mubr.msk.f32.mxu0 %vm745_vm2, %v8426_v52 }
 0x3ba   : > { %6843 = vmatmul.mubr.msk.f32.gmra.mrb[98].mxu1 %vm745_vm2, %v8437_v8  ;;  %6903 = vmatmul.mubr.msk.f32.gmra.mrb[90].mxu0 %vm745_vm2, %v8437_v8 }
 0x3bb   : > { %6873 = vmatprep.mubr.msk.f32.mxu1 %vm745_vm2, %v8367_v49  ;;  %v3259_v49 = vld [vmem:[%s9205_s2 + $0x8] sm:$0xff] }
 0x3be   : > { %6874 = vmatmul.mubr.msk.f32.vlgmr.msra.gmra.mrb[100].mxu1 %vm745_vm2, %v8374_v59  ;;  %v3261_v59 = vld [vmem:[%s9205_s2 + $0x18] sm:$0xff] }
 0x3bf   : > { %6876 = vmatprep.mubr.msk.f32.mxu1 %vm745_vm2, %v8384_v10  ;;  %3570 = vmatprep.mubr.f32.mxu0 %v3261_v59 }
 0x3c2   : > { %6877 = vmatmul.mubr.msk.f32.gmra.mrb[102].mxu1 %vm745_vm2, %v8391_v5 }
 0x3c3   : > { %6879 = vmatprep.mubr.msk.f32.mxu1 %vm745_vm2, %v8401_v27 }
 0x3c6   : > { %6880 = vmatmul.mubr.msk.f32.gmra.mrb[104].mxu1 %vm745_vm2, %v8413_v40 }
 0x3c7   : > { %6882 = vmatprep.mubr.msk.f32.mxu1 %vm745_vm2, %v8426_v52 }
 0x3ca   : > { %6883 = vmatmul.mubr.msk.f32.gmra.mrb[106].mxu1 %vm745_vm2, %v8437_v8 }
 0x3cb   : > { %3465 = vmatprep.mubr.f32.mxu1 %v3259_v49 }
 0x445   : > { %v6735_v10 = vpop.f32.mrb[56].mxu0 }
 0x446   : > { %2307 = vst.msk [vmem:[#allocation2 + $0x8] sm:$0xff] %vm745_vm2, %v6735_v10  ;;  %v2267_v5 = vpop.f32.mrb[57].mxu0 }
 0x447   : > { %2306 = vst.msk [vmem:[#allocation2] sm:$0xff] %vm745_vm2, %v2267_v5 }
 0x44d   : > { %v6738_v17 = vpop.f32.mrb[58].mxu0  ;;  %v3299_v30 = vld [vmem:[#allocation2 + $0x8] sm:$0xff] }
 0x44e   : > { %2309 = vst.msk [vmem:[#allocation2 + $0x18] sm:$0xff] %vm745_vm2, %v6738_v17  ;;  %v2277_v18 = vpop.f32.mrb[59].mxu0  ;;  %v3298_v28 = vld [vmem:[#allocation2] sm:$0xff] }
 0x44f   : > { %2308 = vst.msk [vmem:[#allocation2 + $0x10] sm:$0xff] %vm745_vm2, %v2277_v18  ;;  %v7347_v26 = vpack.c.bf16 %v3299_v30, %v3298_v28 }
 0x451   : > { %v6775_v19 = vpop.f32.mrb[60].mxu0 }
 0x452   : > { %2543 = vst.msk [vmem:[#allocation2 + $0x88] sm:$0xff] %vm745_vm2, %v6775_v19  ;;  %v2503_v20 = vpop.f32.mrb[61].mxu0 }
 0x453   : > { %2542 = vst.msk [vmem:[#allocation2 + $0x80] sm:$0xff] %vm745_vm2, %v2503_v20 }
 0x455   : > { %v6741_v21 = vpop.f32.mrb[72].mxu1  ;;  %v6778_v22 = vpop.f32.mrb[62].mxu0  ;;  %v3301_v40 = vld [vmem:[#allocation2 + $0x18] sm:$0xff] }
 0x456   : > { %2311 = vst.msk [vmem:[#allocation2 + $0x28] sm:$0xff] %vm745_vm2, %v6741_v21  ;;  %2545 = vst.msk [vmem:[#allocation2 + $0x98] sm:$0xff] %vm745_vm2, %v6778_v22  ;;  %v2287_v23 = vpop.f32.mrb[73].mxu1  ;;  %v2513_v24 = vpop.f32.mrb[63].mxu0  ;;  %v3300_v39 = vld [vmem:[#allocation2 + $0x10] sm:$0xff] }
 0x457   : > { %2310 = vst.msk [vmem:[#allocation2 + $0x20] sm:$0xff] %vm745_vm2, %v2287_v23  ;;  %2544 = vst.msk [vmem:[#allocation2 + $0x90] sm:$0xff] %vm745_vm2, %v2513_v24  ;;  %v7351_v44 = vpack.c.bf16 %v3301_v40, %v3300_v39 }
 0x459   : > { %v6781_v25 = vpop.f32.mrb[64].mxu0  ;;  %v3315_v27 = vld [vmem:[#allocation2 + $0x88] sm:$0xff] }
 0x45a   : > { %2547 = vst.msk [vmem:[#allocation2 + $0xa8] sm:$0xff] %vm745_vm2, %v6781_v25  ;;  %v2523_v31 = vpop.f32.mrb[65].mxu0  ;;  %v3314_v34 = vld [vmem:[#allocation2 + $0x80] sm:$0xff] }
 0x45b   : > { %2546 = vst.msk [vmem:[#allocation2 + $0xa0] sm:$0xff] %vm745_vm2, %v2523_v31  ;;  %v7345_v35 = vpack.c.bf16 %v3315_v27, %v3314_v34 }
 0x45d   : > { %v6744_v36 = vpop.f32.mrb[74].mxu1  ;;  %v6784_v37 = vpop.f32.mrb[66].mxu0  ;;  %7346 = vmatprep.subr.bf16.mxu1 %v7345_v35  ;;  %v3317_v38 = vld [vmem:[#allocation2 + $0x98] sm:$0xff]  ;;  %v3303_v50 = vld [vmem:[#allocation2 + $0x28] sm:$0xff] }
 0x45e   : > { %2313 = vst.msk [vmem:[#allocation2 + $0x38] sm:$0xff] %vm745_vm2, %v6744_v36  ;;  %2549 = vst.msk [vmem:[#allocation2 + $0xb8] sm:$0xff] %vm745_vm2, %v6784_v37  ;;  %v2297_v41 = vpop.f32.mrb[75].mxu1  ;;  %v2533_v29 = vpop.f32.mrb[67].mxu0  ;;  %7348 = vmatpush3.bf16.msra.mxu1 %v7347_v26  ;;  %v3316_v42 = vld [vmem:[#allocation2 + $0x90] sm:$0xff]  ;;  %v3302_v48 = vld [vmem:[#allocation2 + $0x20] sm:$0xff] }
 0x45f   : > { %2312 = vst.msk [vmem:[#allocation2 + $0x30] sm:$0xff] %vm745_vm2, %v2297_v41  ;;  %2548 = vst.msk [vmem:[#allocation2 + $0xb0] sm:$0xff] %vm745_vm2, %v2533_v29  ;;  %v7349_v43 = vpack.c.bf16 %v3317_v38, %v3316_v42  ;;  %v7355_v8 = vpack.c.bf16 %v3303_v50, %v3302_v48 }
 0x461   : > { %v6755_v45 = vpop.f32.mrb[76].mxu1  ;;  %v6815_v46 = vpop.f32.mrb[68].mxu0  ;;  %7350 = vmatprep.subr.bf16.mxu1 %v7349_v43  ;;  %v3319_v47 = vld [vmem:[#allocation2 + $0xa8] sm:$0xff] }
 0x462   : > { %2425 = vst.msk [vmem:[#allocation2 + $0x48] sm:$0xff] %vm745_vm2, %v6755_v45  ;;  %2779 = vst.msk [vmem:[#allocation2 + $0x108] sm:$0xff] %vm745_vm2, %v6815_v46  ;;  %v2385_v51 = vpop.f32.mrb[77].mxu1  ;;  %v2739_v52 = vpop.f32.mrb[69].mxu0  ;;  %7352 = vmatpush3.bf16.msra.mxu1 %v7351_v44  ;;  %v3318_v32 = vld [vmem:[#allocation2 + $0xa0] sm:$0xff] }
 0x463   : > { %2424 = vst.msk [vmem:[#allocation2 + $0x40] sm:$0xff] %vm745_vm2, %v2385_v51  ;;  %2778 = vst.msk [vmem:[#allocation2 + $0x100] sm:$0xff] %vm745_vm2, %v2739_v52  ;;  %v7353_v33 = vpack.c.bf16 %v3319_v47, %v3318_v32 }
 0x465   : > { %v6758_v53 = vpop.f32.mrb[78].mxu1  ;;  %v6818_v54 = vpop.f32.mrb[70].mxu0  ;;  %7354 = vmatprep.subr.bf16.mxu1 %v7353_v33  ;;  %v3321_v55 = vld [vmem:[#allocation2 + $0xb8] sm:$0xff] }
 0x466   : > { %v3305_v56 = vld [vmem:[#allocation2 + $0x38] sm:$0xff]  ;;  %2427 = vst.msk [vmem:[#allocation2 + $0x58] sm:$0xff] %vm745_vm2, %v6758_v53  ;;  %2781 = vst.msk [vmem:[#allocation2 + $0x118] sm:$0xff] %vm745_vm2, %v6818_v54  ;;  %v2395_v57 = vpop.f32.mrb[79].mxu1  ;;  %v2749_v58 = vpop.f32.mrb[71].mxu0  ;;  %7356 = vmatpush3.bf16.msra.mxu1 %v7355_v8  ;;  %v3320_v60 = vld [vmem:[#allocation2 + $0xb0] sm:$0xff] }
 0x467   : > { %v3304_v61 = vld [vmem:[#allocation2 + $0x30] sm:$0xff]  ;;  %2426 = vst.msk [vmem:[#allocation2 + $0x50] sm:$0xff] %vm745_vm2, %v2395_v57  ;;  %2780 = vst.msk [vmem:[#allocation2 + $0x110] sm:$0xff] %vm745_vm2, %v2749_v58  ;;  %v7357_v62 = vpack.c.bf16 %v3321_v55, %v3320_v60 }
 0x468   : > { %v7359_v63 = vpack.c.bf16 %v3305_v56, %v3304_v61 }
 0x469   : > { %v6761_v0 = vpop.f32.mrb[80].mxu1  ;;  %v6821_v1 = vpop.f32.mrb[72].mxu0  ;;  %7358 = vmatprep.subr.bf16.mxu1 %v7357_v62  ;;  %v3307_v5 = vld [vmem:[#allocation2 + $0x48] sm:$0xff] }
 0x46a   : > { %2429 = vst.msk [vmem:[#allocation2 + $0x68] sm:$0xff] %vm745_vm2, %v6761_v0  ;;  %2783 = vst.msk [vmem:[#allocation2 + $0x128] sm:$0xff] %vm745_vm2, %v6821_v1  ;;  %v2405_v2 = vpop.f32.mrb[81].mxu1  ;;  %v2759_v3 = vpop.f32.mrb[73].mxu0  ;;  %7360 = vmatpush3.bf16.msra.mxu1 %v7359_v63  ;;  %v3306_v10 = vld [vmem:[#allocation2 + $0x40] sm:$0xff]  ;;  %v3331_v17 = vld [vmem:[#allocation2 + $0x108] sm:$0xff] }
 0x46b   : > { %2428 = vst.msk [vmem:[#allocation2 + $0x60] sm:$0xff] %vm745_vm2, %v2405_v2  ;;  %2782 = vst.msk [vmem:[#allocation2 + $0x120] sm:$0xff] %vm745_vm2, %v2759_v3  ;;  %v3330_v22 = vld [vmem:[#allocation2 + $0x100] sm:$0xff]  ;;  %v7363_v31 = vpack.c.bf16 %v3307_v5, %v3306_v10 }
 0x46c   : > { %v7379_v34 = vpack.c.bf16 %v3331_v17, %v3330_v22 }
 0x46d   : > { %v6764_v4 = vpop.f32.mrb[82].mxu1  ;;  %v6824_v6 = vpop.f32.mrb[74].mxu0  ;;  %v3309_v26 = vld [vmem:[#allocation2 + $0x58] sm:$0xff] }
 0x46e   : > { %2431 = vst.msk [vmem:[#allocation2 + $0x78] sm:$0xff] %vm745_vm2, %v6764_v4  ;;  %2785 = vst.msk [vmem:[#allocation2 + $0x138] sm:$0xff] %vm745_vm2, %v6824_v6  ;;  %v2415_v7 = vpop.f32.mrb[83].mxu1  ;;  %v2769_v9 = vpop.f32.mrb[75].mxu0  ;;  %v3308_v35 = vld [vmem:[#allocation2 + $0x50] sm:$0xff]  ;;  %v3333_v36 = vld [vmem:[#allocation2 + $0x118] sm:$0xff] }
 0x46f   : > { %2430 = vst.msk [vmem:[#allocation2 + $0x70] sm:$0xff] %vm745_vm2, %v2415_v7  ;;  %2784 = vst.msk [vmem:[#allocation2 + $0x130] sm:$0xff] %vm745_vm2, %v2769_v9  ;;  %v3332_v41 = vld [vmem:[#allocation2 + $0x110] sm:$0xff]  ;;  %v7367_v47 = vpack.c.bf16 %v3309_v26, %v3308_v35  ;;  %v3269_v26 = vld [vmem:[%s9205_s2 + $0x58] sm:$0xff] }
 0x470   : > { %v7383_v48 = vpack.c.bf16 %v3333_v36, %v3332_v41 }
 0x471   : > { %v6795_v11 = vpop.f32.mrb[84].mxu1  ;;  %v6855_v12 = vpop.f32.mrb[76].mxu0  ;;  %v3311_v51 = vld [vmem:[#allocation2 + $0x68] sm:$0xff] }
 0x472   : > { %2661 = vst.msk [vmem:[#allocation2 + $0xc8] sm:$0xff] %vm745_vm2, %v6795_v11  ;;  %3015 = vst.msk [vmem:[#allocation2 + $0x188] sm:$0xff] %vm745_vm2, %v6855_v12  ;;  %v2621_v13 = vpop.f32.mrb[85].mxu1  ;;  %v2975_v14 = vpop.f32.mrb[77].mxu0  ;;  %v3310_v50 = vld [vmem:[#allocation2 + $0x60] sm:$0xff]  ;;  %v3335_v52 = vld [vmem:[#allocation2 + $0x128] sm:$0xff] }
 0x473   : > { %2660 = vst.msk [vmem:[#allocation2 + $0xc0] sm:$0xff] %vm745_vm2, %v2621_v13  ;;  %3014 = vst.msk [vmem:[#allocation2 + $0x180] sm:$0xff] %vm745_vm2, %v2975_v14  ;;  %v3334_v54 = vld [vmem:[#allocation2 + $0x120] sm:$0xff]  ;;  %v7371_v62 = vpack.c.bf16 %v3311_v51, %v3310_v50 }
 0x474   : > { %v7387_v63 = vpack.c.bf16 %v3335_v52, %v3334_v54 }
 0x475   : > { %v6798_v15 = vpop.f32.mrb[86].mxu1  ;;  %v6858_v16 = vpop.f32.mrb[78].mxu0  ;;  %v3313_v1 = vld [vmem:[#allocation2 + $0x78] sm:$0xff] }
 0x476   : > { %2663 = vst.msk [vmem:[#allocation2 + $0xd8] sm:$0xff] %vm745_vm2, %v6798_v15  ;;  %3017 = vst.msk [vmem:[#allocation2 + $0x198] sm:$0xff] %vm745_vm2, %v6858_v16  ;;  %v2631_v49 = vpop.f32.mrb[87].mxu1  ;;  %v2985_v59 = vpop.f32.mrb[79].mxu0  ;;  %v3312_v0 = vld [vmem:[#allocation2 + $0x70] sm:$0xff]  ;;  %v3337_v2 = vld [vmem:[#allocation2 + $0x138] sm:$0xff] }
 0x477   : > { %2662 = vst.msk [vmem:[#allocation2 + $0xd0] sm:$0xff] %vm745_vm2, %v2631_v49  ;;  %3016 = vst.msk [vmem:[#allocation2 + $0x190] sm:$0xff] %vm745_vm2, %v2985_v59  ;;  %v3336_v9 = vld [vmem:[#allocation2 + $0x130] sm:$0xff]  ;;  %v7375_v49 = vpack.c.bf16 %v3313_v1, %v3312_v0  ;;  %v3283_v0 = vld [vmem:[%s9205_s2 + $0xc8] sm:$0xff] }
 0x478   : > { %v7391_v59 = vpack.c.bf16 %v3337_v2, %v3336_v9  ;;  %v3289_v2 = vld [vmem:[%s9205_s2 + $0xf8] sm:$0xff] }
 0x479   : > { %v6801_v18 = vpop.f32.mrb[88].mxu1  ;;  %v6861_v19 = vpop.f32.mrb[80].mxu0  ;;  %v3323_v20 = vld [vmem:[#allocation2 + $0xc8] sm:$0xff] }
 0x47a   : > { %v3347_v21 = vld [vmem:[#allocation2 + $0x188] sm:$0xff]  ;;  %2665 = vst.msk [vmem:[#allocation2 + $0xe8] sm:$0xff] %vm745_vm2, %v6801_v18  ;;  %3019 = vst.msk [vmem:[#allocation2 + $0x1a8] sm:$0xff] %vm745_vm2, %v6861_v19  ;;  %v2641_v23 = vpop.f32.mrb[89].mxu1  ;;  %v2995_v24 = vpop.f32.mrb[81].mxu0  ;;  %v3322_v25 = vld [vmem:[#allocation2 + $0xc0] sm:$0xff] }
 0x47b   : > { %v3346_v27 = vld [vmem:[#allocation2 + $0x180] sm:$0xff]  ;;  %2664 = vst.msk [vmem:[#allocation2 + $0xe0] sm:$0xff] %vm745_vm2, %v2641_v23  ;;  %3018 = vst.msk [vmem:[#allocation2 + $0x1a0] sm:$0xff] %vm745_vm2, %v2995_v24  ;;  %v7361_v28 = vpack.c.bf16 %v3323_v20, %v3322_v25  ;;  %v3264_v23 = vld [vmem:[%s9205_s2 + $0x30] sm:$0xff] }
 0x47c   : > { %v7377_v30 = vpack.c.bf16 %v3347_v21, %v3346_v27  ;;  %v3258_v21 = vld [vmem:[%s9205_s2] sm:$0xff] }
 0x47d   : > { %v6804_v37 = vpop.f32.mrb[90].mxu1  ;;  %v6864_v38 = vpop.f32.mrb[82].mxu0  ;;  %7362 = vmatprep.subr.bf16.mxu1 %v7361_v28  ;;  %v3325_v39 = vld [vmem:[#allocation2 + $0xd8] sm:$0xff] }
 0x47e   : > { %7378 = vmatprep.subr.bf16.mxu0 %v7377_v30  ;;  %v3349_v40 = vld [vmem:[#allocation2 + $0x198] sm:$0xff]  ;;  %2667 = vst.msk [vmem:[#allocation2 + $0xf8] sm:$0xff] %vm745_vm2, %v6804_v37  ;;  %3021 = vst.msk [vmem:[#allocation2 + $0x1b8] sm:$0xff] %vm745_vm2, %v6864_v38  ;;  %v2651_v29 = vpop.f32.mrb[91].mxu1  ;;  %v3005_v42 = vpop.f32.mrb[83].mxu0  ;;  %7364 = vmatpush3.bf16.msra.mxu1 %v7363_v31  ;;  %v3324_v43 = vld [vmem:[#allocation2 + $0xd0] sm:$0xff] }
 0x47f   : > { %7380 = vmatpush3.bf16.msra.mxu0 %v7379_v34  ;;  %v3348_v44 = vld [vmem:[#allocation2 + $0x190] sm:$0xff]  ;;  %2666 = vst.msk [vmem:[#allocation2 + $0xf0] sm:$0xff] %vm745_vm2, %v2651_v29  ;;  %3020 = vst.msk [vmem:[#allocation2 + $0x1b0] sm:$0xff] %vm745_vm2, %v3005_v42  ;;  %v7365_v45 = vpack.c.bf16 %v3325_v39, %v3324_v43  ;;  %v3263_v34 = vld [vmem:[%s9205_s2 + $0x28] sm:$0xff] }
 0x480   : > { %v7381_v46 = vpack.c.bf16 %v3349_v40, %v3348_v44  ;;  %v3268_v40 = vld [vmem:[%s9205_s2 + $0x50] sm:$0xff]  ;;  %v3274_v29 = vld [vmem:[%s9205_s2 + $0x80] sm:$0xff] }
 0x481   : > { %v6835_v32 = vpop.f32.mrb[92].mxu1  ;;  %v6895_v33 = vpop.f32.mrb[84].mxu0  ;;  %7366 = vmatprep.subr.bf16.mxu1 %v7365_v45  ;;  %v3327_v8 = vld [vmem:[#allocation2 + $0xe8] sm:$0xff] }
 0x482   : > { %7382 = vmatprep.subr.bf16.mxu0 %v7381_v46  ;;  %v3351_v53 = vld [vmem:[#allocation2 + $0x1a8] sm:$0xff]  ;;  %2897 = vst.msk [vmem:[#allocation2 + $0x148] sm:$0xff] %vm745_vm2, %v6835_v32  ;;  %3251 = vst.msk [vmem:[#allocation2 + $0x208] sm:$0xff] %vm745_vm2, %v6895_v33  ;;  %v2857_v55 = vpop.f32.mrb[93].mxu1  ;;  %v3211_v56 = vpop.f32.mrb[85].mxu0  ;;  %7368 = vmatpush3.bf16.msra.mxu1 %v7367_v47  ;;  %v3326_v57 = vld [vmem:[#allocation2 + $0xe0] sm:$0xff] }
 0x483   : > { %7384 = vmatpush3.bf16.msra.mxu0 %v7383_v48  ;;  %v3350_v58 = vld [vmem:[#allocation2 + $0x1a0] sm:$0xff]  ;;  %2896 = vst.msk [vmem:[#allocation2 + $0x140] sm:$0xff] %vm745_vm2, %v2857_v55  ;;  %3250 = vst.msk [vmem:[#allocation2 + $0x200] sm:$0xff] %vm745_vm2, %v3211_v56  ;;  %v7369_v60 = vpack.c.bf16 %v3327_v8, %v3326_v57  ;;  %v3273_v46 = vld [vmem:[%s9205_s2 + $0x78] sm:$0xff] }
 0x484   : > { %v7385_v61 = vpack.c.bf16 %v3351_v53, %v3350_v58  ;;  %v3279_v48 = vld [vmem:[%s9205_s2 + $0xa8] sm:$0xff]  ;;  %v3278_v53 = vld [vmem:[%s9205_s2 + $0xa0] sm:$0xff]  ;;  %v3284_v55 = vld [vmem:[%s9205_s2 + $0xd0] sm:$0xff] }
 0x485   : > { %v6838_v3 = vpop.f32.mrb[94].mxu1  ;;  %v6898_v4 = vpop.f32.mrb[86].mxu0  ;;  %7370 = vmatprep.subr.bf16.mxu1 %v7369_v60  ;;  %v3329_v6 = vld [vmem:[#allocation2 + $0xf8] sm:$0xff] }
 0x486   : > { %7386 = vmatprep.subr.bf16.mxu0 %v7385_v61  ;;  %v3353_v7 = vld [vmem:[#allocation2 + $0x1b8] sm:$0xff]  ;;  %2899 = vst.msk [vmem:[#allocation2 + $0x158] sm:$0xff] %vm745_vm2, %v6838_v3  ;;  %3253 = vst.msk [vmem:[#allocation2 + $0x218] sm:$0xff] %vm745_vm2, %v6898_v4  ;;  %v2867_v11 = vpop.f32.mrb[95].mxu1  ;;  %v3221_v12 = vpop.f32.mrb[87].mxu0  ;;  %7372 = vmatpush3.bf16.msra.mxu1 %v7371_v62  ;;  %v3328_v13 = vld [vmem:[#allocation2 + $0xf0] sm:$0xff] }
 0x487   : > { %7388 = vmatpush3.bf16.msra.mxu0 %v7387_v63  ;;  %v3352_v14 = vld [vmem:[#allocation2 + $0x1b0] sm:$0xff]  ;;  %2898 = vst.msk [vmem:[#allocation2 + $0x150] sm:$0xff] %vm745_vm2, %v2867_v11  ;;  %3252 = vst.msk [vmem:[#allocation2 + $0x210] sm:$0xff] %vm745_vm2, %v3221_v12  ;;  %v7373_v15 = vpack.c.bf16 %v3329_v6, %v3328_v13  ;;  %v3294_v13 = vld [vmem:[%s9205_s2 + $0x120] sm:$0xff] }
 0x488   : > { %v7389_v16 = vpack.c.bf16 %v3353_v7, %v3352_v14  ;;  %v3288_v11 = vld [vmem:[%s9205_s2 + $0xf0] sm:$0xff] }
 0x489   : > { %v6841_v10 = vpop.f32.mrb[96].mxu1  ;;  %v6901_v5 = vpop.f32.mrb[88].mxu0  ;;  %7374 = vmatprep.subr.bf16.mxu1 %v7373_v15  ;;  %v3363_v17 = vld [vmem:[#allocation2 + $0x208] sm:$0xff] }
 0x48a   : > { %7390 = vmatprep.subr.bf16.mxu0 %v7389_v16  ;;  %2901 = vst.msk [vmem:[#allocation2 + $0x168] sm:$0xff] %vm745_vm2, %v6841_v10  ;;  %3255 = vst.msk [vmem:[#allocation2 + $0x228] sm:$0xff] %vm745_vm2, %v6901_v5  ;;  %v2877_v18 = vpop.f32.mrb[97].mxu1  ;;  %v3231_v19 = vpop.f32.mrb[89].mxu0  ;;  %7376 = vmatpush3.bf16.msra.mxu1 %v7375_v49  ;;  %v3362_v20 = vld [vmem:[#allocation2 + $0x200] sm:$0xff]  ;;  %v3339_v32 = vld [vmem:[#allocation2 + $0x148] sm:$0xff] }
 0x48b   : > { %7392 = vmatpush3.bf16.msra.mxu0 %v7391_v59  ;;  %2900 = vst.msk [vmem:[#allocation2 + $0x160] sm:$0xff] %vm745_vm2, %v2877_v18  ;;  %3254 = vst.msk [vmem:[#allocation2 + $0x220] sm:$0xff] %vm745_vm2, %v3231_v19  ;;  %v7409_v22 = vpack.c.bf16 %v3363_v17, %v3362_v20  ;;  %v3338_v52 = vld [vmem:[#allocation2 + $0x140] sm:$0xff]  ;;  %v3293_v10 = vld [vmem:[%s9205_s2 + $0x118] sm:$0xff] }
 0x48c   : > { %v7395_v56 = vpack.c.bf16 %v3339_v32, %v3338_v52  ;;  %v3262_v17 = vld [vmem:[%s9205_s2 + $0x20] sm:$0xff]  ;;  %v3260_v19 = vld [vmem:[%s9205_s2 + $0x10] sm:$0xff]  ;;  %v3267_v20 = vld [vmem:[%s9205_s2 + $0x48] sm:$0xff] }
 0x48d   : > { %v6844_v24 = vpop.f32.mrb[98].mxu1  ;;  %v6904_v25 = vpop.f32.mrb[90].mxu0  ;;  %7410 = vmatprep.subr.bf16.mxu1 %v7409_v22  ;;  %3466 = vmatmul.mubr.f32.vlgmr.msra.gmra.mrb[108].mxu1 %v3258_v21  ;;  %v3365_v27 = vld [vmem:[#allocation2 + $0x218] sm:$0xff]  ;;  %v3266_v21 = vld [vmem:[%s9205_s2 + $0x40] sm:$0xff]  ;;  %v3868_v52 = vld [vmem:[#allocation5 + $0x30] sm:$0xff] }
 0x48e   : > { %2903 = vst.msk [vmem:[#allocation2 + $0x178] sm:$0xff] %vm745_vm2, %v6844_v24  ;;  %3257 = vst.msk [vmem:[#allocation2 + $0x238] sm:$0xff] %vm745_vm2, %v6904_v25  ;;  %v2887_v28 = vpop.f32.mrb[99].mxu1  ;;  %v3241_v30 = vpop.f32.mrb[91].mxu0  ;;  %7412 = vmatpush3.bf16.msra.mxu1 %v7409_v22  ;;  %v3364_v31 = vld [vmem:[#allocation2 + $0x210] sm:$0xff]  ;;  %3470 = vmatprep.mubr.f32.mxu1 %v3264_v23  ;;  %v3341_v61 = vld [vmem:[#allocation2 + $0x158] sm:$0xff] }
 0x48f   : > { %2902 = vst.msk [vmem:[#allocation2 + $0x170] sm:$0xff] %vm745_vm2, %v2887_v28  ;;  %3256 = vst.msk [vmem:[#allocation2 + $0x230] sm:$0xff] %vm745_vm2, %v3241_v30  ;;  %v7413_v35 = vpack.c.bf16 %v3365_v27, %v3364_v31  ;;  %v3340_v60 = vld [vmem:[#allocation2 + $0x150] sm:$0xff]  ;;  %v3265_v23 = vld [vmem:[%s9205_s2 + $0x38] sm:$0xff] }
 0x490   : > { %v7399_v3 = vpack.c.bf16 %v3341_v61, %v3340_v60  ;;  %v3272_v22 = vld [vmem:[%s9205_s2 + $0x70] sm:$0xff]  ;;  %v3277_v24 = vld [vmem:[%s9205_s2 + $0x98] sm:$0xff]  ;;  %v3271_v25 = vld [vmem:[%s9205_s2 + $0x68] sm:$0xff] }
 0x491   : > { %v6875_v36 = vpop.f32.mrb[100].mxu1  ;;  %7414 = vmatprep.subr.bf16.mxu1 %v7413_v35  ;;  %3471 = vmatmul.mubr.f32.gmra.mrb[110].mxu1 %v3263_v34  ;;  %v3367_v37 = vld [vmem:[#allocation2 + $0x228] sm:$0xff]  ;;  %v3282_v27 = vld [vmem:[%s9205_s2 + $0xc0] sm:$0xff]  ;;  %v3276_v31 = vld [vmem:[%s9205_s2 + $0x90] sm:$0xff] }
 0x492   : > { %3133 = vst.msk [vmem:[#allocation2 + $0x1c8] sm:$0xff] %vm745_vm2, %v6875_v36  ;;  %v3093_v38 = vpop.f32.mrb[101].mxu1  ;;  %7416 = vmatpush3.bf16.msra.mxu1 %v7413_v35  ;;  %v3366_v39 = vld [vmem:[#allocation2 + $0x220] sm:$0xff]  ;;  %3475 = vmatprep.mubr.f32.mxu1 %v3269_v26  ;;  %v3343_v7 = vld [vmem:[#allocation2 + $0x168] sm:$0xff]  ;;  %v3292_v34 = vld [vmem:[%s9205_s2 + $0x110] sm:$0xff] }
 0x493   : > { %3132 = vst.msk [vmem:[#allocation2 + $0x1c0] sm:$0xff] %vm745_vm2, %v3093_v38  ;;  %v7417_v41 = vpack.c.bf16 %v3367_v37, %v3366_v39  ;;  %v3342_v6 = vld [vmem:[#allocation2 + $0x160] sm:$0xff]  ;;  %v3287_v30 = vld [vmem:[%s9205_s2 + $0xe8] sm:$0xff]  ;;  %v3297_v26 = vld [vmem:[%s9205_s2 + $0x138] sm:$0xff] }
 0x494   : > { %v7403_v14 = vpack.c.bf16 %v3343_v7, %v3342_v6  ;;  %v3270_v28 = vld [vmem:[%s9205_s2 + $0x60] sm:$0xff]  ;;  %v3275_v35 = vld [vmem:[%s9205_s2 + $0x88] sm:$0xff]  ;;  %v3281_v36 = vld [vmem:[%s9205_s2 + $0xb8] sm:$0xff] }
 0x495   : > { %v6878_v42 = vpop.f32.mrb[102].mxu1  ;;  %7418 = vmatprep.subr.bf16.mxu1 %v7417_v41  ;;  %3476 = vmatmul.mubr.f32.gmra.mrb[112].mxu1 %v3268_v40  ;;  %v3369_v43 = vld [vmem:[#allocation2 + $0x238] sm:$0xff]  ;;  %v3280_v37 = vld [vmem:[%s9205_s2 + $0xb0] sm:$0xff]  ;;  %v3286_v38 = vld [vmem:[%s9205_s2 + $0xe0] sm:$0xff] }
 0x496   : > { %3135 = vst.msk [vmem:[#allocation2 + $0x1d8] sm:$0xff] %vm745_vm2, %v6878_v42  ;;  %v3103_v44 = vpop.f32.mrb[103].mxu1  ;;  %7420 = vmatpush3.bf16.msra.mxu1 %v7417_v41  ;;  %v3368_v45 = vld [vmem:[#allocation2 + $0x230] sm:$0xff]  ;;  %3480 = vmatprep.mubr.f32.mxu1 %v3274_v29  ;;  %v3345_v49 = vld [vmem:[#allocation2 + $0x178] sm:$0xff]  ;;  %v3291_v40 = vld [vmem:[%s9205_s2 + $0x108] sm:$0xff] }
 0x497   : > { %3134 = vst.msk [vmem:[#allocation2 + $0x1d0] sm:$0xff] %vm745_vm2, %v3103_v44  ;;  %v7421_v47 = vpack.c.bf16 %v3369_v43, %v3368_v45  ;;  %v3344_v16 = vld [vmem:[#allocation2 + $0x170] sm:$0xff]  ;;  %v3285_v39 = vld [vmem:[%s9205_s2 + $0xd8] sm:$0xff]  ;;  %v3290_v41 = vld [vmem:[%s9205_s2 + $0x100] sm:$0xff] }
 0x498   : > { %v7407_v18 = vpack.c.bf16 %v3345_v49, %v3344_v16  ;;  %v3296_v29 = vld [vmem:[%s9205_s2 + $0x130] sm:$0xff]  ;;  %v3295_v42 = vld [vmem:[%s9205_s2 + $0x128] sm:$0xff]  ;;  %v3724_v43 = vld [vmem:[#allocation5] sm:$0xff] }
 0x499   : > { %v6881_v50 = vpop.f32.mrb[104].mxu1  ;;  %7422 = vmatprep.subr.bf16.mxu1 %v7421_v47  ;;  %3481 = vmatmul.mubr.f32.gmra.mrb[114].mxu1 %v3273_v46  ;;  %v3355_v51 = vld [vmem:[#allocation2 + $0x1c8] sm:$0xff]  ;;  %v3866_v46 = vld [vmem:[#allocation5 + $0x20] sm:$0xff] }
 0x49a   : > { %3137 = vst.msk [vmem:[#allocation2 + $0x1e8] sm:$0xff] %vm745_vm2, %v6881_v50  ;;  %v3113_v33 = vpop.f32.mrb[105].mxu1  ;;  %7424 = vmatpush3.bf16.msra.mxu1 %v7421_v47  ;;  %v3354_v8 = vld [vmem:[#allocation2 + $0x1c0] sm:$0xff]  ;;  %3485 = vmatprep.mubr.f32.mxu1 %v3279_v48  ;;  %v3725_v44 = vld [vmem:[#allocation5 + $0x8] sm:$0xff]  ;;  %v3726_v50 = vld [vmem:[#allocation5 + $0x10] sm:$0xff] }
 0x49b   : > { %3136 = vst.msk [vmem:[#allocation2 + $0x1e0] sm:$0xff] %vm745_vm2, %v3113_v33  ;;  %v7393_v54 = vpack.c.bf16 %v3355_v51, %v3354_v8  ;;  %v7425_v45 = vpack.c.bf16 %v3725_v44, %v3724_v43  ;;  %v3867_v47 = vld [vmem:[#allocation5 + $0x28] sm:$0xff]  ;;  %v3727_v51 = vld [vmem:[#allocation5 + $0x18] sm:$0xff]  ;;  %v4104_v44 = vld [vmem:[#allocation5 + $0x70] sm:$0xff] }
 0x49c   : > { %v7433_v48 = vpack.c.bf16 %v3867_v47, %v3866_v46  ;;  %v7429_v32 = vpack.c.bf16 %v3727_v51, %v3726_v50  ;;  %v3869_v33 = vld [vmem:[#allocation5 + $0x38] sm:$0xff] }
 0x49d   : > { %v6884_v57 = vpop.f32.mrb[106].mxu1  ;;  %7394 = vmatprep.subr.bf16.mxu0 %v7393_v54  ;;  %3486 = vmatmul.mubr.f32.gmra.mrb[116].mxu1 %v3278_v53  ;;  %v3357_v58 = vld [vmem:[#allocation2 + $0x1d8] sm:$0xff]  ;;  %v7437_v8 = vpack.c.bf16 %v3869_v33, %v3868_v52  ;;  %v3984_v53 = vld [vmem:[#allocation5 + $0x40] sm:$0xff]  ;;  %v3985_v54 = vld [vmem:[#allocation5 + $0x48] sm:$0xff] }
 0x49e   : > { %3139 = vst.msk [vmem:[#allocation2 + $0x1f8] sm:$0xff] %vm745_vm2, %v6884_v57  ;;  %v3123_v62 = vpop.f32.mrb[107].mxu1  ;;  %7396 = vmatpush3.bf16.msra.mxu0 %v7395_v56  ;;  %v3356_v63 = vld [vmem:[#allocation2 + $0x1d0] sm:$0xff]  ;;  %3490 = vmatprep.mubr.f32.mxu1 %v3284_v55  ;;  %v8755_v55 = vpack.c.bf16 %v3985_v54, %v3984_v53  ;;  %v4102_v56 = vld [vmem:[#allocation5 + $0x60] sm:$0xff]  ;;  %v4103_v57 = vld [vmem:[#allocation5 + $0x68] sm:$0xff] }
 0x49f   : > { %3138 = vst.msk [vmem:[#allocation2 + $0x1f0] sm:$0xff] %vm745_vm2, %v3123_v62  ;;  %v7397_v1 = vpack.c.bf16 %v3357_v58, %v3356_v63  ;;  %7434 = vmatprep.subr.bf16.mxu1 %v7433_v48  ;;  %v8758_v58 = vpack.c.bf16 %v4103_v57, %v4102_v56  ;;  %v3987_v43 = vld [vmem:[#allocation5 + $0x58] sm:$0xff]  ;;  %v4220_v53 = vld [vmem:[#allocation5 + $0x80] sm:$0xff]  ;;  %v4221_v57 = vld [vmem:[#allocation5 + $0x88] sm:$0xff] }
 0x4a1   : > { %7398 = vmatprep.subr.bf16.mxu0 %v7397_v1  ;;  %3491 = vmatmul.mubr.f32.gmra.mrb[118].mxu1 %v3283_v0  ;;  %v3359_v4 = vld [vmem:[#allocation2 + $0x1e8] sm:$0xff] }
 0x4a2   : > { %7400 = vmatpush3.bf16.msra.mxu0 %v7399_v3  ;;  %v3358_v9 = vld [vmem:[#allocation2 + $0x1e0] sm:$0xff]  ;;  %3495 = vmatprep.mubr.f32.mxu1 %v3289_v2 }
 0x4a3   : > { %v7401_v12 = vpack.c.bf16 %v3359_v4, %v3358_v9 }
 0x4a5   : > { %7402 = vmatprep.subr.bf16.mxu0 %v7401_v12  ;;  %3496 = vmatmul.mubr.f32.gmra.mrb[120].mxu1 %v3288_v11  ;;  %v3361_v15 = vld [vmem:[#allocation2 + $0x1f8] sm:$0xff] }
 0x4a6   : > { %7404 = vmatpush3.bf16.msra.mxu0 %v7403_v14  ;;  %v3360_v59 = vld [vmem:[#allocation2 + $0x1f0] sm:$0xff]  ;;  %3500 = vmatprep.mubr.f32.mxu1 %v3294_v13 }
 0x4a7   : > { %v7405_v5 = vpack.c.bf16 %v3361_v15, %v3360_v59 }
 0x4a9   : > { %7406 = vmatprep.subr.bf16.mxu0 %v7405_v5  ;;  %3501 = vmatmul.mubr.f32.gmra.mrb[122].mxu1 %v3293_v10 }
 0x4aa   : > { %7408 = vmatpush3.bf16.msra.mxu0 %v7407_v18  ;;  %6921 = vmatprep.mubr.msk.f32.mxu1 %vm1817_vm3, %v3262_v17 }
 0x4ab   : > { %7426 = vmatprep.subr.bf16.mxu0 %v7425_v45 }
 0x4ad   : > { %3571 = vmatmul.mubr.f32.vlgmr.msra.gmra.mrb[92].mxu0 %v3260_v19  ;;  %6922 = vmatmul.mubr.msk.f32.vlgmr.msra.gmra.mrb[124].mxu1 %vm1817_vm3, %v3267_v20  ;;  %v8772_v19 = vld [vmem:[%s9209_s6] ss:$0 sm:$0xff] }
 0x4ae   : > { %3575 = vmatprep.mubr.f32.mxu0 %v3266_v21  ;;  %6924 = vmatprep.mubr.msk.f32.mxu1 %vm1817_vm3, %v3272_v22 }
 0x4af   : > { %7428 = vmatpush3.bf16.msra.mxu0 %v7425_v45  ;;  %7436 = vmatpush3.bf16.msra.mxu1 %v7433_v48  ;;  %v4105_v45 = vld [vmem:[#allocation5 + $0x78] sm:$0xff] }
 0x4b0   : > { %7430 = vmatprep.subr.bf16.mxu0 %v7429_v32  ;;  %7438 = vmatprep.subr.bf16.mxu1 %v7437_v8 }
 0x4b1   : > { %3576 = vmatmul.mubr.f32.gmra.mrb[94].mxu0 %v3265_v23  ;;  %6925 = vmatmul.mubr.msk.f32.gmra.mrb[126].mxu1 %vm1817_vm3, %v3277_v24 }
 0x4b2   : > { %3580 = vmatprep.mubr.f32.mxu0 %v3271_v25  ;;  %6927 = vmatprep.mubr.msk.f32.mxu1 %vm1817_vm3, %v3282_v27 }
 0x4b3   : > { %7432 = vmatpush3.bf16.msra.mxu0 %v7429_v32  ;;  %7440 = vmatpush3.bf16.msra.mxu1 %v7437_v8  ;;  %v7453_v8 = vpack.c.bf16 %v4105_v45, %v4104_v44  ;;  %v4574_v44 = vld [vmem:[#allocation5 + $0xe0] sm:$0xff]  ;;  %v4575_v45 = vld [vmem:[#allocation5 + $0xe8] sm:$0xff] }
 0x4b4   : > { %7442 = vmatprep.subr.bf16.mxu0 %v8755_v55  ;;  %7450 = vmatprep.subr.bf16.mxu1 %v8758_v58 }
 0x4b5   : > { %3581 = vmatmul.mubr.f32.gmra.mrb[96].mxu0 %v3270_v28  ;;  %6928 = vmatmul.mubr.msk.f32.gmra.mrb[128].mxu1 %vm1817_vm3, %v3287_v30 }
 0x4b6   : > { %3585 = vmatprep.mubr.f32.mxu0 %v3276_v31  ;;  %6930 = vmatprep.mubr.msk.f32.mxu1 %vm1817_vm3, %v3292_v34 }
 0x4b9   : > { %3586 = vmatmul.mubr.f32.gmra.mrb[98].mxu0 %v3275_v35  ;;  %6931 = vmatmul.mubr.msk.f32.gmra.mrb[130].mxu1 %vm1817_vm3, %v3297_v26 }
 0x4ba   : > { %3590 = vmatprep.mubr.f32.mxu0 %v3281_v36 }
 0x4bd   : > { %3591 = vmatmul.mubr.f32.gmra.mrb[100].mxu0 %v3280_v37 }
 0x4be   : > { %3595 = vmatprep.mubr.f32.mxu0 %v3286_v38 }
 0x4c1   : > { %3596 = vmatmul.mubr.f32.gmra.mrb[102].mxu0 %v3285_v39 }
 0x4c2   : > { %3600 = vmatprep.mubr.f32.mxu0 %v3291_v40 }
 0x4c5   : > { %3601 = vmatmul.mubr.f32.gmra.mrb[104].mxu0 %v3290_v41  ;;  %v3986_v41 = vld [vmem:[#allocation5 + $0x50] sm:$0xff] }
 0x4c6   : > { %3605 = vmatprep.mubr.f32.mxu0 %v3296_v29  ;;  %v7445_v33 = vpack.c.bf16 %v3987_v43, %v3986_v41  ;;  %v4456_v41 = vld [vmem:[#allocation5 + $0xc0] sm:$0xff] }
 0x4c9   : > { %3606 = vmatmul.mubr.f32.gmra.mrb[106].mxu0 %v3295_v42 }
 0x560   : > { %v6227_v60 = vpop.f32.mrb[108].mxu1 }
 0x561   : > { %v6228_v61 = vpop.f32.mrb[109].mxu1 }
 0x562   : > { %v6229_v62 = vadd.f32 %v6228_v61, %v6227_v60  ;;  %v4338_v60 = vld [vmem:[#allocation5 + $0xa0] sm:$0xff]  ;;  %v4339_v61 = vld [vmem:[#allocation5 + $0xa8] sm:$0xff] }
 0x564   : > { %v6230_v63 = vpop.f32.mrb[110].mxu1  ;;  %v3468_v24 = vadd.f32 %v6229_v62, %v8772_v19 }
 0x565   : > { %v6231_v0 = vpop.f32.mrb[111].mxu1 }
 0x566   : > { %v6232_v1 = vadd.f32 %v6231_v0, %v6230_v63 }
 0x568   : > { %v6233_v2 = vpop.f32.mrb[112].mxu1  ;;  %v3473_v35 = vadd.f32 %v6232_v1, %v8772_v19 }
 0x569   : > { %v6234_v3 = vpop.f32.mrb[113].mxu1 }
 0x56a   : > { %v6235_v4 = vadd.f32 %v6234_v3, %v6233_v2 }
 0x56c   : > { %v6236_v6 = vpop.f32.mrb[114].mxu1  ;;  %v3478_v46 = vadd.f32 %v6235_v4, %v8772_v19  ;;  %v7457_v4 = vpack.c.bf16 %v4221_v57, %v4220_v53  ;;  %v4695_v57 = vld [vmem:[#allocation5 + $0x118] sm:$0xff] }
 0x56d   : > { %v6237_v7 = vpop.f32.mrb[115].mxu1 }
 0x56e   : > { %v6238_v9 = vadd.f32 %v6237_v7, %v6236_v6  ;;  %v7465_v6 = vpack.c.bf16 %v4339_v61, %v4338_v60 }
 0x570   : > { %v6239_v11 = vpop.f32.mrb[116].mxu1  ;;  %v3483_v62 = vadd.f32 %v6238_v9, %v8772_v19 }
 0x571   : > { %v6240_v12 = vpop.f32.mrb[117].mxu1 }
 0x572   : > { %v8761_v13 = vadd.f32 %v6240_v12, %v6239_v11 }
 0x574   : > { %v6242_v14 = vpop.f32.mrb[118].mxu1  ;;  %v3488_v9 = vadd.f32 %v8761_v13, %v8772_v19 }
 0x575   : > { %v6243_v15 = vpop.f32.mrb[119].mxu1 }
 0x576   : > { %v8763_v16 = vadd.f32 %v6243_v15, %v6242_v14 }
 0x578   : > { %v6245_v49 = vpop.f32.mrb[120].mxu1  ;;  %v3493_v13 = vadd.f32 %v8763_v16, %v8772_v19 }
 0x579   : > { %v6246_v59 = vpop.f32.mrb[121].mxu1 }
 0x57a   : > { %v8765_v10 = vadd.f32 %v6246_v59, %v6245_v49 }
 0x57c   : > { %v6248_v5 = vpop.f32.mrb[122].mxu1 }
 0x57d   : > { %v6249_v17 = vpop.f32.mrb[123].mxu1 }
 0x57e   : > { %v8767_v18 = vadd.f32 %v6249_v17, %v6248_v5 }
 0x580   : > { %v6283_v20 = vpop.f32.mrb[92].mxu0  ;;  %v6923_v21 = vpop.f32.mrb[124].mxu1 }
 0x581   : > { %v6284_v22 = vpop.f32.mrb[93].mxu0  ;;  %v3677_v23 = vpop.f32.mrb[125].mxu1 }
 0x582   : > { %v6285_v25 = vadd.f32 %v6284_v22, %v6283_v20  ;;  %v3498_v22 = vadd.f32 %v8765_v10, %v8772_v19 }
 0x584   : > { %v6286_v27 = vpop.f32.mrb[94].mxu0  ;;  %v3573_v28 = vadd.f32 %v6285_v25, %v3468_v24  ;;  %v6926_v30 = vpop.f32.mrb[126].mxu1 }
 0x585   : > { %v6287_v31 = vpop.f32.mrb[95].mxu0  ;;  %v3687_v34 = vpop.f32.mrb[127].mxu1 }
 0x586   : > { %v6288_v26 = vadd.f32 %v6287_v31, %v6286_v27  ;;  %v3678_v36 = vadd.f32 %v3677_v23, %v3573_v28 }
 0x588   : > { %v3578_v37 = vadd.f32 %v6288_v26, %v3473_v35  ;;  %v8776_v38 = vmax.f32 %v3678_v36, 0.0  ;;  %v6289_v39 = vpop.f32.mrb[96].mxu0  ;;  %v6929_v40 = vpop.f32.mrb[128].mxu1 }
 0x589   : > { %v6290_v29 = vpop.f32.mrb[97].mxu0  ;;  %v3697_v42 = vpop.f32.mrb[129].mxu1 }
 0x58a   : > { %v3683_v47 = vadd.f32 %v6923_v21, %v3578_v37  ;;  %v6291_v48 = vadd.f32 %v6290_v29, %v6289_v39  ;;  %6941 = vmatprep.mubr.msk.f32.mxu0 %vm745_vm2, %v8776_v38  ;;  %6961 = vmatprep.mubr.msk.f32.mxu1 %vm745_vm2, %v8776_v38  ;;  %v4340_v39 = vld [vmem:[#allocation5 + $0xb0] sm:$0xff]  ;;  %v4457_v29 = vld [vmem:[#allocation5 + $0xc8] sm:$0xff] }
 0x58b   : > { %v7473_v43 = vpack.c.bf16 %v4457_v29, %v4456_v41 }
 0x58c   : > { %v8783_v50 = vmax.f32 %v3683_v47, 0.0  ;;  %v6292_v51 = vpop.f32.mrb[98].mxu0  ;;  %v3583_v52 = vadd.f32 %v6291_v48, %v3478_v46  ;;  %v6932_v32 = vpop.f32.mrb[130].mxu1  ;;  %v7481_v46 = vpack.c.bf16 %v4575_v45, %v4574_v44  ;;  %v4458_v47 = vld [vmem:[#allocation5 + $0xd0] sm:$0xff]  ;;  %v4459_v48 = vld [vmem:[#allocation5 + $0xd8] sm:$0xff] }
 0x58d   : > { %v6293_v54 = vpop.f32.mrb[99].mxu0  ;;  %v3707_v56 = vpop.f32.mrb[131].mxu1 }
 0x58e   : > { %v6294_v63 = vadd.f32 %v6293_v54, %v6292_v51  ;;  %v3688_v0 = vadd.f32 %v3687_v34, %v3583_v52  ;;  %6942 = vmatmul.mubr.msk.f32.vlgmr.msra.gmra.mrb[108].mxu0 %vm745_vm2, %v8783_v50  ;;  %6962 = vmatmul.mubr.msk.f32.vlgmr.msra.gmra.mrb[132].mxu1 %vm745_vm2, %v8783_v50  ;;  %v7477_v51 = vpack.c.bf16 %v4459_v48, %v4458_v47  ;;  %v4576_v52 = vld [vmem:[#allocation5 + $0xf0] sm:$0xff] }
 0x58f   : > { %7444 = vmatpush3.bf16.msra.mxu0 %v8755_v55  ;;  %7452 = vmatpush3.bf16.msra.mxu1 %v8758_v58 }
 0x590   : > { %v3588_v1 = vadd.f32 %v6294_v63, %v3483_v62  ;;  %v8792_v2 = vmax.f32 %v3688_v0, 0.0  ;;  %v6295_v3 = vpop.f32.mrb[100].mxu0  ;;  %7446 = vmatprep.subr.bf16.mxu0 %v7445_v33  ;;  %7454 = vmatprep.subr.bf16.mxu1 %v7453_v8 }
 0x591   : > { %v6296_v7 = vpop.f32.mrb[101].mxu0 }
 0x592   : > { %v3693_v11 = vadd.f32 %v6926_v30, %v3588_v1  ;;  %v6297_v12 = vadd.f32 %v6296_v7, %v6295_v3  ;;  %6944 = vmatprep.mubr.msk.f32.mxu0 %vm745_vm2, %v8792_v2  ;;  %6964 = vmatprep.mubr.msk.f32.mxu1 %vm745_vm2, %v8792_v2  ;;  %v3503_v30 = vadd.f32 %v8767_v18, %v8772_v19  ;;  %v4222_v18 = vld [vmem:[#allocation5 + $0x90] sm:$0xff]  ;;  %v4223_v19 = vld [vmem:[#allocation5 + $0x98] sm:$0xff] }
 0x593   : > { %7448 = vmatpush3.bf16.msra.mxu0 %v7445_v33  ;;  %7456 = vmatpush3.bf16.msra.mxu1 %v7453_v8  ;;  %v7461_v37 = vpack.c.bf16 %v4223_v19, %v4222_v18  ;;  %v4692_v33 = vld [vmem:[#allocation5 + $0x100] sm:$0xff]  ;;  %v4693_v8 = vld [vmem:[#allocation5 + $0x108] sm:$0xff] }
 0x594   : > { %v8800_v55 = vmax.f32 %v3693_v11, 0.0  ;;  %v6298_v58 = vpop.f32.mrb[102].mxu0  ;;  %v3593_v14 = vadd.f32 %v6297_v12, %v3488_v9  ;;  %7458 = vmatprep.subr.bf16.mxu0 %v7457_v4  ;;  %7466 = vmatprep.subr.bf16.mxu1 %v7465_v6  ;;  %v7489_v54 = vpack.c.bf16 %v4693_v8, %v4692_v33 }
 0x595   : > { %v6299_v15 = vpop.f32.mrb[103].mxu0 }
 0x596   : > { %v6300_v49 = vadd.f32 %v6299_v15, %v6298_v58  ;;  %v3698_v59 = vadd.f32 %v3697_v42, %v3593_v14  ;;  %6945 = vmatmul.mubr.msk.f32.gmra.mrb[110].mxu0 %vm745_vm2, %v8800_v55  ;;  %6965 = vmatmul.mubr.msk.f32.gmra.mrb[134].mxu1 %vm745_vm2, %v8800_v55 }
 0x598   : > { %v3598_v5 = vadd.f32 %v6300_v49, %v3493_v13  ;;  %v8808_v17 = vmax.f32 %v3698_v59, 0.0  ;;  %v6301_v20 = vpop.f32.mrb[104].mxu0 }
 0x599   : > { %v6302_v21 = vpop.f32.mrb[105].mxu0 }
 0x59a   : > { %v3703_v23 = vadd.f32 %v6929_v40, %v3598_v5  ;;  %v6303_v24 = vadd.f32 %v6302_v21, %v6301_v20  ;;  %6947 = vmatprep.mubr.msk.f32.mxu0 %vm745_vm2, %v8808_v17  ;;  %6967 = vmatprep.mubr.msk.f32.mxu1 %vm745_vm2, %v8808_v17  ;;  %v4341_v40 = vld [vmem:[#allocation5 + $0xb8] sm:$0xff] }
 0x59b   : > { %v7469_v42 = vpack.c.bf16 %v4341_v40, %v4340_v39 }
 0x59c   : > { %v8816_v16 = vmax.f32 %v3703_v23, 0.0  ;;  %v6304_v25 = vpop.f32.mrb[106].mxu0  ;;  %v3603_v27 = vadd.f32 %v6303_v24, %v3498_v22 }
 0x59d   : > { %v6305_v28 = vpop.f32.mrb[107].mxu0 }
 0x59e   : > { %v6306_v31 = vadd.f32 %v6305_v28, %v6304_v25  ;;  %v3708_v34 = vadd.f32 %v3707_v56, %v3603_v27  ;;  %6948 = vmatmul.mubr.msk.f32.gmra.mrb[112].mxu0 %vm745_vm2, %v8816_v16  ;;  %6968 = vmatmul.mubr.msk.f32.gmra.mrb[136].mxu1 %vm745_vm2, %v8816_v16  ;;  %v4694_v56 = vld [vmem:[#allocation5 + $0x110] sm:$0xff] }
 0x59f   : > { %v7493_v60 = vpack.c.bf16 %v4695_v57, %v4694_v56 }
 0x5a0   : > { %v3608_v10 = vadd.f32 %v6306_v31, %v3503_v30  ;;  %v8824_v35 = vmax.f32 %v3708_v34, 0.0 }
 0x5a2   : > { %v3713_v26 = vadd.f32 %v6932_v32, %v3608_v10  ;;  %6950 = vmatprep.mubr.msk.f32.mxu0 %vm745_vm2, %v8824_v35  ;;  %6970 = vmatprep.mubr.msk.f32.mxu1 %vm745_vm2, %v8824_v35  ;;  %v4577_v32 = vld [vmem:[#allocation5 + $0xf8] sm:$0xff] }
 0x5a3   : > { %v7485_v53 = vpack.c.bf16 %v4577_v32, %v4576_v52 }
 0x5a4   : > { %v8830_v36 = vmax.f32 %v3713_v26, 0.0 }
 0x5a6   : > { %6951 = vmatmul.mubr.msk.f32.gmra.mrb[114].mxu0 %vm745_vm2, %v8830_v36  ;;  %6971 = vmatmul.mubr.msk.f32.gmra.mrb[138].mxu1 %vm745_vm2, %v8830_v36 }
 0x5a7   : > { %6981 = vmatprep.mubr.msk.f32.mxu0 %vm745_vm2, %v8776_v38  ;;  %7001 = vmatprep.mubr.msk.f32.mxu1 %vm745_vm2, %v8776_v38 }
 0x5aa   : > { %6982 = vmatmul.mubr.msk.f32.vlgmr.msra.gmra.mrb[116].mxu0 %vm745_vm2, %v8783_v50  ;;  %7002 = vmatmul.mubr.msk.f32.vlgmr.msra.gmra.mrb[140].mxu1 %vm745_vm2, %v8783_v50 }
 0x5ab   : > { %7460 = vmatpush3.bf16.msra.mxu0 %v7457_v4  ;;  %6984 = vmatprep.mubr.msk.f32.mxu0 %vm745_vm2, %v8792_v2 }
 0x5ac   : > { %7004 = vmatprep.mubr.msk.f32.mxu1 %vm745_vm2, %v8792_v2  ;;  %7462 = vmatprep.subr.bf16.mxu0 %v7461_v37 }
 0x5ad   : > { %7468 = vmatpush3.bf16.msra.mxu1 %v7465_v6 }
 0x5ae   : > { %6985 = vmatmul.mubr.msk.f32.gmra.mrb[118].mxu0 %vm745_vm2, %v8800_v55  ;;  %7005 = vmatmul.mubr.msk.f32.gmra.mrb[142].mxu1 %vm745_vm2, %v8800_v55 }
 0x5af   : > { %6987 = vmatprep.mubr.msk.f32.mxu0 %vm745_vm2, %v8808_v17  ;;  %7007 = vmatprep.mubr.msk.f32.mxu1 %vm745_vm2, %v8808_v17 }
 0x5b0   : > { %7464 = vmatpush3.bf16.msra.mxu0 %v7461_v37  ;;  %7470 = vmatprep.subr.bf16.mxu1 %v7469_v42 }
 0x5b1   : > { %7472 = vmatpush3.bf16.msra.mxu1 %v7469_v42  ;;  %7474 = vmatprep.subr.bf16.mxu0 %v7473_v43 }
 0x5b2   : > { %6988 = vmatmul.mubr.msk.f32.gmra.mrb[120].mxu0 %vm745_vm2, %v8816_v16  ;;  %7008 = vmatmul.mubr.msk.f32.gmra.mrb[144].mxu1 %vm745_vm2, %v8816_v16 }
 0x5b3   : > { %6990 = vmatprep.mubr.msk.f32.mxu0 %vm745_vm2, %v8824_v35  ;;  %7010 = vmatprep.mubr.msk.f32.mxu1 %vm745_vm2, %v8824_v35 }
 0x5b4   : > { %7482 = vmatprep.subr.bf16.mxu1 %v7481_v46 }
 0x5b6   : > { %6991 = vmatmul.mubr.msk.f32.gmra.mrb[122].mxu0 %vm745_vm2, %v8830_v36  ;;  %7011 = vmatmul.mubr.msk.f32.gmra.mrb[146].mxu1 %vm745_vm2, %v8830_v36 }
 0x5b7   : > { %7021 = vmatprep.mubr.msk.f32.mxu0 %vm745_vm2, %v8776_v38  ;;  %7041 = vmatprep.mubr.msk.f32.mxu1 %vm745_vm2, %v8776_v38 }
 0x5ba   : > { %7022 = vmatmul.mubr.msk.f32.vlgmr.msra.gmra.mrb[124].mxu0 %vm745_vm2, %v8783_v50  ;;  %7042 = vmatmul.mubr.msk.f32.vlgmr.msra.gmra.mrb[148].mxu1 %vm745_vm2, %v8783_v50 }
 0x5bb   : > { %7476 = vmatpush3.bf16.msra.mxu0 %v7473_v43  ;;  %7024 = vmatprep.mubr.msk.f32.mxu0 %vm745_vm2, %v8792_v2 }
 0x5bc   : > { %7044 = vmatprep.mubr.msk.f32.mxu1 %vm745_vm2, %v8792_v2  ;;  %7478 = vmatprep.subr.bf16.mxu0 %v7477_v51 }
 0x5bd   : > { %7484 = vmatpush3.bf16.msra.mxu1 %v7481_v46 }
 0x5be   : > { %7025 = vmatmul.mubr.msk.f32.gmra.mrb[126].mxu0 %vm745_vm2, %v8800_v55  ;;  %7045 = vmatmul.mubr.msk.f32.gmra.mrb[150].mxu1 %vm745_vm2, %v8800_v55 }
 0x5bf   : > { %7027 = vmatprep.mubr.msk.f32.mxu0 %vm745_vm2, %v8808_v17  ;;  %7047 = vmatprep.mubr.msk.f32.mxu1 %vm745_vm2, %v8808_v17 }
 0x5c0   : > { %7480 = vmatpush3.bf16.msra.mxu0 %v7477_v51  ;;  %7486 = vmatprep.subr.bf16.mxu1 %v7485_v53 }
 0x5c1   : > { %7488 = vmatpush3.bf16.msra.mxu1 %v7485_v53  ;;  %7490 = vmatprep.subr.bf16.mxu0 %v7489_v54 }
 0x5c2   : > { %7028 = vmatmul.mubr.msk.f32.gmra.mrb[128].mxu0 %vm745_vm2, %v8816_v16  ;;  %7048 = vmatmul.mubr.msk.f32.gmra.mrb[152].mxu1 %vm745_vm2, %v8816_v16 }
 0x5c3   : > { %7030 = vmatprep.mubr.msk.f32.mxu0 %vm745_vm2, %v8824_v35  ;;  %7050 = vmatprep.mubr.msk.f32.mxu1 %vm745_vm2, %v8824_v35 }
 0x5c6   : > { %7031 = vmatmul.mubr.msk.f32.gmra.mrb[130].mxu0 %vm745_vm2, %v8830_v36  ;;  %7051 = vmatmul.mubr.msk.f32.gmra.mrb[154].mxu1 %vm745_vm2, %v8830_v36 }
 0x5c7   : > { %7061 = vmatprep.mubr.msk.f32.mxu0 %vm745_vm2, %v8776_v38  ;;  %7081 = vmatprep.mubr.msk.f32.mxu1 %vm745_vm2, %v8776_v38 }
 0x5ca   : > { %7062 = vmatmul.mubr.msk.f32.vlgmr.msra.gmra.mrb[132].mxu0 %vm745_vm2, %v8783_v50  ;;  %7082 = vmatmul.mubr.msk.f32.vlgmr.msra.gmra.mrb[156].mxu1 %vm745_vm2, %v8783_v50 }
 0x5cb   : > { %7064 = vmatprep.mubr.msk.f32.mxu0 %vm745_vm2, %v8792_v2  ;;  %7084 = vmatprep.mubr.msk.f32.mxu1 %vm745_vm2, %v8792_v2 }
 0x5cc   : > { %7492 = vmatpush3.bf16.msra.mxu0 %v7489_v54 }
 0x5cd   : > { %7494 = vmatprep.subr.bf16.mxu0 %v7493_v60 }
 0x5ce   : > { %7065 = vmatmul.mubr.msk.f32.gmra.mrb[134].mxu0 %vm745_vm2, %v8800_v55  ;;  %7085 = vmatmul.mubr.msk.f32.gmra.mrb[158].mxu1 %vm745_vm2, %v8800_v55 }
 0x5cf   : > { %7067 = vmatprep.mubr.msk.f32.mxu0 %vm745_vm2, %v8808_v17  ;;  %7087 = vmatprep.mubr.msk.f32.mxu1 %vm745_vm2, %v8808_v17 }
 0x5d0   : > { %7496 = vmatpush3.bf16.msra.mxu0 %v7493_v60 }
 0x5d2   : > { %7068 = vmatmul.mubr.msk.f32.gmra.mrb[136].mxu0 %vm745_vm2, %v8816_v16  ;;  %7088 = vmatmul.mubr.msk.f32.gmra.mrb[160].mxu1 %vm745_vm2, %v8816_v16 }
 0x5d3   : > { %7070 = vmatprep.mubr.msk.f32.mxu0 %vm745_vm2, %v8824_v35  ;;  %7090 = vmatprep.mubr.msk.f32.mxu1 %vm745_vm2, %v8824_v35 }
 0x5d6   : > { %7071 = vmatmul.mubr.msk.f32.gmra.mrb[138].mxu0 %vm745_vm2, %v8830_v36  ;;  %7091 = vmatmul.mubr.msk.f32.gmra.mrb[162].mxu1 %vm745_vm2, %v8830_v36 }
 0x5d7   : > { %7101 = vmatprep.mubr.msk.f32.mxu0 %vm745_vm2, %v8776_v38  ;;  %v4810_v38 = vld [vmem:[%s9205_s2 + $0x8] sm:$0xff] }
 0x5d8   : > { %5016 = vmatprep.mubr.f32.mxu1 %v4810_v38 }
 0x5da   : > { %7102 = vmatmul.mubr.msk.f32.vlgmr.msra.gmra.mrb[140].mxu0 %vm745_vm2, %v8783_v50  ;;  %v4812_v50 = vld [vmem:[%s9205_s2 + $0x18] sm:$0xff] }
 0x5db   : > { %7104 = vmatprep.mubr.msk.f32.mxu0 %vm745_vm2, %v8792_v2 }
 0x5de   : > { %7105 = vmatmul.mubr.msk.f32.gmra.mrb[142].mxu0 %vm745_vm2, %v8800_v55 }
 0x5df   : > { %7107 = vmatprep.mubr.msk.f32.mxu0 %vm745_vm2, %v8808_v17 }
 0x5e2   : > { %7108 = vmatmul.mubr.msk.f32.gmra.mrb[144].mxu0 %vm745_vm2, %v8816_v16 }
 0x5e3   : > { %7110 = vmatprep.mubr.msk.f32.mxu0 %vm745_vm2, %v8824_v35 }
 0x5e6   : > { %7111 = vmatmul.mubr.msk.f32.gmra.mrb[146].mxu0 %vm745_vm2, %v8830_v36 }
 0x5e7   : > { %5121 = vmatprep.mubr.f32.mxu0 %v4812_v50 }
 0x661   : > { %v6943_v61 = vpop.f32.mrb[108].mxu0  ;;  %v6963_v62 = vpop.f32.mrb[132].mxu1 }
 0x662   : > { %3858 = vst.msk [vmem:[#allocation2 + $0x8] sm:$0xff] %vm745_vm2, %v6943_v61  ;;  %3976 = vst.msk [vmem:[#allocation2 + $0x48] sm:$0xff] %vm745_vm2, %v6963_v62  ;;  %v3818_v63 = vpop.f32.mrb[109].mxu0  ;;  %v3936_v0 = vpop.f32.mrb[133].mxu1 }
 0x663   : > { %3857 = vst.msk [vmem:[#allocation2] sm:$0xff] %vm745_vm2, %v3818_v63  ;;  %3975 = vst.msk [vmem:[#allocation2 + $0x40] sm:$0xff] %vm745_vm2, %v3936_v0 }
 0x669   : > { %v6946_v1 = vpop.f32.mrb[110].mxu0  ;;  %v6966_v2 = vpop.f32.mrb[134].mxu1  ;;  %v4850_v25 = vld [vmem:[#allocation2 + $0x8] sm:$0xff] }
 0x66a   : > { %3860 = vst.msk [vmem:[#allocation2 + $0x18] sm:$0xff] %vm745_vm2, %v6946_v1  ;;  %3978 = vst.msk [vmem:[#allocation2 + $0x58] sm:$0xff] %vm745_vm2, %v6966_v2  ;;  %v3828_v3 = vpop.f32.mrb[111].mxu0  ;;  %v3946_v4 = vpop.f32.mrb[135].mxu1  ;;  %v4849_v16 = vld [vmem:[#allocation2] sm:$0xff] }
 0x66b   : > { %3859 = vst.msk [vmem:[#allocation2 + $0x10] sm:$0xff] %vm745_vm2, %v3828_v3  ;;  %3977 = vst.msk [vmem:[#allocation2 + $0x50] sm:$0xff] %vm745_vm2, %v3946_v4  ;;  %v7499_v34 = vpack.c.bf16 %v4850_v25, %v4849_v16  ;;  %v4857_v2 = vld [vmem:[#allocation2 + $0x40] sm:$0xff]  ;;  %v4858_v3 = vld [vmem:[#allocation2 + $0x48] sm:$0xff] }
 0x671   : > { %v6949_v6 = vpop.f32.mrb[112].mxu0  ;;  %v6969_v7 = vpop.f32.mrb[136].mxu1  ;;  %v4852_v18 = vld [vmem:[#allocation2 + $0x18] sm:$0xff] }
 0x672   : > { %3862 = vst.msk [vmem:[#allocation2 + $0x28] sm:$0xff] %vm745_vm2, %v6949_v6  ;;  %3980 = vst.msk [vmem:[#allocation2 + $0x68] sm:$0xff] %vm745_vm2, %v6969_v7  ;;  %v3838_v9 = vpop.f32.mrb[113].mxu0  ;;  %v3956_v11 = vpop.f32.mrb[137].mxu1  ;;  %v4851_v36 = vld [vmem:[#allocation2 + $0x10] sm:$0xff] }
 0x673   : > { %3861 = vst.msk [vmem:[#allocation2 + $0x20] sm:$0xff] %vm745_vm2, %v3838_v9  ;;  %3979 = vst.msk [vmem:[#allocation2 + $0x60] sm:$0xff] %vm745_vm2, %v3956_v11  ;;  %v7503_v41 = vpack.c.bf16 %v4852_v18, %v4851_v36  ;;  %v7515_v11 = vpack.c.bf16 %v4858_v3, %v4857_v2  ;;  %v4819_v3 = vld [vmem:[%s9205_s2 + $0x50] sm:$0xff] }
 0x679   : > { %v6952_v12 = vpop.f32.mrb[114].mxu0  ;;  %v6972_v55 = vpop.f32.mrb[138].mxu1  ;;  %v4854_v45 = vld [vmem:[#allocation2 + $0x28] sm:$0xff] }
 0x67a   : > { %3864 = vst.msk [vmem:[#allocation2 + $0x38] sm:$0xff] %vm745_vm2, %v6952_v12  ;;  %3982 = vst.msk [vmem:[#allocation2 + $0x78] sm:$0xff] %vm745_vm2, %v6972_v55  ;;  %v3848_v58 = vpop.f32.mrb[115].mxu0  ;;  %v3966_v14 = vpop.f32.mrb[139].mxu1  ;;  %v4853_v44 = vld [vmem:[#allocation2 + $0x20] sm:$0xff] }
 0x67b   : > { %3863 = vst.msk [vmem:[#allocation2 + $0x30] sm:$0xff] %vm745_vm2, %v3848_v58  ;;  %3981 = vst.msk [vmem:[#allocation2 + $0x70] sm:$0xff] %vm745_vm2, %v3966_v14  ;;  %v7507_v52 = vpack.c.bf16 %v4854_v45, %v4853_v44  ;;  %v4859_v14 = vld [vmem:[#allocation2 + $0x50] sm:$0xff]  ;;  %v4809_v45 = vld [vmem:[%s9205_s2] sm:$0xff] }
 0x67d   : > { %v6983_v15 = vpop.f32.mrb[116].mxu0  ;;  %v7003_v13 = vpop.f32.mrb[140].mxu1 }
 0x67e   : > { %4094 = vst.msk [vmem:[#allocation2 + $0x88] sm:$0xff] %vm745_vm2, %v6983_v15  ;;  %4212 = vst.msk [vmem:[#allocation2 + $0xc8] sm:$0xff] %vm745_vm2, %v7003_v13  ;;  %v4054_v49 = vpop.f32.mrb[117].mxu0  ;;  %v4172_v59 = vpop.f32.mrb[141].mxu1  ;;  %v4860_v15 = vld [vmem:[#allocation2 + $0x58] sm:$0xff] }
 0x67f   : > { %4093 = vst.msk [vmem:[#allocation2 + $0x80] sm:$0xff] %vm745_vm2, %v4054_v49  ;;  %4211 = vst.msk [vmem:[#allocation2 + $0xc0] sm:$0xff] %vm745_vm2, %v4172_v59 }
 0x681   : > { %v6986_v5 = vpop.f32.mrb[118].mxu0  ;;  %v7006_v17 = vpop.f32.mrb[142].mxu1  ;;  %v4856_v54 = vld [vmem:[#allocation2 + $0x38] sm:$0xff] }
 0x682   : > { %4096 = vst.msk [vmem:[#allocation2 + $0x98] sm:$0xff] %vm745_vm2, %v6986_v5  ;;  %4214 = vst.msk [vmem:[#allocation2 + $0xd8] sm:$0xff] %vm745_vm2, %v7006_v17  ;;  %v4064_v20 = vpop.f32.mrb[119].mxu0  ;;  %v4182_v21 = vpop.f32.mrb[143].mxu1  ;;  %v4855_v53 = vld [vmem:[#allocation2 + $0x30] sm:$0xff]  ;;  %v7519_v17 = vpack.c.bf16 %v4860_v15, %v4859_v14 }
 0x683   : > { %4095 = vst.msk [vmem:[#allocation2 + $0x90] sm:$0xff] %vm745_vm2, %v4064_v20  ;;  %4213 = vst.msk [vmem:[#allocation2 + $0xd0] sm:$0xff] %vm745_vm2, %v4182_v21  ;;  %v7511_v62 = vpack.c.bf16 %v4856_v54, %v4855_v53 }
 0x685   : > { %v6989_v22 = vpop.f32.mrb[120].mxu0  ;;  %v7009_v23 = vpop.f32.mrb[144].mxu1  ;;  %v4866_v24 = vld [vmem:[#allocation2 + $0x88] sm:$0xff] }
 0x686   : > { %4098 = vst.msk [vmem:[#allocation2 + $0xa8] sm:$0xff] %vm745_vm2, %v6989_v22  ;;  %4216 = vst.msk [vmem:[#allocation2 + $0xe8] sm:$0xff] %vm745_vm2, %v7009_v23  ;;  %v4074_v27 = vpop.f32.mrb[121].mxu0  ;;  %v4192_v28 = vpop.f32.mrb[145].mxu1  ;;  %v4865_v30 = vld [vmem:[#allocation2 + $0x80] sm:$0xff]  ;;  %v4874_v50 = vld [vmem:[#allocation2 + $0xc8] sm:$0xff] }
 0x687   : > { %4097 = vst.msk [vmem:[#allocation2 + $0xa0] sm:$0xff] %vm745_vm2, %v4074_v27  ;;  %4215 = vst.msk [vmem:[#allocation2 + $0xe0] sm:$0xff] %vm745_vm2, %v4192_v28  ;;  %v7497_v31 = vpack.c.bf16 %v4866_v24, %v4865_v30  ;;  %v4873_v38 = vld [vmem:[#allocation2 + $0xc0] sm:$0xff]  ;;  %v4862_v24 = vld [vmem:[#allocation2 + $0x68] sm:$0xff] }
 0x688   : > { %v7513_v1 = vpack.c.bf16 %v4874_v50, %v4873_v38  ;;  %v4861_v23 = vld [vmem:[#allocation2 + $0x60] sm:$0xff]  ;;  %v4820_v38 = vld [vmem:[%s9205_s2 + $0x58] sm:$0xff] }
 0x689   : > { %v6992_v10 = vpop.f32.mrb[122].mxu0  ;;  %v7012_v35 = vpop.f32.mrb[146].mxu1  ;;  %7498 = vmatprep.subr.bf16.mxu1 %v7497_v31  ;;  %v4868_v26 = vld [vmem:[#allocation2 + $0x98] sm:$0xff]  ;;  %v7523_v30 = vpack.c.bf16 %v4862_v24, %v4861_v23 }
 0x68a   : > { %4100 = vst.msk [vmem:[#allocation2 + $0xb8] sm:$0xff] %vm745_vm2, %v6992_v10  ;;  %4218 = vst.msk [vmem:[#allocation2 + $0xf8] sm:$0xff] %vm745_vm2, %v7012_v35  ;;  %v4084_v19 = vpop.f32.mrb[123].mxu0  ;;  %v4202_v37 = vpop.f32.mrb[147].mxu1  ;;  %7500 = vmatpush3.bf16.msra.mxu1 %v7499_v34  ;;  %v4867_v39 = vld [vmem:[#allocation2 + $0x90] sm:$0xff]  ;;  %v4876_v9 = vld [vmem:[#allocation2 + $0xd8] sm:$0xff] }
 0x68b   : > { %4099 = vst.msk [vmem:[#allocation2 + $0xb0] sm:$0xff] %vm745_vm2, %v4084_v19  ;;  %4217 = vst.msk [vmem:[#allocation2 + $0xf0] sm:$0xff] %vm745_vm2, %v4202_v37  ;;  %v7501_v40 = vpack.c.bf16 %v4868_v26, %v4867_v39  ;;  %v4875_v7 = vld [vmem:[#allocation2 + $0xd0] sm:$0xff]  ;;  %v4864_v26 = vld [vmem:[#allocation2 + $0x78] sm:$0xff] }
 0x68c   : > { %v7517_v58 = vpack.c.bf16 %v4876_v9, %v4875_v7  ;;  %v4863_v35 = vld [vmem:[#allocation2 + $0x70] sm:$0xff]  ;;  %v4824_v9 = vld [vmem:[%s9205_s2 + $0x78] sm:$0xff] }
 0x68d   : > { %v7023_v29 = vpop.f32.mrb[124].mxu0  ;;  %v7043_v42 = vpop.f32.mrb[148].mxu1  ;;  %7502 = vmatprep.subr.bf16.mxu1 %v7501_v40  ;;  %v4870_v43 = vld [vmem:[#allocation2 + $0xa8] sm:$0xff]  ;;  %v7527_v19 = vpack.c.bf16 %v4864_v26, %v4863_v35 }
 0x68e   : > { %4330 = vst.msk [vmem:[#allocation2 + $0x108] sm:$0xff] %vm745_vm2, %v7023_v29  ;;  %4448 = vst.msk [vmem:[#allocation2 + $0x148] sm:$0xff] %vm745_vm2, %v7043_v42  ;;  %v4290_v46 = vpop.f32.mrb[125].mxu0  ;;  %v4408_v47 = vpop.f32.mrb[149].mxu1  ;;  %7504 = vmatpush3.bf16.msra.mxu1 %v7503_v41  ;;  %v4869_v48 = vld [vmem:[#allocation2 + $0xa0] sm:$0xff]  ;;  %v4878_v5 = vld [vmem:[#allocation2 + $0xe8] sm:$0xff] }
 0x68f   : > { %4329 = vst.msk [vmem:[#allocation2 + $0x100] sm:$0xff] %vm745_vm2, %v4290_v46  ;;  %4447 = vst.msk [vmem:[#allocation2 + $0x140] sm:$0xff] %vm745_vm2, %v4408_v47  ;;  %v7505_v51 = vpack.c.bf16 %v4870_v43, %v4869_v48  ;;  %v4877_v59 = vld [vmem:[#allocation2 + $0xe0] sm:$0xff]  ;;  %v4815_v47 = vld [vmem:[%s9205_s2 + $0x30] sm:$0xff] }
 0x690   : > { %v7521_v22 = vpack.c.bf16 %v4878_v5, %v4877_v59  ;;  %v4830_v5 = vld [vmem:[%s9205_s2 + $0xa8] sm:$0xff] }
 0x691   : > { %v7026_v32 = vpop.f32.mrb[126].mxu0  ;;  %v7046_v33 = vpop.f32.mrb[150].mxu1  ;;  %7506 = vmatprep.subr.bf16.mxu1 %v7505_v51  ;;  %v4872_v8 = vld [vmem:[#allocation2 + $0xb8] sm:$0xff]  ;;  %v4834_v35 = vld [vmem:[%s9205_s2 + $0xc8] sm:$0xff] }
 0x692   : > { %4332 = vst.msk [vmem:[#allocation2 + $0x118] sm:$0xff] %vm745_vm2, %v7026_v32  ;;  %4450 = vst.msk [vmem:[#allocation2 + $0x158] sm:$0xff] %vm745_vm2, %v7046_v33  ;;  %v4300_v56 = vpop.f32.mrb[127].mxu0  ;;  %v4418_v57 = vpop.f32.mrb[151].mxu1  ;;  %7508 = vmatpush3.bf16.msra.mxu1 %v7507_v52  ;;  %v4871_v60 = vld [vmem:[#allocation2 + $0xb0] sm:$0xff]  ;;  %v4880_v28 = vld [vmem:[#allocation2 + $0xf8] sm:$0xff] }
 0x693   : > { %4331 = vst.msk [vmem:[#allocation2 + $0x110] sm:$0xff] %vm745_vm2, %v4300_v56  ;;  %4449 = vst.msk [vmem:[#allocation2 + $0x150] sm:$0xff] %vm745_vm2, %v4418_v57  ;;  %v7509_v61 = vpack.c.bf16 %v4872_v8, %v4871_v60  ;;  %v4879_v27 = vld [vmem:[#allocation2 + $0xf0] sm:$0xff]  ;;  %v4814_v57 = vld [vmem:[%s9205_s2 + $0x28] sm:$0xff] }
 0x694   : > { %v7525_v10 = vpack.c.bf16 %v4880_v28, %v4879_v27 }
 0x695   : > { %v7029_v63 = vpop.f32.mrb[128].mxu0  ;;  %v7049_v0 = vpop.f32.mrb[152].mxu1  ;;  %7510 = vmatprep.subr.bf16.mxu1 %v7509_v61  ;;  %v4882_v29 = vld [vmem:[#allocation2 + $0x108] sm:$0xff] }
 0x696   : > { %4334 = vst.msk [vmem:[#allocation2 + $0x128] sm:$0xff] %vm745_vm2, %v7029_v63  ;;  %4452 = vst.msk [vmem:[#allocation2 + $0x168] sm:$0xff] %vm745_vm2, %v7049_v0  ;;  %v4310_v4 = vpop.f32.mrb[129].mxu0  ;;  %v4428_v6 = vpop.f32.mrb[153].mxu1  ;;  %7512 = vmatpush3.bf16.msra.mxu1 %v7511_v62  ;;  %v4881_v41 = vld [vmem:[#allocation2 + $0x100] sm:$0xff] }
 0x697   : > { %4333 = vst.msk [vmem:[#allocation2 + $0x120] sm:$0xff] %vm745_vm2, %v4310_v4  ;;  %4451 = vst.msk [vmem:[#allocation2 + $0x160] sm:$0xff] %vm745_vm2, %v4428_v6  ;;  %7514 = vmatprep.subr.bf16.mxu1 %v7513_v1  ;;  %v7531_v48 = vpack.c.bf16 %v4882_v29, %v4881_v41  ;;  %v4825_v6 = vld [vmem:[%s9205_s2 + $0x80] sm:$0xff] }
 0x698   : > { %v4889_v24 = vld [vmem:[#allocation2 + $0x140] sm:$0xff] }
 0x699   : > { %v7032_v12 = vpop.f32.mrb[130].mxu0  ;;  %v7052_v55 = vpop.f32.mrb[154].mxu1  ;;  %v4884_v8 = vld [vmem:[#allocation2 + $0x118] sm:$0xff] }
 0x69a   : > { %4336 = vst.msk [vmem:[#allocation2 + $0x138] sm:$0xff] %vm745_vm2, %v7032_v12  ;;  %4454 = vst.msk [vmem:[#allocation2 + $0x178] sm:$0xff] %vm745_vm2, %v7052_v55  ;;  %v4320_v13 = vpop.f32.mrb[131].mxu0  ;;  %v4438_v49 = vpop.f32.mrb[155].mxu1  ;;  %7516 = vmatpush3.bf16.msra.mxu1 %v7515_v11  ;;  %v4883_v33 = vld [vmem:[#allocation2 + $0x110] sm:$0xff] }
 0x69b   : > { %4335 = vst.msk [vmem:[#allocation2 + $0x130] sm:$0xff] %vm745_vm2, %v4320_v13  ;;  %4453 = vst.msk [vmem:[#allocation2 + $0x170] sm:$0xff] %vm745_vm2, %v4438_v49  ;;  %7518 = vmatprep.subr.bf16.mxu1 %v7517_v58  ;;  %v7535_v50 = vpack.c.bf16 %v4884_v8, %v4883_v33 }
 0x69d   : > { %v7063_v20 = vpop.f32.mrb[132].mxu0  ;;  %v7083_v21 = vpop.f32.mrb[156].mxu1  ;;  %v4886_v0 = vld [vmem:[#allocation2 + $0x128] sm:$0xff] }
 0x69e   : > { %4566 = vst.msk [vmem:[#allocation2 + $0x188] sm:$0xff] %vm745_vm2, %v7063_v20  ;;  %4684 = vst.msk [vmem:[#allocation2 + $0x1c8] sm:$0xff] %vm745_vm2, %v7083_v21  ;;  %v4526_v16 = vpop.f32.mrb[133].mxu0  ;;  %v4644_v25 = vpop.f32.mrb[157].mxu1  ;;  %7520 = vmatpush3.bf16.msra.mxu1 %v7519_v17  ;;  %v4885_v63 = vld [vmem:[#allocation2 + $0x120] sm:$0xff] }
 0x69f   : > { %4565 = vst.msk [vmem:[#allocation2 + $0x180] sm:$0xff] %vm745_vm2, %v4526_v16  ;;  %4683 = vst.msk [vmem:[#allocation2 + $0x1c0] sm:$0xff] %vm745_vm2, %v4644_v25  ;;  %7522 = vmatprep.subr.bf16.mxu1 %v7521_v22  ;;  %v7539_v7 = vpack.c.bf16 %v4886_v0, %v4885_v63  ;;  %v4829_v20 = vld [vmem:[%s9205_s2 + $0xa0] sm:$0xff]  ;;  %v4890_v16 = vld [vmem:[#allocation2 + $0x148] sm:$0xff] }
 0x6a0   : > { %v4813_v0 = vld [vmem:[%s9205_s2 + $0x20] sm:$0xff] }
 0x6a1   : > { %v7066_v31 = vpop.f32.mrb[134].mxu0  ;;  %v7086_v34 = vpop.f32.mrb[158].mxu1  ;;  %v4888_v58 = vld [vmem:[#allocation2 + $0x138] sm:$0xff] }
 0x6a2   : > { %4568 = vst.msk [vmem:[#allocation2 + $0x198] sm:$0xff] %vm745_vm2, %v7066_v31  ;;  %4686 = vst.msk [vmem:[#allocation2 + $0x1d8] sm:$0xff] %vm745_vm2, %v7086_v34  ;;  %v4536_v36 = vpop.f32.mrb[135].mxu0  ;;  %v4654_v18 = vpop.f32.mrb[159].mxu1  ;;  %7524 = vmatpush3.bf16.msra.mxu1 %v7523_v30  ;;  %v4887_v55 = vld [vmem:[#allocation2 + $0x130] sm:$0xff]  ;;  %v7547_v34 = vpack.c.bf16 %v4890_v16, %v4889_v24  ;;  %v5275_v24 = vld [vmem:[%s9212_s9] sm:$0xff] }
 0x6a3   : > { %4567 = vst.msk [vmem:[#allocation2 + $0x190] sm:$0xff] %vm745_vm2, %v4536_v36  ;;  %4685 = vst.msk [vmem:[#allocation2 + $0x1d0] sm:$0xff] %vm745_vm2, %v4654_v18  ;;  %7526 = vmatprep.subr.bf16.mxu1 %v7525_v10  ;;  %v7543_v17 = vpack.c.bf16 %v4888_v58, %v4887_v55  ;;  %v4835_v10 = vld [vmem:[%s9205_s2 + $0xd0] sm:$0xff]  ;;  %v4838_v55 = vld [vmem:[%s9205_s2 + $0xe8] sm:$0xff] }
 0x6a4   : > { %v4827_v58 = vld [vmem:[%s9205_s2 + $0x90] sm:$0xff]  ;;  %v5276_v16 = vld [vmem:[%s9212_s9 + $0x8] sm:$0xff] }
 0x6a5   : > { %v7069_v37 = vpop.f32.mrb[136].mxu0  ;;  %v7089_v39 = vpop.f32.mrb[160].mxu1  ;;  %v4898_v40 = vld [vmem:[#allocation2 + $0x188] sm:$0xff] }
 0x6a6   : > { %4570 = vst.msk [vmem:[#allocation2 + $0x1a8] sm:$0xff] %vm745_vm2, %v7069_v37  ;;  %4688 = vst.msk [vmem:[#allocation2 + $0x1e8] sm:$0xff] %vm745_vm2, %v7089_v39  ;;  %v4546_v42 = vpop.f32.mrb[137].mxu0  ;;  %v4664_v43 = vpop.f32.mrb[161].mxu1  ;;  %7528 = vmatpush3.bf16.msra.mxu1 %v7527_v19  ;;  %v4897_v44 = vld [vmem:[#allocation2 + $0x180] sm:$0xff]  ;;  %v4906_v49 = vld [vmem:[#allocation2 + $0x1c8] sm:$0xff] }
 0x6a7   : > { %4569 = vst.msk [vmem:[#allocation2 + $0x1a0] sm:$0xff] %vm745_vm2, %v4546_v42  ;;  %4687 = vst.msk [vmem:[#allocation2 + $0x1e0] sm:$0xff] %vm745_vm2, %v4664_v43  ;;  %v7529_v46 = vpack.c.bf16 %v4898_v40, %v4897_v44  ;;  %v4905_v13 = vld [vmem:[#allocation2 + $0x1c0] sm:$0xff]  ;;  %v4891_v19 = vld [vmem:[#allocation2 + $0x150] sm:$0xff] }
 0x6a8   : > { %v7545_v22 = vpack.c.bf16 %v4906_v49, %v4905_v13  ;;  %v4892_v37 = vld [vmem:[#allocation2 + $0x158] sm:$0xff] }
 0x6a9   : > { %v7072_v51 = vpop.f32.mrb[138].mxu0  ;;  %v7092_v52 = vpop.f32.mrb[162].mxu1  ;;  %7530 = vmatprep.subr.bf16.mxu0 %v7529_v46  ;;  %5017 = vmatmul.mubr.f32.vlgmr.msra.gmra.mrb[164].mxu1 %v4809_v45  ;;  %v4900_v32 = vld [vmem:[#allocation2 + $0x198] sm:$0xff]  ;;  %v7551_v43 = vpack.c.bf16 %v4892_v37, %v4891_v19  ;;  %v4839_v45 = vld [vmem:[%s9205_s2 + $0xf0] sm:$0xff] }
 0x6aa   : > { %4572 = vst.msk [vmem:[#allocation2 + $0x1b8] sm:$0xff] %vm745_vm2, %v7072_v51  ;;  %4690 = vst.msk [vmem:[#allocation2 + $0x1f8] sm:$0xff] %vm745_vm2, %v7092_v52  ;;  %v4556_v53 = vpop.f32.mrb[139].mxu0  ;;  %v4674_v54 = vpop.f32.mrb[163].mxu1  ;;  %7532 = vmatpush3.bf16.msra.mxu0 %v7531_v48  ;;  %v4899_v56 = vld [vmem:[#allocation2 + $0x190] sm:$0xff]  ;;  %5021 = vmatprep.mubr.f32.mxu1 %v4815_v47  ;;  %v4908_v30 = vld [vmem:[#allocation2 + $0x1d8] sm:$0xff] }
 0x6ab   : > { %4571 = vst.msk [vmem:[#allocation2 + $0x1b0] sm:$0xff] %vm745_vm2, %v4556_v53  ;;  %4689 = vst.msk [vmem:[#allocation2 + $0x1f0] sm:$0xff] %vm745_vm2, %v4674_v54  ;;  %v7533_v60 = vpack.c.bf16 %v4900_v32, %v4899_v56  ;;  %v4907_v28 = vld [vmem:[#allocation2 + $0x1d0] sm:$0xff]  ;;  %v4840_v44 = vld [vmem:[%s9205_s2 + $0xf8] sm:$0xff] }
 0x6ac   : > { %v7549_v36 = vpack.c.bf16 %v4908_v30, %v4907_v28  ;;  %v4893_v48 = vld [vmem:[#allocation2 + $0x160] sm:$0xff]  ;;  %v4894_v51 = vld [vmem:[#allocation2 + $0x168] sm:$0xff]  ;;  %v4848_v13 = vld [vmem:[%s9205_s2 + $0x138] sm:$0xff] }
 0x6ad   : > { %v7103_v61 = vpop.f32.mrb[140].mxu0  ;;  %7534 = vmatprep.subr.bf16.mxu0 %v7533_v60  ;;  %5022 = vmatmul.mubr.f32.gmra.mrb[166].mxu1 %v4814_v57  ;;  %v4902_v62 = vld [vmem:[#allocation2 + $0x1a8] sm:$0xff]  ;;  %v7555_v53 = vpack.c.bf16 %v4894_v51, %v4893_v48  ;;  %v4845_v54 = vld [vmem:[%s9205_s2 + $0x120] sm:$0xff]  ;;  %v4895_v60 = vld [vmem:[#allocation2 + $0x170] sm:$0xff] }
 0x6ae   : > { %4802 = vst.msk [vmem:[#allocation2 + $0x208] sm:$0xff] %vm745_vm2, %v7103_v61  ;;  %v4762_v1 = vpop.f32.mrb[141].mxu0  ;;  %7536 = vmatpush3.bf16.msra.mxu0 %v7535_v50  ;;  %v4901_v2 = vld [vmem:[#allocation2 + $0x1a0] sm:$0xff]  ;;  %5026 = vmatprep.mubr.f32.mxu1 %v4820_v38  ;;  %v4910_v29 = vld [vmem:[#allocation2 + $0x1e8] sm:$0xff]  ;;  %v4896_v38 = vld [vmem:[#allocation2 + $0x178] sm:$0xff] }
 0x6af   : > { %4801 = vst.msk [vmem:[#allocation2 + $0x200] sm:$0xff] %vm745_vm2, %v4762_v1  ;;  %v7537_v4 = vpack.c.bf16 %v4902_v62, %v4901_v2  ;;  %v4909_v41 = vld [vmem:[#allocation2 + $0x1e0] sm:$0xff]  ;;  %v4844_v61 = vld [vmem:[%s9205_s2 + $0x118] sm:$0xff]  ;;  %v7559_v63 = vpack.c.bf16 %v4896_v38, %v4895_v60  ;;  %v4811_v1 = vld [vmem:[%s9205_s2 + $0x10] sm:$0xff] }
 0x6b0   : > { %v7553_v46 = vpack.c.bf16 %v4910_v29, %v4909_v41  ;;  %v4818_v2 = vld [vmem:[%s9205_s2 + $0x48] sm:$0xff]  ;;  %v4832_v49 = vld [vmem:[%s9205_s2 + $0xb8] sm:$0xff] }
 0x6b1   : > { %v7106_v11 = vpop.f32.mrb[142].mxu0  ;;  %7538 = vmatprep.subr.bf16.mxu0 %v7537_v4  ;;  %5027 = vmatmul.mubr.f32.gmra.mrb[168].mxu1 %v4819_v3  ;;  %v4904_v12 = vld [vmem:[#allocation2 + $0x1b8] sm:$0xff]  ;;  %v4817_v3 = vld [vmem:[%s9205_s2 + $0x40] sm:$0xff]  ;;  %v4823_v4 = vld [vmem:[%s9205_s2 + $0x70] sm:$0xff] }
 0x6b2   : > { %4804 = vst.msk [vmem:[#allocation2 + $0x218] sm:$0xff] %vm745_vm2, %v7106_v11  ;;  %v4772_v14 = vpop.f32.mrb[143].mxu0  ;;  %7540 = vmatpush3.bf16.msra.mxu0 %v7539_v7  ;;  %v4903_v15 = vld [vmem:[#allocation2 + $0x1b0] sm:$0xff]  ;;  %5031 = vmatprep.mubr.f32.mxu1 %v4825_v6  ;;  %v4912_v33 = vld [vmem:[#allocation2 + $0x1f8] sm:$0xff]  ;;  %v4833_v11 = vld [vmem:[%s9205_s2 + $0xc0] sm:$0xff] }
 0x6b3   : > { %4803 = vst.msk [vmem:[#allocation2 + $0x210] sm:$0xff] %vm745_vm2, %v4772_v14  ;;  %v7541_v59 = vpack.c.bf16 %v4904_v12, %v4903_v15  ;;  %v4911_v32 = vld [vmem:[#allocation2 + $0x1f0] sm:$0xff]  ;;  %v4816_v6 = vld [vmem:[%s9205_s2 + $0x38] sm:$0xff]  ;;  %v4821_v12 = vld [vmem:[%s9205_s2 + $0x60] sm:$0xff] }
 0x6b4   : > { %v7557_v56 = vpack.c.bf16 %v4912_v33, %v4911_v32  ;;  %v4828_v7 = vld [vmem:[%s9205_s2 + $0x98] sm:$0xff]  ;;  %v4843_v14 = vld [vmem:[%s9205_s2 + $0x110] sm:$0xff]  ;;  %v4826_v15 = vld [vmem:[%s9205_s2 + $0x88] sm:$0xff] }
 0x6b5   : > { %v7109_v21 = vpop.f32.mrb[144].mxu0  ;;  %7542 = vmatprep.subr.bf16.mxu0 %v7541_v59  ;;  %5032 = vmatmul.mubr.f32.gmra.mrb[170].mxu1 %v4824_v9  ;;  %v4914_v23 = vld [vmem:[#allocation2 + $0x208] sm:$0xff]  ;;  %v4831_v59 = vld [vmem:[%s9205_s2 + $0xb0] sm:$0xff]  ;;  %v5278_v28 = vld [vmem:[%s9212_s9 + $0x18] sm:$0xff] }
 0x6b6   : > { %4806 = vst.msk [vmem:[#allocation2 + $0x228] sm:$0xff] %vm745_vm2, %v7109_v21  ;;  %v4782_v25 = vpop.f32.mrb[145].mxu0  ;;  %7544 = vmatpush3.bf16.msra.mxu0 %v7543_v17  ;;  %v4913_v27 = vld [vmem:[#allocation2 + $0x200] sm:$0xff]  ;;  %5036 = vmatprep.mubr.f32.mxu1 %v4830_v5  ;;  %v4822_v9 = vld [vmem:[%s9205_s2 + $0x68] sm:$0xff]  ;;  %v4836_v17 = vld [vmem:[%s9205_s2 + $0xd8] sm:$0xff] }
 0x6b7   : > { %4805 = vst.msk [vmem:[#allocation2 + $0x220] sm:$0xff] %vm745_vm2, %v4782_v25  ;;  %7546 = vmatprep.subr.bf16.mxu0 %v7545_v22  ;;  %v7561_v31 = vpack.c.bf16 %v4914_v23, %v4913_v27  ;;  %v4837_v5 = vld [vmem:[%s9205_s2 + $0xe0] sm:$0xff]  ;;  %v4847_v22 = vld [vmem:[%s9205_s2 + $0x130] sm:$0xff]  ;;  %v4846_v23 = vld [vmem:[%s9205_s2 + $0x128] sm:$0xff]  ;;  %v7577_v25 = vpack.c.bf16 %v5276_v16, %v5275_v24 }
 0x6b8   : > { %v4841_v21 = vld [vmem:[%s9205_s2 + $0x100] sm:$0xff]  ;;  %v5277_v27 = vld [vmem:[%s9212_s9 + $0x10] sm:$0xff] }
 0x6b9   : > { %v7112_v26 = vpop.f32.mrb[146].mxu0  ;;  %7562 = vmatprep.subr.bf16.mxu1 %v7561_v31  ;;  %5037 = vmatmul.mubr.f32.gmra.mrb[172].mxu1 %v4829_v20  ;;  %v4916_v18 = vld [vmem:[#allocation2 + $0x218] sm:$0xff]  ;;  %v4842_v20 = vld [vmem:[%s9205_s2 + $0x108] sm:$0xff]  ;;  %v7581_v30 = vpack.c.bf16 %v5278_v28, %v5277_v27 }
 0x6ba   : > { %4808 = vst.msk [vmem:[#allocation2 + $0x238] sm:$0xff] %vm745_vm2, %v7112_v26  ;;  %v4792_v39 = vpop.f32.mrb[147].mxu0  ;;  %7548 = vmatpush3.bf16.msra.mxu0 %v7547_v34  ;;  %7564 = vmatpush3.bf16.msra.mxu1 %v7561_v31  ;;  %v4915_v40 = vld [vmem:[#allocation2 + $0x210] sm:$0xff] }
 0x6bb   : > { %4807 = vst.msk [vmem:[#allocation2 + $0x230] sm:$0xff] %vm745_vm2, %v4792_v39  ;;  %7550 = vmatprep.subr.bf16.mxu0 %v7549_v36  ;;  %v7565_v42 = vpack.c.bf16 %v4916_v18, %v4915_v40  ;;  %5041 = vmatprep.mubr.f32.mxu1 %v4835_v10 }
 0x6bd   : > { %7566 = vmatprep.subr.bf16.mxu1 %v7565_v42  ;;  %5042 = vmatmul.mubr.f32.gmra.mrb[174].mxu1 %v4834_v35  ;;  %v4918_v47 = vld [vmem:[#allocation2 + $0x228] sm:$0xff] }
 0x6be   : > { %7552 = vmatpush3.bf16.msra.mxu0 %v7551_v43  ;;  %7568 = vmatpush3.bf16.msra.mxu1 %v7565_v42  ;;  %v4917_v52 = vld [vmem:[#allocation2 + $0x220] sm:$0xff] }
 0x6bf   : > { %7554 = vmatprep.subr.bf16.mxu0 %v7553_v46  ;;  %v7569_v8 = vpack.c.bf16 %v4918_v47, %v4917_v52  ;;  %5046 = vmatprep.mubr.f32.mxu1 %v4840_v44 }
 0x6c1   : > { %7570 = vmatprep.subr.bf16.mxu1 %v7569_v8  ;;  %5047 = vmatmul.mubr.f32.gmra.mrb[176].mxu1 %v4839_v45  ;;  %v4920_v57 = vld [vmem:[#allocation2 + $0x238] sm:$0xff] }
 0x6c2   : > { %7556 = vmatpush3.bf16.msra.mxu0 %v7555_v53  ;;  %7572 = vmatpush3.bf16.msra.mxu1 %v7569_v8  ;;  %v4919_v50 = vld [vmem:[#allocation2 + $0x230] sm:$0xff]  ;;  %v9165_v8 = vld [vmem:[%s9211_s8] ss:$0 sm:$0xff] }
 0x6c3   : > { %7558 = vmatprep.subr.bf16.mxu0 %v7557_v56  ;;  %v7573_v62 = vpack.c.bf16 %v4920_v57, %v4919_v50  ;;  %5051 = vmatprep.mubr.f32.mxu1 %v4845_v54 }
 0x6c5   : > { %7574 = vmatprep.subr.bf16.mxu1 %v7573_v62  ;;  %5052 = vmatmul.mubr.f32.gmra.mrb[178].mxu1 %v4844_v61 }
 0x6c6   : > { %7560 = vmatpush3.bf16.msra.mxu0 %v7559_v63  ;;  %7576 = vmatpush3.bf16.msra.mxu1 %v7573_v62 }
 0x6c7   : > { %7129 = vmatprep.mubr.msk.f32.mxu1 %vm1817_vm3, %v4813_v0  ;;  %7578 = vmatprep.subr.bf16.mxu0 %v7577_v25 }
 0x6c9   : > { %5122 = vmatmul.mubr.f32.vlgmr.msra.gmra.mrb[148].mxu0 %v4811_v1  ;;  %7130 = vmatmul.mubr.msk.f32.vlgmr.msra.gmra.mrb[180].mxu1 %vm1817_vm3, %v4818_v2 }
 0x6ca   : > { %5126 = vmatprep.mubr.f32.mxu0 %v4817_v3  ;;  %7132 = vmatprep.mubr.msk.f32.mxu1 %vm1817_vm3, %v4823_v4 }
 0x6cb   : > { %7580 = vmatpush3.bf16.msra.mxu0 %v7577_v25 }
 0x6cc   : > { %7582 = vmatprep.subr.bf16.mxu0 %v7581_v30 }
 0x6cd   : > { %5127 = vmatmul.mubr.f32.gmra.mrb[150].mxu0 %v4816_v6  ;;  %7133 = vmatmul.mubr.msk.f32.gmra.mrb[182].mxu1 %vm1817_vm3, %v4828_v7 }
 0x6ce   : > { %5131 = vmatprep.mubr.f32.mxu0 %v4822_v9  ;;  %7135 = vmatprep.mubr.msk.f32.mxu1 %vm1817_vm3, %v4833_v11 }
 0x6cf   : > { %7584 = vmatpush3.bf16.msra.mxu0 %v7581_v30 }
 0x6d1   : > { %5132 = vmatmul.mubr.f32.gmra.mrb[152].mxu0 %v4821_v12  ;;  %7136 = vmatmul.mubr.msk.f32.gmra.mrb[184].mxu1 %vm1817_vm3, %v4838_v55 }
 0x6d2   : > { %5136 = vmatprep.mubr.f32.mxu0 %v4827_v58  ;;  %7138 = vmatprep.mubr.msk.f32.mxu1 %vm1817_vm3, %v4843_v14 }
 0x6d5   : > { %5137 = vmatmul.mubr.f32.gmra.mrb[154].mxu0 %v4826_v15  ;;  %7139 = vmatmul.mubr.msk.f32.gmra.mrb[186].mxu1 %vm1817_vm3, %v4848_v13 }
 0x6d6   : > { %5141 = vmatprep.mubr.f32.mxu0 %v4832_v49 }
 0x6d9   : > { %5142 = vmatmul.mubr.f32.gmra.mrb[156].mxu0 %v4831_v59 }
 0x6da   : > { %5146 = vmatprep.mubr.f32.mxu0 %v4837_v5 }
 0x6dd   : > { %5147 = vmatmul.mubr.f32.gmra.mrb[158].mxu0 %v4836_v17 }
 0x6de   : > { %5151 = vmatprep.mubr.f32.mxu0 %v4842_v20 }
 0x6e1   : > { %5152 = vmatmul.mubr.f32.gmra.mrb[160].mxu0 %v4841_v21 }
 0x6e2   : > { %5156 = vmatprep.mubr.f32.mxu0 %v4847_v22 }
 0x6e5   : > { %5157 = vmatmul.mubr.f32.gmra.mrb[162].mxu0 %v4846_v23 }
 0x77c   : > { %v6463_v31 = vpop.f32.mrb[164].mxu1 }
 0x77d   : > { %v6464_v34 = vpop.f32.mrb[165].mxu1 }
 0x77e   : > { %v6465_v10 = vadd.f32 %v6464_v34, %v6463_v31 }
 0x780   : > { %v6466_v35 = vpop.f32.mrb[166].mxu1  ;;  %v5019_v60 = vadd.f32 %v6465_v10, %v9165_v8 }
 0x781   : > { %v6467_v26 = vpop.f32.mrb[167].mxu1 }
 0x782   : > { %v6468_v36 = vadd.f32 %v6467_v26, %v6466_v35 }
 0x784   : > { %v6469_v18 = vpop.f32.mrb[168].mxu1  ;;  %v5024_v1 = vadd.f32 %v6468_v36, %v9165_v8 }
 0x785   : > { %v6470_v19 = vpop.f32.mrb[169].mxu1 }
 0x786   : > { %v6471_v37 = vadd.f32 %v6470_v19, %v6469_v18 }
 0x788   : > { %v6472_v39 = vpop.f32.mrb[170].mxu1  ;;  %v5029_v55 = vadd.f32 %v6471_v37, %v9165_v8 }
 0x789   : > { %v6473_v40 = vpop.f32.mrb[171].mxu1 }
 0x78a   : > { %v6474_v41 = vadd.f32 %v6473_v40, %v6472_v39 }
 0x78c   : > { %v6475_v29 = vpop.f32.mrb[172].mxu1  ;;  %v5034_v20 = vadd.f32 %v6474_v41, %v9165_v8 }
 0x78d   : > { %v6476_v42 = vpop.f32.mrb[173].mxu1 }
 0x78e   : > { %v6477_v43 = vadd.f32 %v6476_v42, %v6475_v29 }
 0x790   : > { %v6478_v44 = vpop.f32.mrb[174].mxu1  ;;  %v5039_v27 = vadd.f32 %v6477_v43, %v9165_v8 }
 0x791   : > { %v6479_v45 = vpop.f32.mrb[175].mxu1 }
 0x792   : > { %v6480_v46 = vadd.f32 %v6479_v45, %v6478_v44 }
 0x794   : > { %v6481_v47 = vpop.f32.mrb[176].mxu1  ;;  %v5044_v26 = vadd.f32 %v6480_v46, %v9165_v8 }
 0x795   : > { %v6482_v48 = vpop.f32.mrb[177].mxu1 }
 0x796   : > { %v6483_v51 = vadd.f32 %v6482_v48, %v6481_v47 }
 0x798   : > { %v6484_v52 = vpop.f32.mrb[178].mxu1  ;;  %v5049_v41 = vadd.f32 %v6483_v51, %v9165_v8 }
 0x799   : > { %v6485_v32 = vpop.f32.mrb[179].mxu1 }
 0x79a   : > { %v9160_v33 = vadd.f32 %v6485_v32, %v6484_v52 }
 0x79c   : > { %v6519_v53 = vpop.f32.mrb[148].mxu0  ;;  %v7131_v54 = vpop.f32.mrb[180].mxu1  ;;  %v5054_v46 = vadd.f32 %v9160_v33, %v9165_v8 }
 0x79d   : > { %v6520_v56 = vpop.f32.mrb[149].mxu0  ;;  %v5228_v57 = vpop.f32.mrb[181].mxu1 }
 0x79e   : > { %v6521_v38 = vadd.f32 %v6520_v56, %v6519_v53  ;;  %v5808_v56 = vld [vmem:[%s9213_s10] ss:$0 sm:$0xff] }
 0x7a0   : > { %v6522_v50 = vpop.f32.mrb[150].mxu0  ;;  %v5124_v61 = vadd.f32 %v6521_v38, %v5019_v60  ;;  %v7134_v62 = vpop.f32.mrb[182].mxu1 }
 0x7a1   : > { %v6523_v63 = vpop.f32.mrb[151].mxu0  ;;  %v5238_v0 = vpop.f32.mrb[183].mxu1 }
 0x7a2   : > { %v6524_v2 = vadd.f32 %v6523_v63, %v6522_v50  ;;  %v5229_v3 = vadd.f32 %v5228_v57, %v5124_v61 }
 0x7a4   : > { %v5129_v4 = vadd.f32 %v6524_v2, %v5024_v1  ;;  %v5267_v6 = vmax.f32 %v5229_v3, 0.0  ;;  %v6525_v7 = vpop.f32.mrb[152].mxu0  ;;  %v7137_v9 = vpop.f32.mrb[184].mxu1 }
 0x7a5   : > { %v6526_v11 = vpop.f32.mrb[153].mxu0  ;;  %v5248_v12 = vpop.f32.mrb[185].mxu1 }
 0x7a6   : > { %v5234_v58 = vadd.f32 %v7131_v54, %v5129_v4  ;;  %v6527_v14 = vadd.f32 %v6526_v11, %v6525_v7  ;;  %7149 = vmatprep.mubr.msk.f32.mxu0 %vm745_vm2, %v5267_v6 }
 0x7a8   : > { %v5268_v15 = vmax.f32 %v5234_v58, 0.0  ;;  %v6528_v13 = vpop.f32.mrb[154].mxu0  ;;  %v5134_v49 = vadd.f32 %v6527_v14, %v5029_v55  ;;  %v7140_v59 = vpop.f32.mrb[186].mxu1 }
 0x7a9   : > { %v6529_v5 = vpop.f32.mrb[155].mxu0  ;;  %v5258_v17 = vpop.f32.mrb[187].mxu1 }
 0x7aa   : > { %v6530_v21 = vadd.f32 %v6529_v5, %v6528_v13  ;;  %v5239_v22 = vadd.f32 %v5238_v0, %v5134_v49  ;;  %7150 = vmatmul.mubr.msk.f32.vlgmr.msra.gmra.mrb[164].mxu0 %vm745_vm2, %v5268_v15 }
 0x7ac   : > { %v5139_v23 = vadd.f32 %v6530_v21, %v5034_v20  ;;  %v5269_v24 = vmax.f32 %v5239_v22, 0.0  ;;  %v6531_v16 = vpop.f32.mrb[156].mxu0 }
 0x7ad   : > { %v6532_v25 = vpop.f32.mrb[157].mxu0 }
 0x7ae   : > { %v5244_v28 = vadd.f32 %v7134_v62, %v5139_v23  ;;  %v6533_v30 = vadd.f32 %v6532_v25, %v6531_v16  ;;  %7152 = vmatprep.mubr.msk.f32.mxu0 %vm745_vm2, %v5269_v24 }
 0x7b0   : > { %v5270_v31 = vmax.f32 %v5244_v28, 0.0  ;;  %v6534_v34 = vpop.f32.mrb[158].mxu0  ;;  %v5144_v10 = vadd.f32 %v6533_v30, %v5039_v27 }
 0x7b1   : > { %v6535_v35 = vpop.f32.mrb[159].mxu0 }
 0x7b2   : > { %v6536_v36 = vadd.f32 %v6535_v35, %v6534_v34  ;;  %v5249_v18 = vadd.f32 %v5248_v12, %v5144_v10  ;;  %7153 = vmatmul.mubr.msk.f32.gmra.mrb[166].mxu0 %vm745_vm2, %v5270_v31 }
 0x7b4   : > { %v5149_v19 = vadd.f32 %v6536_v36, %v5044_v26  ;;  %v5271_v37 = vmax.f32 %v5249_v18, 0.0  ;;  %v6537_v39 = vpop.f32.mrb[160].mxu0 }
 0x7b5   : > { %v6538_v40 = vpop.f32.mrb[161].mxu0 }
 0x7b6   : > { %v5254_v29 = vadd.f32 %v7137_v9, %v5149_v19  ;;  %v6539_v42 = vadd.f32 %v6538_v40, %v6537_v39  ;;  %7155 = vmatprep.mubr.msk.f32.mxu0 %vm745_vm2, %v5271_v37 }
 0x7b8   : > { %v5272_v43 = vmax.f32 %v5254_v29, 0.0  ;;  %v6540_v44 = vpop.f32.mrb[162].mxu0  ;;  %v5154_v45 = vadd.f32 %v6539_v42, %v5049_v41 }
 0x7b9   : > { %v6541_v47 = vpop.f32.mrb[163].mxu0 }
 0x7ba   : > { %v6542_v48 = vadd.f32 %v6541_v47, %v6540_v44  ;;  %v5259_v52 = vadd.f32 %v5258_v17, %v5154_v45  ;;  %7156 = vmatmul.mubr.msk.f32.gmra.mrb[168].mxu0 %vm745_vm2, %v5272_v43 }
 0x7bc   : > { %v5159_v32 = vadd.f32 %v6542_v48, %v5054_v46  ;;  %v5273_v53 = vmax.f32 %v5259_v52, 0.0 }
 0x7be   : > { %v5264_v54 = vadd.f32 %v7140_v59, %v5159_v32  ;;  %7158 = vmatprep.mubr.msk.f32.mxu0 %vm745_vm2, %v5273_v53 }
 0x7c0   : > { %v5274_v51 = vmax.f32 %v5264_v54, 0.0 }
 0x7c2   : > { %7159 = vmatmul.mubr.msk.f32.gmra.mrb[170].mxu0 %vm745_vm2, %v5274_v51 }
 0x87d   : > { %v7151_v33 = vpop.f32.mrb[164].mxu0 }
 0x87e   : > { %v5382_v8 = vadd.f32 %v7151_v33, %v5808_v56  ;;  %v5376_v57 = vpop.f32.mrb[165].mxu0 }
 0x87f   : > { %v5377_v60 = vadd.f32 %v5808_v56, %v5376_v57 }
 0x880   : > { %5416 = vst.msk [vmem:[%s451_s30 + $0x8] sm:$0xff] %vm745_vm2, %v5382_v8 }
 0x881   : > { %5415 = vst.msk [vmem:[%s451_s30] sm:$0xff] %vm745_vm2, %v5377_v60 }
 0x885   : > { %v7154_v38 = vpop.f32.mrb[166].mxu0 }
 0x886   : > { %v5392_v50 = vadd.f32 %v7154_v38, %v5808_v56  ;;  %v5386_v61 = vpop.f32.mrb[167].mxu0 }
 0x887   : > { %v5387_v62 = vadd.f32 %v5808_v56, %v5386_v61 }
 0x888   : > { %5418 = vst.msk [vmem:[%s451_s30 + $0x18] sm:$0xff] %vm745_vm2, %v5392_v50 }
 0x889   : > { %5417 = vst.msk [vmem:[%s451_s30 + $0x10] sm:$0xff] %vm745_vm2, %v5387_v62 }
 0x88d   : > { %v7157_v63 = vpop.f32.mrb[168].mxu0 }
 0x88e   : > { %v5402_v0 = vadd.f32 %v7157_v63, %v5808_v56  ;;  %v5396_v1 = vpop.f32.mrb[169].mxu0 }
 0x88f   : > { %v5397_v2 = vadd.f32 %v5808_v56, %v5396_v1 }
 0x890   : > { %5420 = vst.msk [vmem:[%s451_s30 + $0x28] sm:$0xff] %vm745_vm2, %v5402_v0 }
 0x891   : > { %5419 = vst.msk [vmem:[%s451_s30 + $0x20] sm:$0xff] %vm745_vm2, %v5397_v2 }
 0x895   : > { %v7160_v3 = vpop.f32.mrb[170].mxu0 }
 0x896   : > { %v5412_v4 = vadd.f32 %v7160_v3, %v5808_v56  ;;  %v5406_v6 = vpop.f32.mrb[171].mxu0 }
 0x897   : > { %v5407_v7 = vadd.f32 %v5808_v56, %v5406_v6 }
 0x898   : > { %5422 = vst.msk [vmem:[%s451_s30 + $0x38] sm:$0xff] %vm745_vm2, %v5412_v4 }
 0x899   : > { %5421 = vst.msk [vmem:[%s451_s30 + $0x30] sm:$0xff] %vm745_vm2, %v5407_v7 }
 0x89a PF: > { %s25_s21 = sadd.s32 1, %s7690_s21  }
 0x89b   : > { %p22_p5 = scmp.ge.s32.totalorder %s25_s21, 4  }
 0x89d   :  { %24 = sbr.rel (!%p22_p5) target bundleno = 2 (0x2), region = 139 }
 0x8a4   :  { %5460 = vsyncpa [#allocation4], 1 }
 0x8a5   :  { %5462 = vsyncpa [#allocation4 + $0x1], 1 }
 0x8a6   :  { %5463 = vsyncpa [#allocation6], 1 }

</bundles_post_ra>
